<compile_context>
chip_gen: v7x
topology: tpu7x:2x2x1
jax: 0.10.0
libtpu: 0.0.40
codegen_flags: <defaults>
</compile_context>

<pallas_src>
import math

import jax
import jax.numpy as jnp
from jax.experimental import pallas as pl
from jax.experimental.pallas import tpu as pltpu

# ---------------- model configuration (small, synthetic) ----------------
VOCAB = 30          # config['vocab_size']
HIDDEN = 32         # config['bert_hidden_size']
N_HEADS = 4
HEAD_DIM = HIDDEN // N_HEADS
INTER = 64          # BERT intermediate size
N_LAYERS = 2
MAX_POS = 16
TYPE_VOCAB = 2
CLASS_NUM = 9       # config['class_num']
CLS_PAD = 128       # classifier logits padded to a full 128-lane width (lane-dense store)
LN_EPS = 1e-12
ATT_SCALE = 1.0 / math.sqrt(HEAD_DIM)

BATCH = 2
SEQ = 8


# ----------------------------- in-kernel helpers -----------------------------

def _erf(x):
    # Abramowitz & Stegun 7.1.26, |err| < 1.5e-7 — exact-GELU numerics without depending
    # on a lax.erf lowering.  The reciprocal goes to the EUP slot via pl.reciprocal.
    p = 0.3275911
    a1, a2, a3, a4, a5 = 0.254829592, -0.284496736, 1.421413741, -1.453152027, 1.061405429
    ax = jnp.abs(x)
    t = pl.reciprocal(1.0 + p * ax, approx=False)
    poly = t * (a1 + t * (a2 + t * (a3 + t * (a4 + t * a5))))
    y = 1.0 - poly * jnp.exp(-ax * ax)
    return jnp.where(x >= 0.0, y, -y)


def _gelu_exact(x):
    # PyTorch / HF BERT GELU (erf form, approximate=False).
    return 0.5 * x * (1.0 + _erf(x * (1.0 / math.sqrt(2.0))))


def _layernorm(x, g, b):
    mean = jnp.mean(x, axis=-1, keepdims=True)
    var = jnp.mean(jnp.square(x - mean), axis=-1, keepdims=True)
    return (x - mean) * jax.lax.rsqrt(var + LN_EPS) * g + b


def _softmax_lastdim(s):
    s = s - jnp.max(s, axis=-1, keepdims=True)
    p = jnp.exp(s)
    return p * pl.reciprocal(jnp.sum(p, axis=-1, keepdims=True), approx=True)


def _bf16(x):
    return x.astype(jnp.bfloat16)


# ----------------------------- fused BERT kernel -----------------------------

def _bert_fused_kernel(
    emb_ref,                        # [B*S, H]  f32  embedding sum (word + pos + type)
    emb_g_ref, emb_b_ref,           # [1, H]    f32
    wqkv_ref, bqkv_ref,             # [L, H, 3H] bf16, [L, 1, 3H] f32  (scale folded in Q)
    wo_ref, bo_ref,                 # [L, H, H]  bf16, [L, 1, H]  f32
    ln1_g_ref, ln1_b_ref,           # [L, 1, H]  f32
    w1_ref, b1_ref,                 # [L, H, I]  bf16, [L, 1, I]  f32
    w2_ref, b2_ref,                 # [L, I, H]  bf16, [L, 1, H]  f32
    ln2_g_ref, ln2_b_ref,           # [L, 1, H]  f32
    cls_w_ref, cls_b_ref,           # [H, CLS_PAD] bf16, [1, CLS_PAD] f32
    out_ref,                        # [B*S, CLS_PAD] f32
):
    # Embedding LayerNorm (f32).
    h = _layernorm(emb_ref[...], emb_g_ref[...], emb_b_ref[...])            # [BS, H]

    for l in range(N_LAYERS):                                                # static unroll
        # ---- fused QKV projection: one bf16 MXU op with N = 3H ----
        qkv = jnp.dot(_bf16(h), wqkv_ref[l],
                      preferred_element_type=jnp.float32) + bqkv_ref[l]      # [BS, 3H]
        q = qkv[:, 0 * HIDDEN:1 * HIDDEN]     # already scaled by 1/sqrt(HEAD_DIM)
        k = qkv[:, 1 * HIDDEN:2 * HIDDEN]
        v = qkv[:, 2 * HIDDEN:3 * HIDDEN]

        # ---- multi-head self-attention (no mask: reference calls bert(x) w/o mask).
        # Static Python loop over batch elements (8-row sublane slices) and heads.
        # Per-head contexts are concatenated lane-contiguously and the head merge is done
        # with a single [BS,H] @ [H,H] output projection after the loops.
        ctx_rows = []
        for b in range(BATCH):
            r0 = b * SEQ
            ctx_heads = []
            for hh in range(N_HEADS):
                c = hh * HEAD_DIM
                qh = _bf16(q[r0:r0 + SEQ, c:c + HEAD_DIM])
                kh = _bf16(k[r0:r0 + SEQ, c:c + HEAD_DIM])
                vh = _bf16(v[r0:r0 + SEQ, c:c + HEAD_DIM])
                # contract on dim 1 of BOTH operands: no transpose of kh needed.
                s = jax.lax.dot_general(qh, kh, (((1,), (1,)), ((), ())),
                                        preferred_element_type=jnp.float32)  # [S, S]
                p = _softmax_lastdim(s)
                ctx_heads.append(jnp.dot(_bf16(p), vh,
                                         preferred_element_type=jnp.float32))  # [S, HD]
            ctx_rows.append(jnp.concatenate(ctx_heads, axis=-1))             # [S, H]
        ctx = jnp.concatenate(ctx_rows, axis=0)                               # [BS, H]

        attn = jnp.dot(_bf16(ctx), wo_ref[l],
                       preferred_element_type=jnp.float32) + bo_ref[l]        # [BS, H]

        # ---- residual + LayerNorm fused ----
        h = _layernorm(attn + h, ln1_g_ref[l], ln1_b_ref[l])

        # ---- feed-forward: GELU(exact) ----
        ff = jnp.dot(_bf16(h), w1_ref[l],
                     preferred_element_type=jnp.float32) + b1_ref[l]           # [BS, I]
        ff = _gelu_exact(ff)
        ff = jnp.dot(_bf16(ff), w2_ref[l],
                     preferred_element_type=jnp.float32) + b2_ref[l]           # [BS, H]
        h = _layernorm(ff + h, ln2_g_ref[l], ln2_b_ref[l])

    # ---- classifier head: lane-dense padded output (unmasked 128-lane stores) ----
    out_ref[...] = (jnp.dot(_bf16(h), cls_w_ref[...],
                            preferred_element_type=jnp.float32) + cls_b_ref[...])


def bert_ner_logits(packed, emb_sum, B, S):
    """emb_sum: [B*S, H] float32 (word + pos + type embeddings, pre-LN)."""
    assert B == BATCH and S == SEQ
    M = B * S
    full2 = lambda i: (0, 0)
    full3 = lambda i: (0, 0, 0)
    in_specs = [
        pl.BlockSpec((M, HIDDEN), full2),                            # emb (all rows)
        pl.BlockSpec((1, HIDDEN), full2),                            # emb_ln_g
        pl.BlockSpec((1, HIDDEN), full2),                            # emb_ln_b
        pl.BlockSpec((N_LAYERS, HIDDEN, 3 * HIDDEN), full3),         # wqkv (bf16)
        pl.BlockSpec((N_LAYERS, 1, 3 * HIDDEN), full3),              # bqkv
        pl.BlockSpec((N_LAYERS, HIDDEN, HIDDEN), full3),             # wo (bf16)
        pl.BlockSpec((N_LAYERS, 1, HIDDEN), full3),                  # bo
        pl.BlockSpec((N_LAYERS, 1, HIDDEN), full3),                  # ln1_g
        pl.BlockSpec((N_LAYERS, 1, HIDDEN), full3),                  # ln1_b
        pl.BlockSpec((N_LAYERS, HIDDEN, INTER), full3),              # w1 (bf16)
        pl.BlockSpec((N_LAYERS, 1, INTER), full3),                   # b1
        pl.BlockSpec((N_LAYERS, INTER, HIDDEN), full3),              # w2 (bf16)
        pl.BlockSpec((N_LAYERS, 1, HIDDEN), full3),                  # b2
        pl.BlockSpec((N_LAYERS, 1, HIDDEN), full3),                  # ln2_g
        pl.BlockSpec((N_LAYERS, 1, HIDDEN), full3),                  # ln2_b
        pl.BlockSpec((HIDDEN, CLS_PAD), full2),                      # cls_w (bf16, padded)
        pl.BlockSpec((1, CLS_PAD), full2),                           # cls_b (padded)
    ]
    out = pl.pallas_call(
        _bert_fused_kernel,
        grid=(1,),                                                   # single fused step
        in_specs=in_specs,
        out_specs=pl.BlockSpec((M, CLS_PAD), full2),
        out_shape=jax.ShapeDtypeStruct((M, CLS_PAD), jnp.float32),
    )(
        emb_sum,
        packed["emb_ln_g"], packed["emb_ln_b"],
        packed["wqkv"], packed["bqkv"],
        packed["wo"], packed["bo"],
        packed["ln1_g"], packed["ln1_b"],
        packed["w1"], packed["b1"],
        packed["w2"], packed["b2"],
        packed["ln2_g"], packed["ln2_b"],
        packed["cls_w"], packed["cls_b"],
    )
    return out[:, :CLASS_NUM].reshape(B, S, CLASS_NUM)


# ------------------------- parameter initialization -------------------------

def init_params(key):
    n_keys = 4 + 6 * N_LAYERS
    keys = iter(jax.random.split(key, n_keys))

    def nrm(k, shape):
        return 0.02 * jax.random.normal(k, shape, jnp.float32)

    params = {
        "word_emb": nrm(next(keys), (VOCAB, HIDDEN)).at[0].set(0.0),  # padding_idx=0
        "pos_emb": nrm(next(keys), (MAX_POS, HIDDEN)),
        "type_emb": nrm(next(keys), (TYPE_VOCAB, HIDDEN)),
        "emb_ln_g": jnp.ones((HIDDEN,), jnp.float32),
        "emb_ln_b": jnp.zeros((HIDDEN,), jnp.float32),
        "cls_w": nrm(next(keys), (HIDDEN, CLASS_NUM)),     # nn.Linear(hidden, class_num)
        "cls_b": jnp.zeros((CLASS_NUM,), jnp.float32),
        "layers": [],
    }
    for _ in range(N_LAYERS):
        params["layers"].append({
            "wq": nrm(next(keys), (HIDDEN, HIDDEN)), "bq": jnp.zeros((HIDDEN,), jnp.float32),
            "wk": nrm(next(keys), (HIDDEN, HIDDEN)), "bk": jnp.zeros((HIDDEN,), jnp.float32),
            "wv": nrm(next(keys), (HIDDEN, HIDDEN)), "bv": jnp.zeros((HIDDEN,), jnp.float32),
            "wo": nrm(next(keys), (HIDDEN, HIDDEN)), "bo": jnp.zeros((HIDDEN,), jnp.float32),
            "ln1_g": jnp.ones((HIDDEN,), jnp.float32), "ln1_b": jnp.zeros((HIDDEN,), jnp.float32),
            "w1": nrm(next(keys), (HIDDEN, INTER)), "b1": jnp.zeros((INTER,), jnp.float32),
            "w2": nrm(next(keys), (INTER, HIDDEN)), "b2": jnp.zeros((HIDDEN,), jnp.float32),
            "ln2_g": jnp.ones((HIDDEN,), jnp.float32), "ln2_b": jnp.zeros((HIDDEN,), jnp.float32),
        })
    return params


def pack_params(params):
    """Stack per-layer weights into [L, ...], fuse QKV (scale folded into Q), cast matmul
    weights to bf16, and pad the classifier to a lane-dense 128-wide output."""
    L = params["layers"]
    bf = lambda a: a.astype(jnp.bfloat16)
    stack2_bf = lambda name: bf(jnp.stack([lp[name] for lp in L]))             # [L, K, N]
    stack_row = lambda name: jnp.stack([lp[name][None, :] for lp in L])        # [L, 1, N]
    wqkv = jnp.stack([jnp.concatenate(
        [lp["wq"] * ATT_SCALE, lp["wk"], lp["wv"]], axis=1) for lp in L])      # [L, H, 3H]
    bqkv = jnp.stack([jnp.concatenate(
        [lp["bq"] * ATT_SCALE, lp["bk"], lp["bv"]])[None, :] for lp in L])     # [L, 1, 3H]
    return {
        "word_emb": params["word_emb"],
        "pos_emb": params["pos_emb"],
        "type_emb": params["type_emb"],
        "emb_ln_g": params["emb_ln_g"].reshape(1, HIDDEN),
        "emb_ln_b": params["emb_ln_b"].reshape(1, HIDDEN),
        "wqkv": bf(wqkv), "bqkv": bqkv,
        "wo": stack2_bf("wo"), "bo": stack_row("bo"),
        "ln1_g": stack_row("ln1_g"), "ln1_b": stack_row("ln1_b"),
        "w1": stack2_bf("w1"), "b1": stack_row("b1"),
        "w2": stack2_bf("w2"), "b2": stack_row("b2"),
        "ln2_g": stack_row("ln2_g"), "ln2_b": stack_row("ln2_b"),
        "cls_w": bf(jnp.pad(params["cls_w"], ((0, 0), (0, CLS_PAD - CLASS_NUM)))),  # [H,128]
        "cls_b": jnp.pad(params["cls_b"], (0, CLS_PAD - CLASS_NUM)).reshape(1, CLS_PAD),
    }


# ------------------------------- forward pass -------------------------------

def torch_model_forward(packed, token_ids):
    """Equivalent of TorchModel.forward(x) with target=None, use_crf=False."""
    B, S = token_ids.shape
    assert S <= MAX_POS, f"sequence length {S} exceeds MAX_POS={MAX_POS}"
    # Embedding gathers are glue, done in plain JAX (token_type_ids == 0, no attention
    # mask, matching `self.bert(x)` with defaults).
    word = jnp.take(packed["word_emb"], token_ids, axis=0)        # [B, S, H]
    pos = packed["pos_emb"][:S][None, :, :]                       # [1, S, H]
    tok = packed["type_emb"][0][None, None, :]                    # [1, 1, H]
    emb_sum = (word + pos + tok).reshape(B * S, HIDDEN)
    return bert_ner_logits(packed, emb_sum, B, S)


if __name__ == "__main__":
    key = jax.random.PRNGKey(0)
    pkey, dkey = jax.random.split(key)
    params = init_params(pkey)
    packed = pack_params(params)

    token_ids = jax.random.randint(dkey, (BATCH, SEQ), 1, VOCAB, dtype=jnp.int32)

    out = jax.jit(torch_model_forward)(packed, token_ids)
    jax.block_until_ready(out)
    assert out.shape == (BATCH, SEQ, CLASS_NUM), out.shape
    assert bool(jnp.all(jnp.isfinite(out)))
    print("KERNEL_OK")
</pallas_src>

<mosaic_0001>
module attributes {stable_mosaic.version = 11 : i64} {
  func.func @_bert_fused_kernel(%arg0: i32, %arg1: memref<16x32xf32, #tpu.memory_space<vmem>>, %arg2: memref<1x32xf32, #tpu.memory_space<vmem>>, %arg3: memref<1x32xf32, #tpu.memory_space<vmem>>, %arg4: memref<2x32x96xbf16, #tpu.memory_space<vmem>>, %arg5: memref<2x1x96xf32, #tpu.memory_space<vmem>>, %arg6: memref<2x32x32xbf16, #tpu.memory_space<vmem>>, %arg7: memref<2x1x32xf32, #tpu.memory_space<vmem>>, %arg8: memref<2x1x32xf32, #tpu.memory_space<vmem>>, %arg9: memref<2x1x32xf32, #tpu.memory_space<vmem>>, %arg10: memref<2x32x64xbf16, #tpu.memory_space<vmem>>, %arg11: memref<2x1x64xf32, #tpu.memory_space<vmem>>, %arg12: memref<2x64x32xbf16, #tpu.memory_space<vmem>>, %arg13: memref<2x1x32xf32, #tpu.memory_space<vmem>>, %arg14: memref<2x1x32xf32, #tpu.memory_space<vmem>>, %arg15: memref<2x1x32xf32, #tpu.memory_space<vmem>>, %arg16: memref<32x128xbf16, #tpu.memory_space<vmem>>, %arg17: memref<1x128xf32, #tpu.memory_space<vmem>>, %arg18: memref<16x128xf32, #tpu.memory_space<vmem>>) attributes {dimension_semantics = [#tpu.dimension_semantics<arbitrary>], iteration_bounds = array<i64: 1>, scalar_prefetch = 0 : i64, scratch_operands = 0 : i64, tpu.core_type = #tpu.core_type<tc>, window_params = [{pipeline_mode = #tpu.pipeline_mode<synchronous>, transform_indices = @transform_0, window_bounds = array<i64: 16, 32>}, {pipeline_mode = #tpu.pipeline_mode<synchronous>, transform_indices = @transform_1, window_bounds = array<i64: 1, 32>}, {pipeline_mode = #tpu.pipeline_mode<synchronous>, transform_indices = @transform_2, window_bounds = array<i64: 1, 32>}, {pipeline_mode = #tpu.pipeline_mode<synchronous>, transform_indices = @transform_3, window_bounds = array<i64: 2, 32, 96>}, {pipeline_mode = #tpu.pipeline_mode<synchronous>, transform_indices = @transform_4, window_bounds = array<i64: 2, 1, 96>}, {pipeline_mode = #tpu.pipeline_mode<synchronous>, transform_indices = @transform_5, window_bounds = array<i64: 2, 32, 32>}, {pipeline_mode = #tpu.pipeline_mode<synchronous>, transform_indices = @transform_6, window_bounds = array<i64: 2, 1, 32>}, {pipeline_mode = #tpu.pipeline_mode<synchronous>, transform_indices = @transform_7, window_bounds = array<i64: 2, 1, 32>}, {pipeline_mode = #tpu.pipeline_mode<synchronous>, transform_indices = @transform_8, window_bounds = array<i64: 2, 1, 32>}, {pipeline_mode = #tpu.pipeline_mode<synchronous>, transform_indices = @transform_9, window_bounds = array<i64: 2, 32, 64>}, {pipeline_mode = #tpu.pipeline_mode<synchronous>, transform_indices = @transform_10, window_bounds = array<i64: 2, 1, 64>}, {pipeline_mode = #tpu.pipeline_mode<synchronous>, transform_indices = @transform_11, window_bounds = array<i64: 2, 64, 32>}, {pipeline_mode = #tpu.pipeline_mode<synchronous>, transform_indices = @transform_12, window_bounds = array<i64: 2, 1, 32>}, {pipeline_mode = #tpu.pipeline_mode<synchronous>, transform_indices = @transform_13, window_bounds = array<i64: 2, 1, 32>}, {pipeline_mode = #tpu.pipeline_mode<synchronous>, transform_indices = @transform_14, window_bounds = array<i64: 2, 1, 32>}, {pipeline_mode = #tpu.pipeline_mode<synchronous>, transform_indices = @transform_15, window_bounds = array<i64: 32, 128>}, {pipeline_mode = #tpu.pipeline_mode<synchronous>, transform_indices = @transform_16, window_bounds = array<i64: 1, 128>}, {pipeline_mode = #tpu.pipeline_mode<synchronous>, transform_indices = @transform_17, window_bounds = array<i64: 16, 128>}]} {
    %c0 = arith.constant 0 : index
    %c0_0 = arith.constant 0 : index
    %0 = vector.load %arg1[%c0, %c0_0] : memref<16x32xf32, #tpu.memory_space<vmem>>, vector<16x32xf32>
    %c0_1 = arith.constant 0 : index
    %c0_2 = arith.constant 0 : index
    %1 = vector.load %arg2[%c0_1, %c0_2] : memref<1x32xf32, #tpu.memory_space<vmem>>, vector<1x32xf32>
    %c0_3 = arith.constant 0 : index
    %c0_4 = arith.constant 0 : index
    %2 = vector.load %arg3[%c0_3, %c0_4] : memref<1x32xf32, #tpu.memory_space<vmem>>, vector<1x32xf32>
    %cst = arith.constant dense<0.000000e+00> : vector<16xf32>
    %3 = vector.multi_reduction <add>, %0, %cst [1] : vector<16x32xf32> to vector<16xf32>
    %4 = vector.shape_cast %3 : vector<16xf32> to vector<16x1xf32>
    %cst_5 = arith.constant 3.200000e+01 : f32
    %5 = vector.broadcast %cst_5 : f32 to vector<16x1xf32>
    %6 = arith.divf %4, %5 : vector<16x1xf32>
    %7 = vector.broadcast %6 : vector<16x1xf32> to vector<16x32xf32>
    %8 = arith.subf %0, %7 : vector<16x32xf32>
    %9 = arith.mulf %8, %8 : vector<16x32xf32>
    %cst_6 = arith.constant dense<0.000000e+00> : vector<16xf32>
    %10 = vector.multi_reduction <add>, %9, %cst_6 [1] : vector<16x32xf32> to vector<16xf32>
    %11 = vector.shape_cast %10 : vector<16xf32> to vector<16x1xf32>
    %cst_7 = arith.constant 3.200000e+01 : f32
    %12 = vector.broadcast %cst_7 : f32 to vector<16x1xf32>
    %13 = arith.divf %11, %12 : vector<16x1xf32>
    %14 = vector.broadcast %6 : vector<16x1xf32> to vector<16x32xf32>
    %15 = arith.subf %0, %14 : vector<16x32xf32>
    %cst_8 = arith.constant 9.99999996E-13 : f32
    %16 = vector.broadcast %cst_8 : f32 to vector<16x1xf32>
    %17 = arith.addf %13, %16 : vector<16x1xf32>
    %18 = math.rsqrt %17 : vector<16x1xf32>
    %19 = vector.broadcast %18 : vector<16x1xf32> to vector<16x32xf32>
    %20 = arith.mulf %15, %19 : vector<16x32xf32>
    %21 = vector.broadcast %1 : vector<1x32xf32> to vector<16x32xf32>
    %22 = arith.mulf %20, %21 : vector<16x32xf32>
    %23 = vector.broadcast %2 : vector<1x32xf32> to vector<16x32xf32>
    %24 = arith.addf %22, %23 : vector<16x32xf32>
    %25 = arith.truncf %24 : vector<16x32xf32> to vector<16x32xbf16>
    %c0_9 = arith.constant 0 : index
    %c0_10 = arith.constant 0 : index
    %c0_11 = arith.constant 0 : index
    %26 = vector.load %arg4[%c0_9, %c0_10, %c0_11] : memref<2x32x96xbf16, #tpu.memory_space<vmem>>, vector<1x32x96xbf16>
    %27 = vector.shape_cast %26 : vector<1x32x96xbf16> to vector<32x96xbf16>
    %cst_12 = arith.constant dense<0.000000e+00> : vector<16x96xf32>
    %28 = tpu.matmul %25, %27, %cst_12 {dimension_numbers = #tpu.dot_dimension_numbers<[1], [0], [0], [1], [0, 0, 1, 1], [], []>} : vector<16x32xbf16>, vector<32x96xbf16>, vector<16x96xf32> -> vector<16x96xf32>
    %c0_13 = arith.constant 0 : index
    %c0_14 = arith.constant 0 : index
    %c0_15 = arith.constant 0 : index
    %29 = vector.load %arg5[%c0_13, %c0_14, %c0_15] : memref<2x1x96xf32, #tpu.memory_space<vmem>>, vector<1x1x96xf32>
    %30 = vector.shape_cast %29 : vector<1x1x96xf32> to vector<1x96xf32>
    %31 = vector.broadcast %30 : vector<1x96xf32> to vector<16x96xf32>
    %32 = arith.addf %28, %31 : vector<16x96xf32>
    %33 = vector.extract_strided_slice %32 {offsets = [0, 0], sizes = [16, 32], strides = [1, 1]} : vector<16x96xf32> to vector<16x32xf32>
    %34 = vector.extract_strided_slice %32 {offsets = [0, 32], sizes = [16, 32], strides = [1, 1]} : vector<16x96xf32> to vector<16x32xf32>
    %35 = vector.extract_strided_slice %32 {offsets = [0, 64], sizes = [16, 32], strides = [1, 1]} : vector<16x96xf32> to vector<16x32xf32>
    %36 = vector.extract_strided_slice %33 {offsets = [0, 0], sizes = [8, 8], strides = [1, 1]} : vector<16x32xf32> to vector<8x8xf32>
    %37 = arith.truncf %36 : vector<8x8xf32> to vector<8x8xbf16>
    %38 = vector.extract_strided_slice %34 {offsets = [0, 0], sizes = [8, 8], strides = [1, 1]} : vector<16x32xf32> to vector<8x8xf32>
    %39 = arith.truncf %38 : vector<8x8xf32> to vector<8x8xbf16>
    %40 = vector.extract_strided_slice %35 {offsets = [0, 0], sizes = [8, 8], strides = [1, 1]} : vector<16x32xf32> to vector<8x8xf32>
    %41 = arith.truncf %40 : vector<8x8xf32> to vector<8x8xbf16>
    %cst_16 = arith.constant dense<0.000000e+00> : vector<8x8xf32>
    %42 = tpu.matmul %37, %39, %cst_16 {dimension_numbers = #tpu.dot_dimension_numbers<[1], [1], [0], [0], [0, 0, 1, 0], [], []>} : vector<8x8xbf16>, vector<8x8xbf16>, vector<8x8xf32> -> vector<8x8xf32>
    %cst_17 = arith.constant dense<0xFF800000> : vector<8xf32>
    %43 = vector.multi_reduction <maximumf>, %42, %cst_17 [1] : vector<8x8xf32> to vector<8xf32>
    %44 = vector.shape_cast %43 : vector<8xf32> to vector<8x1xf32>
    %45 = vector.broadcast %44 : vector<8x1xf32> to vector<8x8xf32>
    %46 = arith.subf %42, %45 : vector<8x8xf32>
    %47 = math.exp %46 : vector<8x8xf32>
    %cst_18 = arith.constant dense<0.000000e+00> : vector<8xf32>
    %48 = vector.multi_reduction <add>, %47, %cst_18 [1] : vector<8x8xf32> to vector<8xf32>
    %49 = vector.shape_cast %48 : vector<8xf32> to vector<8x1xf32>
    %50 = tpu.reciprocal %49 {approx = true} : vector<8x1xf32> -> vector<8x1xf32>
    %51 = vector.broadcast %50 : vector<8x1xf32> to vector<8x8xf32>
    %52 = arith.mulf %47, %51 : vector<8x8xf32>
    %53 = arith.truncf %52 : vector<8x8xf32> to vector<8x8xbf16>
    %cst_19 = arith.constant dense<0.000000e+00> : vector<8x8xf32>
    %54 = tpu.matmul %53, %41, %cst_19 {dimension_numbers = #tpu.dot_dimension_numbers<[1], [0], [0], [1], [0, 0, 1, 1], [], []>} : vector<8x8xbf16>, vector<8x8xbf16>, vector<8x8xf32> -> vector<8x8xf32>
    %55 = vector.extract_strided_slice %33 {offsets = [0, 8], sizes = [8, 8], strides = [1, 1]} : vector<16x32xf32> to vector<8x8xf32>
    %56 = arith.truncf %55 : vector<8x8xf32> to vector<8x8xbf16>
    %57 = vector.extract_strided_slice %34 {offsets = [0, 8], sizes = [8, 8], strides = [1, 1]} : vector<16x32xf32> to vector<8x8xf32>
    %58 = arith.truncf %57 : vector<8x8xf32> to vector<8x8xbf16>
    %59 = vector.extract_strided_slice %35 {offsets = [0, 8], sizes = [8, 8], strides = [1, 1]} : vector<16x32xf32> to vector<8x8xf32>
    %60 = arith.truncf %59 : vector<8x8xf32> to vector<8x8xbf16>
    %cst_20 = arith.constant dense<0.000000e+00> : vector<8x8xf32>
    %61 = tpu.matmul %56, %58, %cst_20 {dimension_numbers = #tpu.dot_dimension_numbers<[1], [1], [0], [0], [0, 0, 1, 0], [], []>} : vector<8x8xbf16>, vector<8x8xbf16>, vector<8x8xf32> -> vector<8x8xf32>
    %cst_21 = arith.constant dense<0xFF800000> : vector<8xf32>
    %62 = vector.multi_reduction <maximumf>, %61, %cst_21 [1] : vector<8x8xf32> to vector<8xf32>
    %63 = vector.shape_cast %62 : vector<8xf32> to vector<8x1xf32>
    %64 = vector.broadcast %63 : vector<8x1xf32> to vector<8x8xf32>
    %65 = arith.subf %61, %64 : vector<8x8xf32>
    %66 = math.exp %65 : vector<8x8xf32>
    %cst_22 = arith.constant dense<0.000000e+00> : vector<8xf32>
    %67 = vector.multi_reduction <add>, %66, %cst_22 [1] : vector<8x8xf32> to vector<8xf32>
    %68 = vector.shape_cast %67 : vector<8xf32> to vector<8x1xf32>
    %69 = tpu.reciprocal %68 {approx = true} : vector<8x1xf32> -> vector<8x1xf32>
    %70 = vector.broadcast %69 : vector<8x1xf32> to vector<8x8xf32>
    %71 = arith.mulf %66, %70 : vector<8x8xf32>
    %72 = arith.truncf %71 : vector<8x8xf32> to vector<8x8xbf16>
    %cst_23 = arith.constant dense<0.000000e+00> : vector<8x8xf32>
    %73 = tpu.matmul %72, %60, %cst_23 {dimension_numbers = #tpu.dot_dimension_numbers<[1], [0], [0], [1], [0, 0, 1, 1], [], []>} : vector<8x8xbf16>, vector<8x8xbf16>, vector<8x8xf32> -> vector<8x8xf32>
    %74 = vector.extract_strided_slice %33 {offsets = [0, 16], sizes = [8, 8], strides = [1, 1]} : vector<16x32xf32> to vector<8x8xf32>
    %75 = arith.truncf %74 : vector<8x8xf32> to vector<8x8xbf16>
    %76 = vector.extract_strided_slice %34 {offsets = [0, 16], sizes = [8, 8], strides = [1, 1]} : vector<16x32xf32> to vector<8x8xf32>
    %77 = arith.truncf %76 : vector<8x8xf32> to vector<8x8xbf16>
    %78 = vector.extract_strided_slice %35 {offsets = [0, 16], sizes = [8, 8], strides = [1, 1]} : vector<16x32xf32> to vector<8x8xf32>
    %79 = arith.truncf %78 : vector<8x8xf32> to vector<8x8xbf16>
    %cst_24 = arith.constant dense<0.000000e+00> : vector<8x8xf32>
    %80 = tpu.matmul %75, %77, %cst_24 {dimension_numbers = #tpu.dot_dimension_numbers<[1], [1], [0], [0], [0, 0, 1, 0], [], []>} : vector<8x8xbf16>, vector<8x8xbf16>, vector<8x8xf32> -> vector<8x8xf32>
    %cst_25 = arith.constant dense<0xFF800000> : vector<8xf32>
    %81 = vector.multi_reduction <maximumf>, %80, %cst_25 [1] : vector<8x8xf32> to vector<8xf32>
    %82 = vector.shape_cast %81 : vector<8xf32> to vector<8x1xf32>
    %83 = vector.broadcast %82 : vector<8x1xf32> to vector<8x8xf32>
    %84 = arith.subf %80, %83 : vector<8x8xf32>
    %85 = math.exp %84 : vector<8x8xf32>
    %cst_26 = arith.constant dense<0.000000e+00> : vector<8xf32>
    %86 = vector.multi_reduction <add>, %85, %cst_26 [1] : vector<8x8xf32> to vector<8xf32>
    %87 = vector.shape_cast %86 : vector<8xf32> to vector<8x1xf32>
    %88 = tpu.reciprocal %87 {approx = true} : vector<8x1xf32> -> vector<8x1xf32>
    %89 = vector.broadcast %88 : vector<8x1xf32> to vector<8x8xf32>
    %90 = arith.mulf %85, %89 : vector<8x8xf32>
    %91 = arith.truncf %90 : vector<8x8xf32> to vector<8x8xbf16>
    %cst_27 = arith.constant dense<0.000000e+00> : vector<8x8xf32>
    %92 = tpu.matmul %91, %79, %cst_27 {dimension_numbers = #tpu.dot_dimension_numbers<[1], [0], [0], [1], [0, 0, 1, 1], [], []>} : vector<8x8xbf16>, vector<8x8xbf16>, vector<8x8xf32> -> vector<8x8xf32>
    %93 = vector.extract_strided_slice %33 {offsets = [0, 24], sizes = [8, 8], strides = [1, 1]} : vector<16x32xf32> to vector<8x8xf32>
    %94 = arith.truncf %93 : vector<8x8xf32> to vector<8x8xbf16>
    %95 = vector.extract_strided_slice %34 {offsets = [0, 24], sizes = [8, 8], strides = [1, 1]} : vector<16x32xf32> to vector<8x8xf32>
    %96 = arith.truncf %95 : vector<8x8xf32> to vector<8x8xbf16>
    %97 = vector.extract_strided_slice %35 {offsets = [0, 24], sizes = [8, 8], strides = [1, 1]} : vector<16x32xf32> to vector<8x8xf32>
    %98 = arith.truncf %97 : vector<8x8xf32> to vector<8x8xbf16>
    %cst_28 = arith.constant dense<0.000000e+00> : vector<8x8xf32>
    %99 = tpu.matmul %94, %96, %cst_28 {dimension_numbers = #tpu.dot_dimension_numbers<[1], [1], [0], [0], [0, 0, 1, 0], [], []>} : vector<8x8xbf16>, vector<8x8xbf16>, vector<8x8xf32> -> vector<8x8xf32>
    %cst_29 = arith.constant dense<0xFF800000> : vector<8xf32>
    %100 = vector.multi_reduction <maximumf>, %99, %cst_29 [1] : vector<8x8xf32> to vector<8xf32>
    %101 = vector.shape_cast %100 : vector<8xf32> to vector<8x1xf32>
    %102 = vector.broadcast %101 : vector<8x1xf32> to vector<8x8xf32>
    %103 = arith.subf %99, %102 : vector<8x8xf32>
    %104 = math.exp %103 : vector<8x8xf32>
    %cst_30 = arith.constant dense<0.000000e+00> : vector<8xf32>
    %105 = vector.multi_reduction <add>, %104, %cst_30 [1] : vector<8x8xf32> to vector<8xf32>
    %106 = vector.shape_cast %105 : vector<8xf32> to vector<8x1xf32>
    %107 = tpu.reciprocal %106 {approx = true} : vector<8x1xf32> -> vector<8x1xf32>
    %108 = vector.broadcast %107 : vector<8x1xf32> to vector<8x8xf32>
    %109 = arith.mulf %104, %108 : vector<8x8xf32>
    %110 = arith.truncf %109 : vector<8x8xf32> to vector<8x8xbf16>
    %cst_31 = arith.constant dense<0.000000e+00> : vector<8x8xf32>
    %111 = tpu.matmul %110, %98, %cst_31 {dimension_numbers = #tpu.dot_dimension_numbers<[1], [0], [0], [1], [0, 0, 1, 1], [], []>} : vector<8x8xbf16>, vector<8x8xbf16>, vector<8x8xf32> -> vector<8x8xf32>
    %112 = tpu.concatenate %54, %73, %92, %111 in 1 : vector<8x8xf32>, vector<8x8xf32>, vector<8x8xf32>, vector<8x8xf32> -> vector<8x32xf32>
    %113 = vector.extract_strided_slice %33 {offsets = [8, 0], sizes = [8, 8], strides = [1, 1]} : vector<16x32xf32> to vector<8x8xf32>
    %114 = arith.truncf %113 : vector<8x8xf32> to vector<8x8xbf16>
    %115 = vector.extract_strided_slice %34 {offsets = [8, 0], sizes = [8, 8], strides = [1, 1]} : vector<16x32xf32> to vector<8x8xf32>
    %116 = arith.truncf %115 : vector<8x8xf32> to vector<8x8xbf16>
    %117 = vector.extract_strided_slice %35 {offsets = [8, 0], sizes = [8, 8], strides = [1, 1]} : vector<16x32xf32> to vector<8x8xf32>
    %118 = arith.truncf %117 : vector<8x8xf32> to vector<8x8xbf16>
    %cst_32 = arith.constant dense<0.000000e+00> : vector<8x8xf32>
    %119 = tpu.matmul %114, %116, %cst_32 {dimension_numbers = #tpu.dot_dimension_numbers<[1], [1], [0], [0], [0, 0, 1, 0], [], []>} : vector<8x8xbf16>, vector<8x8xbf16>, vector<8x8xf32> -> vector<8x8xf32>
    %cst_33 = arith.constant dense<0xFF800000> : vector<8xf32>
    %120 = vector.multi_reduction <maximumf>, %119, %cst_33 [1] : vector<8x8xf32> to vector<8xf32>
    %121 = vector.shape_cast %120 : vector<8xf32> to vector<8x1xf32>
    %122 = vector.broadcast %121 : vector<8x1xf32> to vector<8x8xf32>
    %123 = arith.subf %119, %122 : vector<8x8xf32>
    %124 = math.exp %123 : vector<8x8xf32>
    %cst_34 = arith.constant dense<0.000000e+00> : vector<8xf32>
    %125 = vector.multi_reduction <add>, %124, %cst_34 [1] : vector<8x8xf32> to vector<8xf32>
    %126 = vector.shape_cast %125 : vector<8xf32> to vector<8x1xf32>
    %127 = tpu.reciprocal %126 {approx = true} : vector<8x1xf32> -> vector<8x1xf32>
    %128 = vector.broadcast %127 : vector<8x1xf32> to vector<8x8xf32>
    %129 = arith.mulf %124, %128 : vector<8x8xf32>
    %130 = arith.truncf %129 : vector<8x8xf32> to vector<8x8xbf16>
    %cst_35 = arith.constant dense<0.000000e+00> : vector<8x8xf32>
    %131 = tpu.matmul %130, %118, %cst_35 {dimension_numbers = #tpu.dot_dimension_numbers<[1], [0], [0], [1], [0, 0, 1, 1], [], []>} : vector<8x8xbf16>, vector<8x8xbf16>, vector<8x8xf32> -> vector<8x8xf32>
    %132 = vector.extract_strided_slice %33 {offsets = [8, 8], sizes = [8, 8], strides = [1, 1]} : vector<16x32xf32> to vector<8x8xf32>
    %133 = arith.truncf %132 : vector<8x8xf32> to vector<8x8xbf16>
    %134 = vector.extract_strided_slice %34 {offsets = [8, 8], sizes = [8, 8], strides = [1, 1]} : vector<16x32xf32> to vector<8x8xf32>
    %135 = arith.truncf %134 : vector<8x8xf32> to vector<8x8xbf16>
    %136 = vector.extract_strided_slice %35 {offsets = [8, 8], sizes = [8, 8], strides = [1, 1]} : vector<16x32xf32> to vector<8x8xf32>
    %137 = arith.truncf %136 : vector<8x8xf32> to vector<8x8xbf16>
    %cst_36 = arith.constant dense<0.000000e+00> : vector<8x8xf32>
    %138 = tpu.matmul %133, %135, %cst_36 {dimension_numbers = #tpu.dot_dimension_numbers<[1], [1], [0], [0], [0, 0, 1, 0], [], []>} : vector<8x8xbf16>, vector<8x8xbf16>, vector<8x8xf32> -> vector<8x8xf32>
    %cst_37 = arith.constant dense<0xFF800000> : vector<8xf32>
    %139 = vector.multi_reduction <maximumf>, %138, %cst_37 [1] : vector<8x8xf32> to vector<8xf32>
    %140 = vector.shape_cast %139 : vector<8xf32> to vector<8x1xf32>
    %141 = vector.broadcast %140 : vector<8x1xf32> to vector<8x8xf32>
    %142 = arith.subf %138, %141 : vector<8x8xf32>
    %143 = math.exp %142 : vector<8x8xf32>
    %cst_38 = arith.constant dense<0.000000e+00> : vector<8xf32>
    %144 = vector.multi_reduction <add>, %143, %cst_38 [1] : vector<8x8xf32> to vector<8xf32>
    %145 = vector.shape_cast %144 : vector<8xf32> to vector<8x1xf32>
    %146 = tpu.reciprocal %145 {approx = true} : vector<8x1xf32> -> vector<8x1xf32>
    %147 = vector.broadcast %146 : vector<8x1xf32> to vector<8x8xf32>
    %148 = arith.mulf %143, %147 : vector<8x8xf32>
    %149 = arith.truncf %148 : vector<8x8xf32> to vector<8x8xbf16>
    %cst_39 = arith.constant dense<0.000000e+00> : vector<8x8xf32>
    %150 = tpu.matmul %149, %137, %cst_39 {dimension_numbers = #tpu.dot_dimension_numbers<[1], [0], [0], [1], [0, 0, 1, 1], [], []>} : vector<8x8xbf16>, vector<8x8xbf16>, vector<8x8xf32> -> vector<8x8xf32>
    %151 = vector.extract_strided_slice %33 {offsets = [8, 16], sizes = [8, 8], strides = [1, 1]} : vector<16x32xf32> to vector<8x8xf32>
    %152 = arith.truncf %151 : vector<8x8xf32> to vector<8x8xbf16>
    %153 = vector.extract_strided_slice %34 {offsets = [8, 16], sizes = [8, 8], strides = [1, 1]} : vector<16x32xf32> to vector<8x8xf32>
    %154 = arith.truncf %153 : vector<8x8xf32> to vector<8x8xbf16>
    %155 = vector.extract_strided_slice %35 {offsets = [8, 16], sizes = [8, 8], strides = [1, 1]} : vector<16x32xf32> to vector<8x8xf32>
    %156 = arith.truncf %155 : vector<8x8xf32> to vector<8x8xbf16>
    %cst_40 = arith.constant dense<0.000000e+00> : vector<8x8xf32>
    %157 = tpu.matmul %152, %154, %cst_40 {dimension_numbers = #tpu.dot_dimension_numbers<[1], [1], [0], [0], [0, 0, 1, 0], [], []>} : vector<8x8xbf16>, vector<8x8xbf16>, vector<8x8xf32> -> vector<8x8xf32>
    %cst_41 = arith.constant dense<0xFF800000> : vector<8xf32>
    %158 = vector.multi_reduction <maximumf>, %157, %cst_41 [1] : vector<8x8xf32> to vector<8xf32>
    %159 = vector.shape_cast %158 : vector<8xf32> to vector<8x1xf32>
    %160 = vector.broadcast %159 : vector<8x1xf32> to vector<8x8xf32>
    %161 = arith.subf %157, %160 : vector<8x8xf32>
    %162 = math.exp %161 : vector<8x8xf32>
    %cst_42 = arith.constant dense<0.000000e+00> : vector<8xf32>
    %163 = vector.multi_reduction <add>, %162, %cst_42 [1] : vector<8x8xf32> to vector<8xf32>
    %164 = vector.shape_cast %163 : vector<8xf32> to vector<8x1xf32>
    %165 = tpu.reciprocal %164 {approx = true} : vector<8x1xf32> -> vector<8x1xf32>
    %166 = vector.broadcast %165 : vector<8x1xf32> to vector<8x8xf32>
    %167 = arith.mulf %162, %166 : vector<8x8xf32>
    %168 = arith.truncf %167 : vector<8x8xf32> to vector<8x8xbf16>
    %cst_43 = arith.constant dense<0.000000e+00> : vector<8x8xf32>
    %169 = tpu.matmul %168, %156, %cst_43 {dimension_numbers = #tpu.dot_dimension_numbers<[1], [0], [0], [1], [0, 0, 1, 1], [], []>} : vector<8x8xbf16>, vector<8x8xbf16>, vector<8x8xf32> -> vector<8x8xf32>
    %170 = vector.extract_strided_slice %33 {offsets = [8, 24], sizes = [8, 8], strides = [1, 1]} : vector<16x32xf32> to vector<8x8xf32>
    %171 = arith.truncf %170 : vector<8x8xf32> to vector<8x8xbf16>
    %172 = vector.extract_strided_slice %34 {offsets = [8, 24], sizes = [8, 8], strides = [1, 1]} : vector<16x32xf32> to vector<8x8xf32>
    %173 = arith.truncf %172 : vector<8x8xf32> to vector<8x8xbf16>
    %174 = vector.extract_strided_slice %35 {offsets = [8, 24], sizes = [8, 8], strides = [1, 1]} : vector<16x32xf32> to vector<8x8xf32>
    %175 = arith.truncf %174 : vector<8x8xf32> to vector<8x8xbf16>
    %cst_44 = arith.constant dense<0.000000e+00> : vector<8x8xf32>
    %176 = tpu.matmul %171, %173, %cst_44 {dimension_numbers = #tpu.dot_dimension_numbers<[1], [1], [0], [0], [0, 0, 1, 0], [], []>} : vector<8x8xbf16>, vector<8x8xbf16>, vector<8x8xf32> -> vector<8x8xf32>
    %cst_45 = arith.constant dense<0xFF800000> : vector<8xf32>
    %177 = vector.multi_reduction <maximumf>, %176, %cst_45 [1] : vector<8x8xf32> to vector<8xf32>
    %178 = vector.shape_cast %177 : vector<8xf32> to vector<8x1xf32>
    %179 = vector.broadcast %178 : vector<8x1xf32> to vector<8x8xf32>
    %180 = arith.subf %176, %179 : vector<8x8xf32>
    %181 = math.exp %180 : vector<8x8xf32>
    %cst_46 = arith.constant dense<0.000000e+00> : vector<8xf32>
    %182 = vector.multi_reduction <add>, %181, %cst_46 [1] : vector<8x8xf32> to vector<8xf32>
    %183 = vector.shape_cast %182 : vector<8xf32> to vector<8x1xf32>
    %184 = tpu.reciprocal %183 {approx = true} : vector<8x1xf32> -> vector<8x1xf32>
    %185 = vector.broadcast %184 : vector<8x1xf32> to vector<8x8xf32>
    %186 = arith.mulf %181, %185 : vector<8x8xf32>
    %187 = arith.truncf %186 : vector<8x8xf32> to vector<8x8xbf16>
    %cst_47 = arith.constant dense<0.000000e+00> : vector<8x8xf32>
    %188 = tpu.matmul %187, %175, %cst_47 {dimension_numbers = #tpu.dot_dimension_numbers<[1], [0], [0], [1], [0, 0, 1, 1], [], []>} : vector<8x8xbf16>, vector<8x8xbf16>, vector<8x8xf32> -> vector<8x8xf32>
    %189 = tpu.concatenate %131, %150, %169, %188 in 1 : vector<8x8xf32>, vector<8x8xf32>, vector<8x8xf32>, vector<8x8xf32> -> vector<8x32xf32>
    %190 = tpu.concatenate %112, %189 in 0 : vector<8x32xf32>, vector<8x32xf32> -> vector<16x32xf32>
    %191 = arith.truncf %190 : vector<16x32xf32> to vector<16x32xbf16>
    %c0_48 = arith.constant 0 : index
    %c0_49 = arith.constant 0 : index
    %c0_50 = arith.constant 0 : index
    %192 = vector.load %arg6[%c0_48, %c0_49, %c0_50] : memref<2x32x32xbf16, #tpu.memory_space<vmem>>, vector<1x32x32xbf16>
    %193 = vector.shape_cast %192 : vector<1x32x32xbf16> to vector<32x32xbf16>
    %cst_51 = arith.constant dense<0.000000e+00> : vector<16x32xf32>
    %194 = tpu.matmul %191, %193, %cst_51 {dimension_numbers = #tpu.dot_dimension_numbers<[1], [0], [0], [1], [0, 0, 1, 1], [], []>} : vector<16x32xbf16>, vector<32x32xbf16>, vector<16x32xf32> -> vector<16x32xf32>
    %c0_52 = arith.constant 0 : index
    %c0_53 = arith.constant 0 : index
    %c0_54 = arith.constant 0 : index
    %195 = vector.load %arg7[%c0_52, %c0_53, %c0_54] : memref<2x1x32xf32, #tpu.memory_space<vmem>>, vector<1x1x32xf32>
    %196 = vector.shape_cast %195 : vector<1x1x32xf32> to vector<1x32xf32>
    %197 = vector.broadcast %196 : vector<1x32xf32> to vector<16x32xf32>
    %198 = arith.addf %194, %197 : vector<16x32xf32>
    %199 = arith.addf %198, %24 : vector<16x32xf32>
    %c0_55 = arith.constant 0 : index
    %c0_56 = arith.constant 0 : index
    %c0_57 = arith.constant 0 : index
    %200 = vector.load %arg8[%c0_55, %c0_56, %c0_57] : memref<2x1x32xf32, #tpu.memory_space<vmem>>, vector<1x1x32xf32>
    %201 = vector.shape_cast %200 : vector<1x1x32xf32> to vector<1x32xf32>
    %c0_58 = arith.constant 0 : index
    %c0_59 = arith.constant 0 : index
    %c0_60 = arith.constant 0 : index
    %202 = vector.load %arg9[%c0_58, %c0_59, %c0_60] : memref<2x1x32xf32, #tpu.memory_space<vmem>>, vector<1x1x32xf32>
    %203 = vector.shape_cast %202 : vector<1x1x32xf32> to vector<1x32xf32>
    %cst_61 = arith.constant dense<0.000000e+00> : vector<16xf32>
    %204 = vector.multi_reduction <add>, %199, %cst_61 [1] : vector<16x32xf32> to vector<16xf32>
    %205 = vector.shape_cast %204 : vector<16xf32> to vector<16x1xf32>
    %cst_62 = arith.constant 3.200000e+01 : f32
    %206 = vector.broadcast %cst_62 : f32 to vector<16x1xf32>
    %207 = arith.divf %205, %206 : vector<16x1xf32>
    %208 = vector.broadcast %207 : vector<16x1xf32> to vector<16x32xf32>
    %209 = arith.subf %199, %208 : vector<16x32xf32>
    %210 = arith.mulf %209, %209 : vector<16x32xf32>
    %cst_63 = arith.constant dense<0.000000e+00> : vector<16xf32>
    %211 = vector.multi_reduction <add>, %210, %cst_63 [1] : vector<16x32xf32> to vector<16xf32>
    %212 = vector.shape_cast %211 : vector<16xf32> to vector<16x1xf32>
    %cst_64 = arith.constant 3.200000e+01 : f32
    %213 = vector.broadcast %cst_64 : f32 to vector<16x1xf32>
    %214 = arith.divf %212, %213 : vector<16x1xf32>
    %215 = vector.broadcast %207 : vector<16x1xf32> to vector<16x32xf32>
    %216 = arith.subf %199, %215 : vector<16x32xf32>
    %cst_65 = arith.constant 9.99999996E-13 : f32
    %217 = vector.broadcast %cst_65 : f32 to vector<16x1xf32>
    %218 = arith.addf %214, %217 : vector<16x1xf32>
    %219 = math.rsqrt %218 : vector<16x1xf32>
    %220 = vector.broadcast %219 : vector<16x1xf32> to vector<16x32xf32>
    %221 = arith.mulf %216, %220 : vector<16x32xf32>
    %222 = vector.broadcast %201 : vector<1x32xf32> to vector<16x32xf32>
    %223 = arith.mulf %221, %222 : vector<16x32xf32>
    %224 = vector.broadcast %203 : vector<1x32xf32> to vector<16x32xf32>
    %225 = arith.addf %223, %224 : vector<16x32xf32>
    %226 = arith.truncf %225 : vector<16x32xf32> to vector<16x32xbf16>
    %c0_66 = arith.constant 0 : index
    %c0_67 = arith.constant 0 : index
    %c0_68 = arith.constant 0 : index
    %227 = vector.load %arg10[%c0_66, %c0_67, %c0_68] : memref<2x32x64xbf16, #tpu.memory_space<vmem>>, vector<1x32x64xbf16>
    %228 = vector.shape_cast %227 : vector<1x32x64xbf16> to vector<32x64xbf16>
    %cst_69 = arith.constant dense<0.000000e+00> : vector<16x64xf32>
    %229 = tpu.matmul %226, %228, %cst_69 {dimension_numbers = #tpu.dot_dimension_numbers<[1], [0], [0], [1], [0, 0, 1, 1], [], []>} : vector<16x32xbf16>, vector<32x64xbf16>, vector<16x64xf32> -> vector<16x64xf32>
    %c0_70 = arith.constant 0 : index
    %c0_71 = arith.constant 0 : index
    %c0_72 = arith.constant 0 : index
    %230 = vector.load %arg11[%c0_70, %c0_71, %c0_72] : memref<2x1x64xf32, #tpu.memory_space<vmem>>, vector<1x1x64xf32>
    %231 = vector.shape_cast %230 : vector<1x1x64xf32> to vector<1x64xf32>
    %232 = vector.broadcast %231 : vector<1x64xf32> to vector<16x64xf32>
    %233 = arith.addf %229, %232 : vector<16x64xf32>
    %cst_73 = arith.constant 5.000000e-01 : f32
    %234 = vector.broadcast %cst_73 : f32 to vector<16x64xf32>
    %235 = arith.mulf %234, %233 : vector<16x64xf32>
    %cst_74 = arith.constant 0.707106769 : f32
    %236 = vector.broadcast %cst_74 : f32 to vector<16x64xf32>
    %237 = arith.mulf %233, %236 : vector<16x64xf32>
    %238 = math.absf %237 : vector<16x64xf32>
    %cst_75 = arith.constant 0.327591091 : f32
    %239 = vector.broadcast %cst_75 : f32 to vector<16x64xf32>
    %240 = arith.mulf %239, %238 : vector<16x64xf32>
    %cst_76 = arith.constant 1.000000e+00 : f32
    %241 = vector.broadcast %cst_76 : f32 to vector<16x64xf32>
    %242 = arith.addf %241, %240 : vector<16x64xf32>
    %243 = tpu.reciprocal %242 : vector<16x64xf32> -> vector<16x64xf32>
    %cst_77 = arith.constant 1.06140542 : f32
    %244 = vector.broadcast %cst_77 : f32 to vector<16x64xf32>
    %245 = arith.mulf %243, %244 : vector<16x64xf32>
    %cst_78 = arith.constant -1.45315206 : f32
    %246 = vector.broadcast %cst_78 : f32 to vector<16x64xf32>
    %247 = arith.addf %246, %245 : vector<16x64xf32>
    %248 = arith.mulf %243, %247 : vector<16x64xf32>
    %cst_79 = arith.constant 1.42141378 : f32
    %249 = vector.broadcast %cst_79 : f32 to vector<16x64xf32>
    %250 = arith.addf %249, %248 : vector<16x64xf32>
    %251 = arith.mulf %243, %250 : vector<16x64xf32>
    %cst_80 = arith.constant -0.284496725 : f32
    %252 = vector.broadcast %cst_80 : f32 to vector<16x64xf32>
    %253 = arith.addf %252, %251 : vector<16x64xf32>
    %254 = arith.mulf %243, %253 : vector<16x64xf32>
    %cst_81 = arith.constant 0.254829586 : f32
    %255 = vector.broadcast %cst_81 : f32 to vector<16x64xf32>
    %256 = arith.addf %255, %254 : vector<16x64xf32>
    %257 = arith.mulf %243, %256 : vector<16x64xf32>
    %cst_82 = arith.constant 0.000000e+00 : f32
    %258 = vector.broadcast %cst_82 : f32 to vector<16x64xf32>
    %259 = arith.subf %258, %238 : vector<16x64xf32>
    %260 = arith.mulf %259, %238 : vector<16x64xf32>
    %261 = math.exp %260 : vector<16x64xf32>
    %262 = arith.mulf %257, %261 : vector<16x64xf32>
    %cst_83 = arith.constant 1.000000e+00 : f32
    %263 = vector.broadcast %cst_83 : f32 to vector<16x64xf32>
    %264 = arith.subf %263, %262 : vector<16x64xf32>
    %cst_84 = arith.constant 0.000000e+00 : f32
    %265 = vector.broadcast %cst_84 : f32 to vector<16x64xf32>
    %266 = arith.cmpf oge, %237, %265 : vector<16x64xf32>
    %cst_85 = arith.constant 0.000000e+00 : f32
    %267 = vector.broadcast %cst_85 : f32 to vector<16x64xf32>
    %268 = arith.subf %267, %264 : vector<16x64xf32>
    %269 = arith.select %266, %264, %268 : vector<16x64xi1>, vector<16x64xf32>
    %cst_86 = arith.constant 1.000000e+00 : f32
    %270 = vector.broadcast %cst_86 : f32 to vector<16x64xf32>
    %271 = arith.addf %270, %269 : vector<16x64xf32>
    %272 = arith.mulf %235, %271 : vector<16x64xf32>
    %273 = arith.truncf %272 : vector<16x64xf32> to vector<16x64xbf16>
    %c0_87 = arith.constant 0 : index
    %c0_88 = arith.constant 0 : index
    %c0_89 = arith.constant 0 : index
    %274 = vector.load %arg12[%c0_87, %c0_88, %c0_89] : memref<2x64x32xbf16, #tpu.memory_space<vmem>>, vector<1x64x32xbf16>
    %275 = vector.shape_cast %274 : vector<1x64x32xbf16> to vector<64x32xbf16>
    %cst_90 = arith.constant dense<0.000000e+00> : vector<16x32xf32>
    %276 = tpu.matmul %273, %275, %cst_90 {dimension_numbers = #tpu.dot_dimension_numbers<[1], [0], [0], [1], [0, 0, 1, 1], [], []>} : vector<16x64xbf16>, vector<64x32xbf16>, vector<16x32xf32> -> vector<16x32xf32>
    %c0_91 = arith.constant 0 : index
    %c0_92 = arith.constant 0 : index
    %c0_93 = arith.constant 0 : index
    %277 = vector.load %arg13[%c0_91, %c0_92, %c0_93] : memref<2x1x32xf32, #tpu.memory_space<vmem>>, vector<1x1x32xf32>
    %278 = vector.shape_cast %277 : vector<1x1x32xf32> to vector<1x32xf32>
    %279 = vector.broadcast %278 : vector<1x32xf32> to vector<16x32xf32>
    %280 = arith.addf %276, %279 : vector<16x32xf32>
    %281 = arith.addf %280, %225 : vector<16x32xf32>
    %c0_94 = arith.constant 0 : index
    %c0_95 = arith.constant 0 : index
    %c0_96 = arith.constant 0 : index
    %282 = vector.load %arg14[%c0_94, %c0_95, %c0_96] : memref<2x1x32xf32, #tpu.memory_space<vmem>>, vector<1x1x32xf32>
    %283 = vector.shape_cast %282 : vector<1x1x32xf32> to vector<1x32xf32>
    %c0_97 = arith.constant 0 : index
    %c0_98 = arith.constant 0 : index
    %c0_99 = arith.constant 0 : index
    %284 = vector.load %arg15[%c0_97, %c0_98, %c0_99] : memref<2x1x32xf32, #tpu.memory_space<vmem>>, vector<1x1x32xf32>
    %285 = vector.shape_cast %284 : vector<1x1x32xf32> to vector<1x32xf32>
    %cst_100 = arith.constant dense<0.000000e+00> : vector<16xf32>
    %286 = vector.multi_reduction <add>, %281, %cst_100 [1] : vector<16x32xf32> to vector<16xf32>
    %287 = vector.shape_cast %286 : vector<16xf32> to vector<16x1xf32>
    %cst_101 = arith.constant 3.200000e+01 : f32
    %288 = vector.broadcast %cst_101 : f32 to vector<16x1xf32>
    %289 = arith.divf %287, %288 : vector<16x1xf32>
    %290 = vector.broadcast %289 : vector<16x1xf32> to vector<16x32xf32>
    %291 = arith.subf %281, %290 : vector<16x32xf32>
    %292 = arith.mulf %291, %291 : vector<16x32xf32>
    %cst_102 = arith.constant dense<0.000000e+00> : vector<16xf32>
    %293 = vector.multi_reduction <add>, %292, %cst_102 [1] : vector<16x32xf32> to vector<16xf32>
    %294 = vector.shape_cast %293 : vector<16xf32> to vector<16x1xf32>
    %cst_103 = arith.constant 3.200000e+01 : f32
    %295 = vector.broadcast %cst_103 : f32 to vector<16x1xf32>
    %296 = arith.divf %294, %295 : vector<16x1xf32>
    %297 = vector.broadcast %289 : vector<16x1xf32> to vector<16x32xf32>
    %298 = arith.subf %281, %297 : vector<16x32xf32>
    %cst_104 = arith.constant 9.99999996E-13 : f32
    %299 = vector.broadcast %cst_104 : f32 to vector<16x1xf32>
    %300 = arith.addf %296, %299 : vector<16x1xf32>
    %301 = math.rsqrt %300 : vector<16x1xf32>
    %302 = vector.broadcast %301 : vector<16x1xf32> to vector<16x32xf32>
    %303 = arith.mulf %298, %302 : vector<16x32xf32>
    %304 = vector.broadcast %283 : vector<1x32xf32> to vector<16x32xf32>
    %305 = arith.mulf %303, %304 : vector<16x32xf32>
    %306 = vector.broadcast %285 : vector<1x32xf32> to vector<16x32xf32>
    %307 = arith.addf %305, %306 : vector<16x32xf32>
    %308 = arith.truncf %307 : vector<16x32xf32> to vector<16x32xbf16>
    %c1 = arith.constant 1 : index
    %c0_105 = arith.constant 0 : index
    %c0_106 = arith.constant 0 : index
    %309 = vector.load %arg4[%c1, %c0_105, %c0_106] : memref<2x32x96xbf16, #tpu.memory_space<vmem>>, vector<1x32x96xbf16>
    %310 = vector.shape_cast %309 : vector<1x32x96xbf16> to vector<32x96xbf16>
    %cst_107 = arith.constant dense<0.000000e+00> : vector<16x96xf32>
    %311 = tpu.matmul %308, %310, %cst_107 {dimension_numbers = #tpu.dot_dimension_numbers<[1], [0], [0], [1], [0, 0, 1, 1], [], []>} : vector<16x32xbf16>, vector<32x96xbf16>, vector<16x96xf32> -> vector<16x96xf32>
    %c1_108 = arith.constant 1 : index
    %c0_109 = arith.constant 0 : index
    %c0_110 = arith.constant 0 : index
    %312 = vector.load %arg5[%c1_108, %c0_109, %c0_110] : memref<2x1x96xf32, #tpu.memory_space<vmem>>, vector<1x1x96xf32>
    %313 = vector.shape_cast %312 : vector<1x1x96xf32> to vector<1x96xf32>
    %314 = vector.broadcast %313 : vector<1x96xf32> to vector<16x96xf32>
    %315 = arith.addf %311, %314 : vector<16x96xf32>
    %316 = vector.extract_strided_slice %315 {offsets = [0, 0], sizes = [16, 32], strides = [1, 1]} : vector<16x96xf32> to vector<16x32xf32>
    %317 = vector.extract_strided_slice %315 {offsets = [0, 32], sizes = [16, 32], strides = [1, 1]} : vector<16x96xf32> to vector<16x32xf32>
    %318 = vector.extract_strided_slice %315 {offsets = [0, 64], sizes = [16, 32], strides = [1, 1]} : vector<16x96xf32> to vector<16x32xf32>
    %319 = vector.extract_strided_slice %316 {offsets = [0, 0], sizes = [8, 8], strides = [1, 1]} : vector<16x32xf32> to vector<8x8xf32>
    %320 = arith.truncf %319 : vector<8x8xf32> to vector<8x8xbf16>
    %321 = vector.extract_strided_slice %317 {offsets = [0, 0], sizes = [8, 8], strides = [1, 1]} : vector<16x32xf32> to vector<8x8xf32>
    %322 = arith.truncf %321 : vector<8x8xf32> to vector<8x8xbf16>
    %323 = vector.extract_strided_slice %318 {offsets = [0, 0], sizes = [8, 8], strides = [1, 1]} : vector<16x32xf32> to vector<8x8xf32>
    %324 = arith.truncf %323 : vector<8x8xf32> to vector<8x8xbf16>
    %cst_111 = arith.constant dense<0.000000e+00> : vector<8x8xf32>
    %325 = tpu.matmul %320, %322, %cst_111 {dimension_numbers = #tpu.dot_dimension_numbers<[1], [1], [0], [0], [0, 0, 1, 0], [], []>} : vector<8x8xbf16>, vector<8x8xbf16>, vector<8x8xf32> -> vector<8x8xf32>
    %cst_112 = arith.constant dense<0xFF800000> : vector<8xf32>
    %326 = vector.multi_reduction <maximumf>, %325, %cst_112 [1] : vector<8x8xf32> to vector<8xf32>
    %327 = vector.shape_cast %326 : vector<8xf32> to vector<8x1xf32>
    %328 = vector.broadcast %327 : vector<8x1xf32> to vector<8x8xf32>
    %329 = arith.subf %325, %328 : vector<8x8xf32>
    %330 = math.exp %329 : vector<8x8xf32>
    %cst_113 = arith.constant dense<0.000000e+00> : vector<8xf32>
    %331 = vector.multi_reduction <add>, %330, %cst_113 [1] : vector<8x8xf32> to vector<8xf32>
    %332 = vector.shape_cast %331 : vector<8xf32> to vector<8x1xf32>
    %333 = tpu.reciprocal %332 {approx = true} : vector<8x1xf32> -> vector<8x1xf32>
    %334 = vector.broadcast %333 : vector<8x1xf32> to vector<8x8xf32>
    %335 = arith.mulf %330, %334 : vector<8x8xf32>
    %336 = arith.truncf %335 : vector<8x8xf32> to vector<8x8xbf16>
    %cst_114 = arith.constant dense<0.000000e+00> : vector<8x8xf32>
    %337 = tpu.matmul %336, %324, %cst_114 {dimension_numbers = #tpu.dot_dimension_numbers<[1], [0], [0], [1], [0, 0, 1, 1], [], []>} : vector<8x8xbf16>, vector<8x8xbf16>, vector<8x8xf32> -> vector<8x8xf32>
    %338 = vector.extract_strided_slice %316 {offsets = [0, 8], sizes = [8, 8], strides = [1, 1]} : vector<16x32xf32> to vector<8x8xf32>
    %339 = arith.truncf %338 : vector<8x8xf32> to vector<8x8xbf16>
    %340 = vector.extract_strided_slice %317 {offsets = [0, 8], sizes = [8, 8], strides = [1, 1]} : vector<16x32xf32> to vector<8x8xf32>
    %341 = arith.truncf %340 : vector<8x8xf32> to vector<8x8xbf16>
    %342 = vector.extract_strided_slice %318 {offsets = [0, 8], sizes = [8, 8], strides = [1, 1]} : vector<16x32xf32> to vector<8x8xf32>
    %343 = arith.truncf %342 : vector<8x8xf32> to vector<8x8xbf16>
    %cst_115 = arith.constant dense<0.000000e+00> : vector<8x8xf32>
    %344 = tpu.matmul %339, %341, %cst_115 {dimension_numbers = #tpu.dot_dimension_numbers<[1], [1], [0], [0], [0, 0, 1, 0], [], []>} : vector<8x8xbf16>, vector<8x8xbf16>, vector<8x8xf32> -> vector<8x8xf32>
    %cst_116 = arith.constant dense<0xFF800000> : vector<8xf32>
    %345 = vector.multi_reduction <maximumf>, %344, %cst_116 [1] : vector<8x8xf32> to vector<8xf32>
    %346 = vector.shape_cast %345 : vector<8xf32> to vector<8x1xf32>
    %347 = vector.broadcast %346 : vector<8x1xf32> to vector<8x8xf32>
    %348 = arith.subf %344, %347 : vector<8x8xf32>
    %349 = math.exp %348 : vector<8x8xf32>
    %cst_117 = arith.constant dense<0.000000e+00> : vector<8xf32>
    %350 = vector.multi_reduction <add>, %349, %cst_117 [1] : vector<8x8xf32> to vector<8xf32>
    %351 = vector.shape_cast %350 : vector<8xf32> to vector<8x1xf32>
    %352 = tpu.reciprocal %351 {approx = true} : vector<8x1xf32> -> vector<8x1xf32>
    %353 = vector.broadcast %352 : vector<8x1xf32> to vector<8x8xf32>
    %354 = arith.mulf %349, %353 : vector<8x8xf32>
    %355 = arith.truncf %354 : vector<8x8xf32> to vector<8x8xbf16>
    %cst_118 = arith.constant dense<0.000000e+00> : vector<8x8xf32>
    %356 = tpu.matmul %355, %343, %cst_118 {dimension_numbers = #tpu.dot_dimension_numbers<[1], [0], [0], [1], [0, 0, 1, 1], [], []>} : vector<8x8xbf16>, vector<8x8xbf16>, vector<8x8xf32> -> vector<8x8xf32>
    %357 = vector.extract_strided_slice %316 {offsets = [0, 16], sizes = [8, 8], strides = [1, 1]} : vector<16x32xf32> to vector<8x8xf32>
    %358 = arith.truncf %357 : vector<8x8xf32> to vector<8x8xbf16>
    %359 = vector.extract_strided_slice %317 {offsets = [0, 16], sizes = [8, 8], strides = [1, 1]} : vector<16x32xf32> to vector<8x8xf32>
    %360 = arith.truncf %359 : vector<8x8xf32> to vector<8x8xbf16>
    %361 = vector.extract_strided_slice %318 {offsets = [0, 16], sizes = [8, 8], strides = [1, 1]} : vector<16x32xf32> to vector<8x8xf32>
    %362 = arith.truncf %361 : vector<8x8xf32> to vector<8x8xbf16>
    %cst_119 = arith.constant dense<0.000000e+00> : vector<8x8xf32>
    %363 = tpu.matmul %358, %360, %cst_119 {dimension_numbers = #tpu.dot_dimension_numbers<[1], [1], [0], [0], [0, 0, 1, 0], [], []>} : vector<8x8xbf16>, vector<8x8xbf16>, vector<8x8xf32> -> vector<8x8xf32>
    %cst_120 = arith.constant dense<0xFF800000> : vector<8xf32>
    %364 = vector.multi_reduction <maximumf>, %363, %cst_120 [1] : vector<8x8xf32> to vector<8xf32>
    %365 = vector.shape_cast %364 : vector<8xf32> to vector<8x1xf32>
    %366 = vector.broadcast %365 : vector<8x1xf32> to vector<8x8xf32>
    %367 = arith.subf %363, %366 : vector<8x8xf32>
    %368 = math.exp %367 : vector<8x8xf32>
    %cst_121 = arith.constant dense<0.000000e+00> : vector<8xf32>
    %369 = vector.multi_reduction <add>, %368, %cst_121 [1] : vector<8x8xf32> to vector<8xf32>
    %370 = vector.shape_cast %369 : vector<8xf32> to vector<8x1xf32>
    %371 = tpu.reciprocal %370 {approx = true} : vector<8x1xf32> -> vector<8x1xf32>
    %372 = vector.broadcast %371 : vector<8x1xf32> to vector<8x8xf32>
    %373 = arith.mulf %368, %372 : vector<8x8xf32>
    %374 = arith.truncf %373 : vector<8x8xf32> to vector<8x8xbf16>
    %cst_122 = arith.constant dense<0.000000e+00> : vector<8x8xf32>
    %375 = tpu.matmul %374, %362, %cst_122 {dimension_numbers = #tpu.dot_dimension_numbers<[1], [0], [0], [1], [0, 0, 1, 1], [], []>} : vector<8x8xbf16>, vector<8x8xbf16>, vector<8x8xf32> -> vector<8x8xf32>
    %376 = vector.extract_strided_slice %316 {offsets = [0, 24], sizes = [8, 8], strides = [1, 1]} : vector<16x32xf32> to vector<8x8xf32>
    %377 = arith.truncf %376 : vector<8x8xf32> to vector<8x8xbf16>
    %378 = vector.extract_strided_slice %317 {offsets = [0, 24], sizes = [8, 8], strides = [1, 1]} : vector<16x32xf32> to vector<8x8xf32>
    %379 = arith.truncf %378 : vector<8x8xf32> to vector<8x8xbf16>
    %380 = vector.extract_strided_slice %318 {offsets = [0, 24], sizes = [8, 8], strides = [1, 1]} : vector<16x32xf32> to vector<8x8xf32>
    %381 = arith.truncf %380 : vector<8x8xf32> to vector<8x8xbf16>
    %cst_123 = arith.constant dense<0.000000e+00> : vector<8x8xf32>
    %382 = tpu.matmul %377, %379, %cst_123 {dimension_numbers = #tpu.dot_dimension_numbers<[1], [1], [0], [0], [0, 0, 1, 0], [], []>} : vector<8x8xbf16>, vector<8x8xbf16>, vector<8x8xf32> -> vector<8x8xf32>
    %cst_124 = arith.constant dense<0xFF800000> : vector<8xf32>
    %383 = vector.multi_reduction <maximumf>, %382, %cst_124 [1] : vector<8x8xf32> to vector<8xf32>
    %384 = vector.shape_cast %383 : vector<8xf32> to vector<8x1xf32>
    %385 = vector.broadcast %384 : vector<8x1xf32> to vector<8x8xf32>
    %386 = arith.subf %382, %385 : vector<8x8xf32>
    %387 = math.exp %386 : vector<8x8xf32>
    %cst_125 = arith.constant dense<0.000000e+00> : vector<8xf32>
    %388 = vector.multi_reduction <add>, %387, %cst_125 [1] : vector<8x8xf32> to vector<8xf32>
    %389 = vector.shape_cast %388 : vector<8xf32> to vector<8x1xf32>
    %390 = tpu.reciprocal %389 {approx = true} : vector<8x1xf32> -> vector<8x1xf32>
    %391 = vector.broadcast %390 : vector<8x1xf32> to vector<8x8xf32>
    %392 = arith.mulf %387, %391 : vector<8x8xf32>
    %393 = arith.truncf %392 : vector<8x8xf32> to vector<8x8xbf16>
    %cst_126 = arith.constant dense<0.000000e+00> : vector<8x8xf32>
    %394 = tpu.matmul %393, %381, %cst_126 {dimension_numbers = #tpu.dot_dimension_numbers<[1], [0], [0], [1], [0, 0, 1, 1], [], []>} : vector<8x8xbf16>, vector<8x8xbf16>, vector<8x8xf32> -> vector<8x8xf32>
    %395 = tpu.concatenate %337, %356, %375, %394 in 1 : vector<8x8xf32>, vector<8x8xf32>, vector<8x8xf32>, vector<8x8xf32> -> vector<8x32xf32>
    %396 = vector.extract_strided_slice %316 {offsets = [8, 0], sizes = [8, 8], strides = [1, 1]} : vector<16x32xf32> to vector<8x8xf32>
    %397 = arith.truncf %396 : vector<8x8xf32> to vector<8x8xbf16>
    %398 = vector.extract_strided_slice %317 {offsets = [8, 0], sizes = [8, 8], strides = [1, 1]} : vector<16x32xf32> to vector<8x8xf32>
    %399 = arith.truncf %398 : vector<8x8xf32> to vector<8x8xbf16>
    %400 = vector.extract_strided_slice %318 {offsets = [8, 0], sizes = [8, 8], strides = [1, 1]} : vector<16x32xf32> to vector<8x8xf32>
    %401 = arith.truncf %400 : vector<8x8xf32> to vector<8x8xbf16>
    %cst_127 = arith.constant dense<0.000000e+00> : vector<8x8xf32>
    %402 = tpu.matmul %397, %399, %cst_127 {dimension_numbers = #tpu.dot_dimension_numbers<[1], [1], [0], [0], [0, 0, 1, 0], [], []>} : vector<8x8xbf16>, vector<8x8xbf16>, vector<8x8xf32> -> vector<8x8xf32>
    %cst_128 = arith.constant dense<0xFF800000> : vector<8xf32>
    %403 = vector.multi_reduction <maximumf>, %402, %cst_128 [1] : vector<8x8xf32> to vector<8xf32>
    %404 = vector.shape_cast %403 : vector<8xf32> to vector<8x1xf32>
    %405 = vector.broadcast %404 : vector<8x1xf32> to vector<8x8xf32>
    %406 = arith.subf %402, %405 : vector<8x8xf32>
    %407 = math.exp %406 : vector<8x8xf32>
    %cst_129 = arith.constant dense<0.000000e+00> : vector<8xf32>
    %408 = vector.multi_reduction <add>, %407, %cst_129 [1] : vector<8x8xf32> to vector<8xf32>
    %409 = vector.shape_cast %408 : vector<8xf32> to vector<8x1xf32>
    %410 = tpu.reciprocal %409 {approx = true} : vector<8x1xf32> -> vector<8x1xf32>
    %411 = vector.broadcast %410 : vector<8x1xf32> to vector<8x8xf32>
    %412 = arith.mulf %407, %411 : vector<8x8xf32>
    %413 = arith.truncf %412 : vector<8x8xf32> to vector<8x8xbf16>
    %cst_130 = arith.constant dense<0.000000e+00> : vector<8x8xf32>
    %414 = tpu.matmul %413, %401, %cst_130 {dimension_numbers = #tpu.dot_dimension_numbers<[1], [0], [0], [1], [0, 0, 1, 1], [], []>} : vector<8x8xbf16>, vector<8x8xbf16>, vector<8x8xf32> -> vector<8x8xf32>
    %415 = vector.extract_strided_slice %316 {offsets = [8, 8], sizes = [8, 8], strides = [1, 1]} : vector<16x32xf32> to vector<8x8xf32>
    %416 = arith.truncf %415 : vector<8x8xf32> to vector<8x8xbf16>
    %417 = vector.extract_strided_slice %317 {offsets = [8, 8], sizes = [8, 8], strides = [1, 1]} : vector<16x32xf32> to vector<8x8xf32>
    %418 = arith.truncf %417 : vector<8x8xf32> to vector<8x8xbf16>
    %419 = vector.extract_strided_slice %318 {offsets = [8, 8], sizes = [8, 8], strides = [1, 1]} : vector<16x32xf32> to vector<8x8xf32>
    %420 = arith.truncf %419 : vector<8x8xf32> to vector<8x8xbf16>
    %cst_131 = arith.constant dense<0.000000e+00> : vector<8x8xf32>
    %421 = tpu.matmul %416, %418, %cst_131 {dimension_numbers = #tpu.dot_dimension_numbers<[1], [1], [0], [0], [0, 0, 1, 0], [], []>} : vector<8x8xbf16>, vector<8x8xbf16>, vector<8x8xf32> -> vector<8x8xf32>
    %cst_132 = arith.constant dense<0xFF800000> : vector<8xf32>
    %422 = vector.multi_reduction <maximumf>, %421, %cst_132 [1] : vector<8x8xf32> to vector<8xf32>
    %423 = vector.shape_cast %422 : vector<8xf32> to vector<8x1xf32>
    %424 = vector.broadcast %423 : vector<8x1xf32> to vector<8x8xf32>
    %425 = arith.subf %421, %424 : vector<8x8xf32>
    %426 = math.exp %425 : vector<8x8xf32>
    %cst_133 = arith.constant dense<0.000000e+00> : vector<8xf32>
    %427 = vector.multi_reduction <add>, %426, %cst_133 [1] : vector<8x8xf32> to vector<8xf32>
    %428 = vector.shape_cast %427 : vector<8xf32> to vector<8x1xf32>
    %429 = tpu.reciprocal %428 {approx = true} : vector<8x1xf32> -> vector<8x1xf32>
    %430 = vector.broadcast %429 : vector<8x1xf32> to vector<8x8xf32>
    %431 = arith.mulf %426, %430 : vector<8x8xf32>
    %432 = arith.truncf %431 : vector<8x8xf32> to vector<8x8xbf16>
    %cst_134 = arith.constant dense<0.000000e+00> : vector<8x8xf32>
    %433 = tpu.matmul %432, %420, %cst_134 {dimension_numbers = #tpu.dot_dimension_numbers<[1], [0], [0], [1], [0, 0, 1, 1], [], []>} : vector<8x8xbf16>, vector<8x8xbf16>, vector<8x8xf32> -> vector<8x8xf32>
    %434 = vector.extract_strided_slice %316 {offsets = [8, 16], sizes = [8, 8], strides = [1, 1]} : vector<16x32xf32> to vector<8x8xf32>
    %435 = arith.truncf %434 : vector<8x8xf32> to vector<8x8xbf16>
    %436 = vector.extract_strided_slice %317 {offsets = [8, 16], sizes = [8, 8], strides = [1, 1]} : vector<16x32xf32> to vector<8x8xf32>
    %437 = arith.truncf %436 : vector<8x8xf32> to vector<8x8xbf16>
    %438 = vector.extract_strided_slice %318 {offsets = [8, 16], sizes = [8, 8], strides = [1, 1]} : vector<16x32xf32> to vector<8x8xf32>
    %439 = arith.truncf %438 : vector<8x8xf32> to vector<8x8xbf16>
    %cst_135 = arith.constant dense<0.000000e+00> : vector<8x8xf32>
    %440 = tpu.matmul %435, %437, %cst_135 {dimension_numbers = #tpu.dot_dimension_numbers<[1], [1], [0], [0], [0, 0, 1, 0], [], []>} : vector<8x8xbf16>, vector<8x8xbf16>, vector<8x8xf32> -> vector<8x8xf32>
    %cst_136 = arith.constant dense<0xFF800000> : vector<8xf32>
    %441 = vector.multi_reduction <maximumf>, %440, %cst_136 [1] : vector<8x8xf32> to vector<8xf32>
    %442 = vector.shape_cast %441 : vector<8xf32> to vector<8x1xf32>
    %443 = vector.broadcast %442 : vector<8x1xf32> to vector<8x8xf32>
    %444 = arith.subf %440, %443 : vector<8x8xf32>
    %445 = math.exp %444 : vector<8x8xf32>
    %cst_137 = arith.constant dense<0.000000e+00> : vector<8xf32>
    %446 = vector.multi_reduction <add>, %445, %cst_137 [1] : vector<8x8xf32> to vector<8xf32>
    %447 = vector.shape_cast %446 : vector<8xf32> to vector<8x1xf32>
    %448 = tpu.reciprocal %447 {approx = true} : vector<8x1xf32> -> vector<8x1xf32>
    %449 = vector.broadcast %448 : vector<8x1xf32> to vector<8x8xf32>
    %450 = arith.mulf %445, %449 : vector<8x8xf32>
    %451 = arith.truncf %450 : vector<8x8xf32> to vector<8x8xbf16>
    %cst_138 = arith.constant dense<0.000000e+00> : vector<8x8xf32>
    %452 = tpu.matmul %451, %439, %cst_138 {dimension_numbers = #tpu.dot_dimension_numbers<[1], [0], [0], [1], [0, 0, 1, 1], [], []>} : vector<8x8xbf16>, vector<8x8xbf16>, vector<8x8xf32> -> vector<8x8xf32>
    %453 = vector.extract_strided_slice %316 {offsets = [8, 24], sizes = [8, 8], strides = [1, 1]} : vector<16x32xf32> to vector<8x8xf32>
    %454 = arith.truncf %453 : vector<8x8xf32> to vector<8x8xbf16>
    %455 = vector.extract_strided_slice %317 {offsets = [8, 24], sizes = [8, 8], strides = [1, 1]} : vector<16x32xf32> to vector<8x8xf32>
    %456 = arith.truncf %455 : vector<8x8xf32> to vector<8x8xbf16>
    %457 = vector.extract_strided_slice %318 {offsets = [8, 24], sizes = [8, 8], strides = [1, 1]} : vector<16x32xf32> to vector<8x8xf32>
    %458 = arith.truncf %457 : vector<8x8xf32> to vector<8x8xbf16>
    %cst_139 = arith.constant dense<0.000000e+00> : vector<8x8xf32>
    %459 = tpu.matmul %454, %456, %cst_139 {dimension_numbers = #tpu.dot_dimension_numbers<[1], [1], [0], [0], [0, 0, 1, 0], [], []>} : vector<8x8xbf16>, vector<8x8xbf16>, vector<8x8xf32> -> vector<8x8xf32>
    %cst_140 = arith.constant dense<0xFF800000> : vector<8xf32>
    %460 = vector.multi_reduction <maximumf>, %459, %cst_140 [1] : vector<8x8xf32> to vector<8xf32>
    %461 = vector.shape_cast %460 : vector<8xf32> to vector<8x1xf32>
    %462 = vector.broadcast %461 : vector<8x1xf32> to vector<8x8xf32>
    %463 = arith.subf %459, %462 : vector<8x8xf32>
    %464 = math.exp %463 : vector<8x8xf32>
    %cst_141 = arith.constant dense<0.000000e+00> : vector<8xf32>
    %465 = vector.multi_reduction <add>, %464, %cst_141 [1] : vector<8x8xf32> to vector<8xf32>
    %466 = vector.shape_cast %465 : vector<8xf32> to vector<8x1xf32>
    %467 = tpu.reciprocal %466 {approx = true} : vector<8x1xf32> -> vector<8x1xf32>
    %468 = vector.broadcast %467 : vector<8x1xf32> to vector<8x8xf32>
    %469 = arith.mulf %464, %468 : vector<8x8xf32>
    %470 = arith.truncf %469 : vector<8x8xf32> to vector<8x8xbf16>
    %cst_142 = arith.constant dense<0.000000e+00> : vector<8x8xf32>
    %471 = tpu.matmul %470, %458, %cst_142 {dimension_numbers = #tpu.dot_dimension_numbers<[1], [0], [0], [1], [0, 0, 1, 1], [], []>} : vector<8x8xbf16>, vector<8x8xbf16>, vector<8x8xf32> -> vector<8x8xf32>
    %472 = tpu.concatenate %414, %433, %452, %471 in 1 : vector<8x8xf32>, vector<8x8xf32>, vector<8x8xf32>, vector<8x8xf32> -> vector<8x32xf32>
    %473 = tpu.concatenate %395, %472 in 0 : vector<8x32xf32>, vector<8x32xf32> -> vector<16x32xf32>
    %474 = arith.truncf %473 : vector<16x32xf32> to vector<16x32xbf16>
    %c1_143 = arith.constant 1 : index
    %c0_144 = arith.constant 0 : index
    %c0_145 = arith.constant 0 : index
    %475 = vector.load %arg6[%c1_143, %c0_144, %c0_145] : memref<2x32x32xbf16, #tpu.memory_space<vmem>>, vector<1x32x32xbf16>
    %476 = vector.shape_cast %475 : vector<1x32x32xbf16> to vector<32x32xbf16>
    %cst_146 = arith.constant dense<0.000000e+00> : vector<16x32xf32>
    %477 = tpu.matmul %474, %476, %cst_146 {dimension_numbers = #tpu.dot_dimension_numbers<[1], [0], [0], [1], [0, 0, 1, 1], [], []>} : vector<16x32xbf16>, vector<32x32xbf16>, vector<16x32xf32> -> vector<16x32xf32>
    %c1_147 = arith.constant 1 : index
    %c0_148 = arith.constant 0 : index
    %c0_149 = arith.constant 0 : index
    %478 = vector.load %arg7[%c1_147, %c0_148, %c0_149] : memref<2x1x32xf32, #tpu.memory_space<vmem>>, vector<1x1x32xf32>
    %479 = vector.shape_cast %478 : vector<1x1x32xf32> to vector<1x32xf32>
    %480 = vector.broadcast %479 : vector<1x32xf32> to vector<16x32xf32>
    %481 = arith.addf %477, %480 : vector<16x32xf32>
    %482 = arith.addf %481, %307 : vector<16x32xf32>
    %c1_150 = arith.constant 1 : index
    %c0_151 = arith.constant 0 : index
    %c0_152 = arith.constant 0 : index
    %483 = vector.load %arg8[%c1_150, %c0_151, %c0_152] : memref<2x1x32xf32, #tpu.memory_space<vmem>>, vector<1x1x32xf32>
    %484 = vector.shape_cast %483 : vector<1x1x32xf32> to vector<1x32xf32>
    %c1_153 = arith.constant 1 : index
    %c0_154 = arith.constant 0 : index
    %c0_155 = arith.constant 0 : index
    %485 = vector.load %arg9[%c1_153, %c0_154, %c0_155] : memref<2x1x32xf32, #tpu.memory_space<vmem>>, vector<1x1x32xf32>
    %486 = vector.shape_cast %485 : vector<1x1x32xf32> to vector<1x32xf32>
    %cst_156 = arith.constant dense<0.000000e+00> : vector<16xf32>
    %487 = vector.multi_reduction <add>, %482, %cst_156 [1] : vector<16x32xf32> to vector<16xf32>
    %488 = vector.shape_cast %487 : vector<16xf32> to vector<16x1xf32>
    %cst_157 = arith.constant 3.200000e+01 : f32
    %489 = vector.broadcast %cst_157 : f32 to vector<16x1xf32>
    %490 = arith.divf %488, %489 : vector<16x1xf32>
    %491 = vector.broadcast %490 : vector<16x1xf32> to vector<16x32xf32>
    %492 = arith.subf %482, %491 : vector<16x32xf32>
    %493 = arith.mulf %492, %492 : vector<16x32xf32>
    %cst_158 = arith.constant dense<0.000000e+00> : vector<16xf32>
    %494 = vector.multi_reduction <add>, %493, %cst_158 [1] : vector<16x32xf32> to vector<16xf32>
    %495 = vector.shape_cast %494 : vector<16xf32> to vector<16x1xf32>
    %cst_159 = arith.constant 3.200000e+01 : f32
    %496 = vector.broadcast %cst_159 : f32 to vector<16x1xf32>
    %497 = arith.divf %495, %496 : vector<16x1xf32>
    %498 = vector.broadcast %490 : vector<16x1xf32> to vector<16x32xf32>
    %499 = arith.subf %482, %498 : vector<16x32xf32>
    %cst_160 = arith.constant 9.99999996E-13 : f32
    %500 = vector.broadcast %cst_160 : f32 to vector<16x1xf32>
    %501 = arith.addf %497, %500 : vector<16x1xf32>
    %502 = math.rsqrt %501 : vector<16x1xf32>
    %503 = vector.broadcast %502 : vector<16x1xf32> to vector<16x32xf32>
    %504 = arith.mulf %499, %503 : vector<16x32xf32>
    %505 = vector.broadcast %484 : vector<1x32xf32> to vector<16x32xf32>
    %506 = arith.mulf %504, %505 : vector<16x32xf32>
    %507 = vector.broadcast %486 : vector<1x32xf32> to vector<16x32xf32>
    %508 = arith.addf %506, %507 : vector<16x32xf32>
    %509 = arith.truncf %508 : vector<16x32xf32> to vector<16x32xbf16>
    %c1_161 = arith.constant 1 : index
    %c0_162 = arith.constant 0 : index
    %c0_163 = arith.constant 0 : index
    %510 = vector.load %arg10[%c1_161, %c0_162, %c0_163] : memref<2x32x64xbf16, #tpu.memory_space<vmem>>, vector<1x32x64xbf16>
    %511 = vector.shape_cast %510 : vector<1x32x64xbf16> to vector<32x64xbf16>
    %cst_164 = arith.constant dense<0.000000e+00> : vector<16x64xf32>
    %512 = tpu.matmul %509, %511, %cst_164 {dimension_numbers = #tpu.dot_dimension_numbers<[1], [0], [0], [1], [0, 0, 1, 1], [], []>} : vector<16x32xbf16>, vector<32x64xbf16>, vector<16x64xf32> -> vector<16x64xf32>
    %c1_165 = arith.constant 1 : index
    %c0_166 = arith.constant 0 : index
    %c0_167 = arith.constant 0 : index
    %513 = vector.load %arg11[%c1_165, %c0_166, %c0_167] : memref<2x1x64xf32, #tpu.memory_space<vmem>>, vector<1x1x64xf32>
    %514 = vector.shape_cast %513 : vector<1x1x64xf32> to vector<1x64xf32>
    %515 = vector.broadcast %514 : vector<1x64xf32> to vector<16x64xf32>
    %516 = arith.addf %512, %515 : vector<16x64xf32>
    %cst_168 = arith.constant 5.000000e-01 : f32
    %517 = vector.broadcast %cst_168 : f32 to vector<16x64xf32>
    %518 = arith.mulf %517, %516 : vector<16x64xf32>
    %cst_169 = arith.constant 0.707106769 : f32
    %519 = vector.broadcast %cst_169 : f32 to vector<16x64xf32>
    %520 = arith.mulf %516, %519 : vector<16x64xf32>
    %521 = math.absf %520 : vector<16x64xf32>
    %cst_170 = arith.constant 0.327591091 : f32
    %522 = vector.broadcast %cst_170 : f32 to vector<16x64xf32>
    %523 = arith.mulf %522, %521 : vector<16x64xf32>
    %cst_171 = arith.constant 1.000000e+00 : f32
    %524 = vector.broadcast %cst_171 : f32 to vector<16x64xf32>
    %525 = arith.addf %524, %523 : vector<16x64xf32>
    %526 = tpu.reciprocal %525 : vector<16x64xf32> -> vector<16x64xf32>
    %cst_172 = arith.constant 1.06140542 : f32
    %527 = vector.broadcast %cst_172 : f32 to vector<16x64xf32>
    %528 = arith.mulf %526, %527 : vector<16x64xf32>
    %cst_173 = arith.constant -1.45315206 : f32
    %529 = vector.broadcast %cst_173 : f32 to vector<16x64xf32>
    %530 = arith.addf %529, %528 : vector<16x64xf32>
    %531 = arith.mulf %526, %530 : vector<16x64xf32>
    %cst_174 = arith.constant 1.42141378 : f32
    %532 = vector.broadcast %cst_174 : f32 to vector<16x64xf32>
    %533 = arith.addf %532, %531 : vector<16x64xf32>
    %534 = arith.mulf %526, %533 : vector<16x64xf32>
    %cst_175 = arith.constant -0.284496725 : f32
    %535 = vector.broadcast %cst_175 : f32 to vector<16x64xf32>
    %536 = arith.addf %535, %534 : vector<16x64xf32>
    %537 = arith.mulf %526, %536 : vector<16x64xf32>
    %cst_176 = arith.constant 0.254829586 : f32
    %538 = vector.broadcast %cst_176 : f32 to vector<16x64xf32>
    %539 = arith.addf %538, %537 : vector<16x64xf32>
    %540 = arith.mulf %526, %539 : vector<16x64xf32>
    %cst_177 = arith.constant 0.000000e+00 : f32
    %541 = vector.broadcast %cst_177 : f32 to vector<16x64xf32>
    %542 = arith.subf %541, %521 : vector<16x64xf32>
    %543 = arith.mulf %542, %521 : vector<16x64xf32>
    %544 = math.exp %543 : vector<16x64xf32>
    %545 = arith.mulf %540, %544 : vector<16x64xf32>
    %cst_178 = arith.constant 1.000000e+00 : f32
    %546 = vector.broadcast %cst_178 : f32 to vector<16x64xf32>
    %547 = arith.subf %546, %545 : vector<16x64xf32>
    %cst_179 = arith.constant 0.000000e+00 : f32
    %548 = vector.broadcast %cst_179 : f32 to vector<16x64xf32>
    %549 = arith.cmpf oge, %520, %548 : vector<16x64xf32>
    %cst_180 = arith.constant 0.000000e+00 : f32
    %550 = vector.broadcast %cst_180 : f32 to vector<16x64xf32>
    %551 = arith.subf %550, %547 : vector<16x64xf32>
    %552 = arith.select %549, %547, %551 : vector<16x64xi1>, vector<16x64xf32>
    %cst_181 = arith.constant 1.000000e+00 : f32
    %553 = vector.broadcast %cst_181 : f32 to vector<16x64xf32>
    %554 = arith.addf %553, %552 : vector<16x64xf32>
    %555 = arith.mulf %518, %554 : vector<16x64xf32>
    %556 = arith.truncf %555 : vector<16x64xf32> to vector<16x64xbf16>
    %c1_182 = arith.constant 1 : index
    %c0_183 = arith.constant 0 : index
    %c0_184 = arith.constant 0 : index
    %557 = vector.load %arg12[%c1_182, %c0_183, %c0_184] : memref<2x64x32xbf16, #tpu.memory_space<vmem>>, vector<1x64x32xbf16>
    %558 = vector.shape_cast %557 : vector<1x64x32xbf16> to vector<64x32xbf16>
    %cst_185 = arith.constant dense<0.000000e+00> : vector<16x32xf32>
    %559 = tpu.matmul %556, %558, %cst_185 {dimension_numbers = #tpu.dot_dimension_numbers<[1], [0], [0], [1], [0, 0, 1, 1], [], []>} : vector<16x64xbf16>, vector<64x32xbf16>, vector<16x32xf32> -> vector<16x32xf32>
    %c1_186 = arith.constant 1 : index
    %c0_187 = arith.constant 0 : index
    %c0_188 = arith.constant 0 : index
    %560 = vector.load %arg13[%c1_186, %c0_187, %c0_188] : memref<2x1x32xf32, #tpu.memory_space<vmem>>, vector<1x1x32xf32>
    %561 = vector.shape_cast %560 : vector<1x1x32xf32> to vector<1x32xf32>
    %562 = vector.broadcast %561 : vector<1x32xf32> to vector<16x32xf32>
    %563 = arith.addf %559, %562 : vector<16x32xf32>
    %564 = arith.addf %563, %508 : vector<16x32xf32>
    %c1_189 = arith.constant 1 : index
    %c0_190 = arith.constant 0 : index
    %c0_191 = arith.constant 0 : index
    %565 = vector.load %arg14[%c1_189, %c0_190, %c0_191] : memref<2x1x32xf32, #tpu.memory_space<vmem>>, vector<1x1x32xf32>
    %566 = vector.shape_cast %565 : vector<1x1x32xf32> to vector<1x32xf32>
    %c1_192 = arith.constant 1 : index
    %c0_193 = arith.constant 0 : index
    %c0_194 = arith.constant 0 : index
    %567 = vector.load %arg15[%c1_192, %c0_193, %c0_194] : memref<2x1x32xf32, #tpu.memory_space<vmem>>, vector<1x1x32xf32>
    %568 = vector.shape_cast %567 : vector<1x1x32xf32> to vector<1x32xf32>
    %cst_195 = arith.constant dense<0.000000e+00> : vector<16xf32>
    %569 = vector.multi_reduction <add>, %564, %cst_195 [1] : vector<16x32xf32> to vector<16xf32>
    %570 = vector.shape_cast %569 : vector<16xf32> to vector<16x1xf32>
    %cst_196 = arith.constant 3.200000e+01 : f32
    %571 = vector.broadcast %cst_196 : f32 to vector<16x1xf32>
    %572 = arith.divf %570, %571 : vector<16x1xf32>
    %573 = vector.broadcast %572 : vector<16x1xf32> to vector<16x32xf32>
    %574 = arith.subf %564, %573 : vector<16x32xf32>
    %575 = arith.mulf %574, %574 : vector<16x32xf32>
    %cst_197 = arith.constant dense<0.000000e+00> : vector<16xf32>
    %576 = vector.multi_reduction <add>, %575, %cst_197 [1] : vector<16x32xf32> to vector<16xf32>
    %577 = vector.shape_cast %576 : vector<16xf32> to vector<16x1xf32>
    %cst_198 = arith.constant 3.200000e+01 : f32
    %578 = vector.broadcast %cst_198 : f32 to vector<16x1xf32>
    %579 = arith.divf %577, %578 : vector<16x1xf32>
    %580 = vector.broadcast %572 : vector<16x1xf32> to vector<16x32xf32>
    %581 = arith.subf %564, %580 : vector<16x32xf32>
    %cst_199 = arith.constant 9.99999996E-13 : f32
    %582 = vector.broadcast %cst_199 : f32 to vector<16x1xf32>
    %583 = arith.addf %579, %582 : vector<16x1xf32>
    %584 = math.rsqrt %583 : vector<16x1xf32>
    %585 = vector.broadcast %584 : vector<16x1xf32> to vector<16x32xf32>
    %586 = arith.mulf %581, %585 : vector<16x32xf32>
    %587 = vector.broadcast %566 : vector<1x32xf32> to vector<16x32xf32>
    %588 = arith.mulf %586, %587 : vector<16x32xf32>
    %589 = vector.broadcast %568 : vector<1x32xf32> to vector<16x32xf32>
    %590 = arith.addf %588, %589 : vector<16x32xf32>
    %591 = arith.truncf %590 : vector<16x32xf32> to vector<16x32xbf16>
    %c0_200 = arith.constant 0 : index
    %c0_201 = arith.constant 0 : index
    %592 = vector.load %arg16[%c0_200, %c0_201] : memref<32x128xbf16, #tpu.memory_space<vmem>>, vector<32x128xbf16>
    %cst_202 = arith.constant dense<0.000000e+00> : vector<16x128xf32>
    %593 = tpu.matmul %591, %592, %cst_202 {dimension_numbers = #tpu.dot_dimension_numbers<[1], [0], [0], [1], [0, 0, 1, 1], [], []>} : vector<16x32xbf16>, vector<32x128xbf16>, vector<16x128xf32> -> vector<16x128xf32>
    %c0_203 = arith.constant 0 : index
    %c0_204 = arith.constant 0 : index
    %594 = vector.load %arg17[%c0_203, %c0_204] : memref<1x128xf32, #tpu.memory_space<vmem>>, vector<1x128xf32>
    %595 = vector.broadcast %594 : vector<1x128xf32> to vector<16x128xf32>
    %596 = arith.addf %593, %595 : vector<16x128xf32>
    %c0_205 = arith.constant 0 : index
    %c0_206 = arith.constant 0 : index
    %597 = vector.load %arg18[%c0_205, %c0_206] : memref<16x128xf32, #tpu.memory_space<vmem>>, vector<16x128xf32>
    tpu.vector_store %arg18[%c0_205, %c0_206], %596 {strides = array<i32>} : memref<16x128xf32, #tpu.memory_space<vmem>>, vector<16x128xf32>,
    return
  }
  func.func @transform_0(%arg0: i32) -> (i32, i32) {
    %c0_i32 = arith.constant 0 : i32
    %c0_i32_0 = arith.constant 0 : i32
    %c0_i32_1 = arith.constant 0 : i32
    return %c0_i32, %c0_i32_0 : i32, i32
  }
  func.func @transform_1(%arg0: i32) -> (i32, i32) {
    %c0_i32 = arith.constant 0 : i32
    %c0_i32_0 = arith.constant 0 : i32
    %c0_i32_1 = arith.constant 0 : i32
    return %c0_i32, %c0_i32_0 : i32, i32
  }
  func.func @transform_2(%arg0: i32) -> (i32, i32) {
    %c0_i32 = arith.constant 0 : i32
    %c0_i32_0 = arith.constant 0 : i32
    %c0_i32_1 = arith.constant 0 : i32
    return %c0_i32, %c0_i32_0 : i32, i32
  }
  func.func @transform_3(%arg0: i32) -> (i32, i32, i32) {
    %c0_i32 = arith.constant 0 : i32
    %c0_i32_0 = arith.constant 0 : i32
    %c0_i32_1 = arith.constant 0 : i32
    %c0_i32_2 = arith.constant 0 : i32
    return %c0_i32, %c0_i32_0, %c0_i32_1 : i32, i32, i32
  }
  func.func @transform_4(%arg0: i32) -> (i32, i32, i32) {
    %c0_i32 = arith.constant 0 : i32
    %c0_i32_0 = arith.constant 0 : i32
    %c0_i32_1 = arith.constant 0 : i32
    %c0_i32_2 = arith.constant 0 : i32
    return %c0_i32, %c0_i32_0, %c0_i32_1 : i32, i32, i32
  }
  func.func @transform_5(%arg0: i32) -> (i32, i32, i32) {
    %c0_i32 = arith.constant 0 : i32
    %c0_i32_0 = arith.constant 0 : i32
    %c0_i32_1 = arith.constant 0 : i32
    %c0_i32_2 = arith.constant 0 : i32
    return %c0_i32, %c0_i32_0, %c0_i32_1 : i32, i32, i32
  }
  func.func @transform_6(%arg0: i32) -> (i32, i32, i32) {
    %c0_i32 = arith.constant 0 : i32
    %c0_i32_0 = arith.constant 0 : i32
    %c0_i32_1 = arith.constant 0 : i32
    %c0_i32_2 = arith.constant 0 : i32
    return %c0_i32, %c0_i32_0, %c0_i32_1 : i32, i32, i32
  }
  func.func @transform_7(%arg0: i32) -> (i32, i32, i32) {
    %c0_i32 = arith.constant 0 : i32
    %c0_i32_0 = arith.constant 0 : i32
    %c0_i32_1 = arith.constant 0 : i32
    %c0_i32_2 = arith.constant 0 : i32
    return %c0_i32, %c0_i32_0, %c0_i32_1 : i32, i32, i32
  }
  func.func @transform_8(%arg0: i32) -> (i32, i32, i32) {
    %c0_i32 = arith.constant 0 : i32
    %c0_i32_0 = arith.constant 0 : i32
    %c0_i32_1 = arith.constant 0 : i32
    %c0_i32_2 = arith.constant 0 : i32
    return %c0_i32, %c0_i32_0, %c0_i32_1 : i32, i32, i32
  }
  func.func @transform_9(%arg0: i32) -> (i32, i32, i32) {
    %c0_i32 = arith.constant 0 : i32
    %c0_i32_0 = arith.constant 0 : i32
    %c0_i32_1 = arith.constant 0 : i32
    %c0_i32_2 = arith.constant 0 : i32
    return %c0_i32, %c0_i32_0, %c0_i32_1 : i32, i32, i32
  }
  func.func @transform_10(%arg0: i32) -> (i32, i32, i32) {
    %c0_i32 = arith.constant 0 : i32
    %c0_i32_0 = arith.constant 0 : i32
    %c0_i32_1 = arith.constant 0 : i32
    %c0_i32_2 = arith.constant 0 : i32
    return %c0_i32, %c0_i32_0, %c0_i32_1 : i32, i32, i32
  }
  func.func @transform_11(%arg0: i32) -> (i32, i32, i32) {
    %c0_i32 = arith.constant 0 : i32
    %c0_i32_0 = arith.constant 0 : i32
    %c0_i32_1 = arith.constant 0 : i32
    %c0_i32_2 = arith.constant 0 : i32
    return %c0_i32, %c0_i32_0, %c0_i32_1 : i32, i32, i32
  }
  func.func @transform_12(%arg0: i32) -> (i32, i32, i32) {
    %c0_i32 = arith.constant 0 : i32
    %c0_i32_0 = arith.constant 0 : i32
    %c0_i32_1 = arith.constant 0 : i32
    %c0_i32_2 = arith.constant 0 : i32
    return %c0_i32, %c0_i32_0, %c0_i32_1 : i32, i32, i32
  }
  func.func @transform_13(%arg0: i32) -> (i32, i32, i32) {
    %c0_i32 = arith.constant 0 : i32
    %c0_i32_0 = arith.constant 0 : i32
    %c0_i32_1 = arith.constant 0 : i32
    %c0_i32_2 = arith.constant 0 : i32
    return %c0_i32, %c0_i32_0, %c0_i32_1 : i32, i32, i32
  }
  func.func @transform_14(%arg0: i32) -> (i32, i32, i32) {
    %c0_i32 = arith.constant 0 : i32
    %c0_i32_0 = arith.constant 0 : i32
    %c0_i32_1 = arith.constant 0 : i32
    %c0_i32_2 = arith.constant 0 : i32
    return %c0_i32, %c0_i32_0, %c0_i32_1 : i32, i32, i32
  }
  func.func @transform_15(%arg0: i32) -> (i32, i32) {
    %c0_i32 = arith.constant 0 : i32
    %c0_i32_0 = arith.constant 0 : i32
    %c0_i32_1 = arith.constant 0 : i32
    return %c0_i32, %c0_i32_0 : i32, i32
  }
  func.func @transform_16(%arg0: i32) -> (i32, i32) {
    %c0_i32 = arith.constant 0 : i32
    %c0_i32_0 = arith.constant 0 : i32
    %c0_i32_1 = arith.constant 0 : i32
    return %c0_i32, %c0_i32_0 : i32, i32
  }
  func.func @transform_17(%arg0: i32) -> (i32, i32) {
    %c0_i32 = arith.constant 0 : i32
    %c0_i32_0 = arith.constant 0 : i32
    %c0_i32_1 = arith.constant 0 : i32
    return %c0_i32, %c0_i32_0 : i32, i32
  }
}

</mosaic_0001>

<bundles_post_ra>
// kernel: torch_model_forward.1
= control target key start
LH: loop header
LB: loop body
LE: loop exit
PB: predicated region body
PF: predicated region fallthrough
CT: control target
= control target key end

     0   :  { %vm61_vm0 = vcmask 261120   ;;  %v3525_v14 = vmov 0.0   ;;  %vm3526_vm1 = vmmov 0   ;;  %s3528_s24 = smov 96   ;;  %s3529_s25 = smov 120   ;;  %vm177_vm2 = vcmask 64512   ;;  %s4260_s0 = inlined_call_operand.vmem [shape: f32[16,32], index: 0, kind: input, shape index: {}]   ;;  %s4261_s3 = inlined_call_operand.vmem [shape: bf16[2,32,96], index: 3, kind: input, shape index: {}]   ;;  %s4262_s1 = inlined_call_operand.vmem [shape: f32[1,32], index: 1, kind: input, shape index: {}]   ;;  %s4263_s2 = inlined_call_operand.vmem [shape: f32[1,32], index: 2, kind: input, shape index: {}]   ;;  %s4264_s4 = inlined_call_operand.vmem [shape: f32[2,1,96], index: 4, kind: input, shape index: {}]   ;;  %s4265_s5 = inlined_call_operand.vmem [shape: bf16[2,32,32], index: 5, kind: input, shape index: {}]   ;;  %s4266_s6 = inlined_call_operand.vmem [shape: f32[2,1,32], index: 6, kind: input, shape index: {}]   ;;  %s4267_s9 = inlined_call_operand.vmem [shape: bf16[2,32,64], index: 9, kind: input, shape index: {}]   ;;  %s4268_s7 = inlined_call_operand.vmem [shape: f32[2,1,32], index: 7, kind: input, shape index: {}]   ;;  %s4269_s8 = inlined_call_operand.vmem [shape: f32[2,1,32], index: 8, kind: input, shape index: {}]   ;;  %s4270_s11 = inlined_call_operand.vmem [shape: bf16[2,64,32], index: 11, kind: input, shape index: {}]   ;;  %s4271_s10 = inlined_call_operand.vmem [shape: f32[2,1,64], index: 10, kind: input, shape index: {}]   ;;  %s4272_s12 = inlined_call_operand.vmem [shape: f32[2,1,32], index: 12, kind: input, shape index: {}]   ;;  %s4273_s13 = inlined_call_operand.vmem [shape: f32[2,1,32], index: 13, kind: input, shape index: {}]   ;;  %s4274_s14 = inlined_call_operand.vmem [shape: f32[2,1,32], index: 14, kind: input, shape index: {}]   ;;  %s4275_s15 = inlined_call_operand.vmem [shape: bf16[32,128], index: 15, kind: input, shape index: {}]   ;;  %s4276_s16 = inlined_call_operand.vmem [shape: f32[1,128], index: 16, kind: input, shape index: {}]   ;;  %s4277_s17 = inlined_call_operand.vmem [shape: f32[16,128], index: 17, kind: output, shape index: {}]  }
   0x1   :  { %4287 = sst [smem:[#allocation2_spill]] %s4260_s0  ;;  %3085 = vmatprep.subr.bf16.mxu0 %v3525_v14  ;;  %3089 = vmatprep.mubr.msk.bf16.mxu0 %vm3526_vm1, %v3525_v14  ;;  %v2880_v25 = vld [vmem:[%s4262_s1] ss:$0 sm:$0xff]  ;;  %s3531_s27 = smov 80   ;;  %vm241_vm3 = vcmask 1043456   ;;  %vm628_vm4 = vcmask 130048  }
   0x2   :  { %4288 = sst [smem:[#allocation3_spill]] %s4261_s3  ;;  %s4289_s26 = sld [smem:[#allocation2_spill]]  ;;  %3093 = vmatprep.subr.bf16.mxu1 %v3525_v14  ;;  %3095 = vmatprep.mubr.msk.bf16.mxu1 %vm3526_vm1, %v3525_v14  ;;  %v2881_v29 = vld [vmem:[%s4263_s2] ss:$0 sm:$0xff]  ;;  %vm630_vm5 = vcmask 195584   ;;  %vm1361_vm8 = vcmask 523264  }
   0x3   :  { %s4290_s30 = sld [smem:[#allocation3_spill]]  ;;  %v2882_v34 = vld [vmem:[%s4264_s4] ss:$0 sm:$0xff]  ;;  %s3527_s2 = smov 88  }
   0x4   :  { %s3532_s28 = smov 104   ;;  %s3533_s29 = smov 72  }
   0x5   :  { %s3534_s0 = smov 56   ;;  %s3535_s18 = smov 64  }
   0x6   :  { %s4285_s19 = smov 48   ;;  %s4280_s3 = smov 40  }
   0x7   :  { %s4284_s20 = smov 8   ;;  %s4283_s1 = smov 16  }
   0x8   :  { %v57_v0 = vld [vmem:[%s4289_s26] sm:$0xff]  ;;  %v58_v1 = vld [vmem:[%s4289_s26 + $0x8] sm:$0xff]  ;;  %s3530_s26 = smov 112   ;;  %s4282_s21 = smov 24  }
   0x9   :  { %v62_v2 = vsel %vm61_vm0, %v57_v0, 0.0  ;;  %v65_v3 = vsel %vm61_vm0, %v58_v1, 0.0  ;;  %v3403_v15 = vld [vmem:[%s4290_s30] sm:$0xff]   ;;  %v3404_v16 = vld [vmem:[%s4290_s30 + $0x8] sm:$0xff]  }
   0xa   :  { %63 = vadd.xlane.f32.xlu0 %v62_v2  ;;  %3086 = vmatpush3.bf16.msra.mxu0 %v3403_v15 }
   0xb   :  { %3087 = vmatprep.subr.bf16.mxu0 %v3525_v14 }
   0xe   :  { %66 = vadd.xlane.f32.xlu0 %v65_v3  ;;  %3088 = vmatpush3.bf16.msra.mxu0 %v3404_v16 }
   0xf   :  { %3099 = vmatprep.subr.bf16.mxu0 %v3525_v14 }
  0x97   :  { %v64_v4 = vpop.xlane.xlu0 %63 }
  0x98   :  { %v69_v5 = vmul.f32 0.03125, %v64_v4 }
  0x9a   :  { %v71_v6 = vsub.f32 %v57_v0, %v69_v5 }
  0x9b   :  { %v67_v7 = vpop.xlane.xlu0 %66 }
  0x9c   :  { %v70_v8 = vmul.f32 0.03125, %v67_v7  ;;  %v73_v9 = vmul.f32 %v71_v6, %v71_v6 }
  0x9e   :  { %v72_v10 = vsub.f32 %v58_v1, %v70_v8  ;;  %v75_v11 = vsel %vm61_vm0, %v73_v9, 0.0 }
  0x9f   :  { %76 = vadd.xlane.f32.xlu1 %v75_v11 }
  0xa0   :  { %v74_v12 = vmul.f32 %v72_v10, %v72_v10 }
  0xa2   :  { %v78_v13 = vsel %vm61_vm0, %v74_v12, 0.0 }
  0xa3   :  { %79 = vadd.xlane.f32.xlu1 %v78_v13 }
 0x12c   :  { %v77_v17 = vpop.xlane.xlu1 %76 }
 0x12d   :  { %v81_v18 = vmul.f32 0.03125, %v77_v17 }
 0x12f   :  { %v83_v19 = vadd.f32 1e-12, %v81_v18 }
 0x130   :  { %v80_v20 = vpop.xlane.xlu1 %79 }
 0x131   :  { %3425 = vrsqrt.f32 %v83_v19  ;;  %v82_v21 = vmul.f32 0.03125, %v80_v20 }
 0x133   :  { %v84_v22 = vadd.f32 1e-12, %v82_v21 }
 0x135   :  { %3427 = vrsqrt.f32 %v84_v22 }
 0x13b   :  { %v3426_v23 = vpop.eup %3425 }
 0x13c   :  { %v87_v24 = vmul.f32 %v3426_v23, %v71_v6 }
 0x13e   :  { %v95_v28 = vmul.f32 %v2880_v25, %v87_v24 }
 0x13f   :  { %v3428_v26 = vpop.eup %3427 }
 0x140   :  { %v88_v27 = vmul.f32 %v3428_v26, %v72_v10  ;;  %v3661_v31 = vadd.f32 %v2881_v29, %v95_v28 }
 0x142   :  { %v96_v30 = vmul.f32 %v2880_v25, %v88_v27 }
 0x144   :  { %v3663_v32 = vadd.f32 %v2881_v29, %v96_v30 }
 0x146   :  { %v105_v33 = vpack.c.bf16 %v3663_v32, %v3661_v31 }
 0x148   :  { %3090 = vmatmul.mubr.msk.bf16.vlgmr.msra.gmra.mrb[0].mxu0 %vm61_vm0, %v105_v33 }
 0x149   :  { %3101 = vmatprep.mubr.msk.bf16.mxu0 %vm3526_vm1, %v3525_v14 }
 0x21b   :  { %v166_v35 = vpop.f32.mrb[0].mxu0 }
 0x21c   :  { %v167_v36 = vadd.f32 %v2882_v34, %v166_v35  ;;  %v3091_v37 = vpop.f32.mrb[1].mxu0 }
 0x21d   :  { %v169_v38 = vpop.f32.mrb[2].mxu0 }
 0x21e   :  { %v3673_v39 = vpack.c.bf16 %v167_v36, %v167_v36  ;;  %v3092_v40 = vpop.f32.mrb[3].mxu0  ;;  %v170_v41 = vadd.f32 %v2882_v34, %v169_v38 }
 0x220   :  { %287 = vrot.lane.b32.xlu1 %v3673_v39, %s3527_s2  ;;  %175 = vrot.lane.b32.xlu0 %v3673_v39, %s3528_s24  ;;  %v3687_v42 = vpack.c.bf16 %v170_v41, %v170_v41 }
 0x224   :  { %285 = vrot.lane.b32.xlu1 %v3673_v39, %s3529_s25  ;;  %395 = vrot.lane.b32.xlu0 %v3673_v39, %s3530_s26 }
 0x228   :  { %397 = vrot.lane.b32.xlu1 %v3673_v39, %s3531_s27  ;;  %505 = vrot.lane.b32.xlu0 %v3673_v39, %s3532_s28 }
 0x22c   :  { %507 = vrot.lane.b32.xlu1 %v3673_v39, %s3533_s29  ;;  %744 = vrot.lane.b32.xlu0 %v3687_v42, %s3527_s2 }
 0x230   :  { %854 = vrot.lane.b32.xlu0 %v3687_v42, %s3531_s27  ;;  %634 = vrot.lane.b32.xlu1 %v3687_v42, %s3528_s24 }
 0x234   :  { %964 = vrot.lane.b32.xlu0 %v3687_v42, %s3533_s29  ;;  %742 = vrot.lane.b32.xlu1 %v3687_v42, %s3529_s25 }
 0x238   :  { %852 = vrot.lane.b32.xlu1 %v3687_v42, %s3530_s26 }
 0x23c   :  { %962 = vrot.lane.b32.xlu1 %v3687_v42, %s3532_s28 }
 0x240   :  { %347 = vrot.lane.b32.xlu1 %v3673_v39, %s3534_s0 }
 0x292   :  { %v176_v43 = vpop.permute.xlu0 %175  ;;  %v288_v45 = vpop.permute.xlu1 %287 }
 0x293   :  { %v182_v44 = vsel %vm177_vm2, %v176_v43, 0  ;;  %v293_v47 = vsel %vm177_vm2, %v288_v45, 0 }
 0x294   :  { %3094 = vmatpush3.bf16.xpose.msra.mxu1 %v182_v44 }
 0x295   :  { %3105 = vmatprep.subr.bf16.mxu1 %v3525_v14 }
 0x296   :  { %v286_v46 = vpop.permute.xlu1 %285  ;;  %v396_v51 = vpop.permute.xlu0 %395 }
 0x29a   :  { %v398_v48 = vpop.permute.xlu1 %397  ;;  %v506_v54 = vpop.permute.xlu0 %505 }
 0x29b   :  { %3096 = vmatmul.mubr.msk.bf16.vlgmr.msra.gmra.mrb[0].mxu1 %vm177_vm2, %v3673_v39  ;;  %v403_v49 = vsel %vm177_vm2, %v398_v48, 0 }
 0x29c   :  { %3106 = vmatpush3.bf16.xpose.msra.mxu1 %v293_v47  ;;  %3107 = vmatprep.mubr.msk.bf16.mxu1 %vm3526_vm1, %v3525_v14 }
 0x29d   :  { %3117 = vmatprep.subr.bf16.mxu1 %v3525_v14 }
 0x29e   :  { %v508_v50 = vpop.permute.xlu1 %507  ;;  %v745_v56 = vpop.permute.xlu0 %744 }
 0x29f   :  { %v513_v52 = vsel %vm177_vm2, %v508_v50, 0  ;;  %v750_v57 = vsel %vm177_vm2, %v745_v56, 0 }
 0x2a2   :  { %v635_v53 = vpop.permute.xlu1 %634  ;;  %v855_v58 = vpop.permute.xlu0 %854 }
 0x2a3   :  { %3108 = vmatmul.mubr.msk.bf16.vlgmr.msra.gmra.mrb[4].mxu1 %vm177_vm2, %v286_v46  ;;  %v640_v55 = vsel %vm177_vm2, %v635_v53, 0  ;;  %v860_v60 = vsel %vm177_vm2, %v855_v58, 0 }
 0x2a4   :  { %3118 = vmatpush3.bf16.xpose.msra.mxu1 %v403_v49  ;;  %3119 = vmatprep.mubr.msk.bf16.mxu1 %vm3526_vm1, %v3525_v14 }
 0x2a5   :  { %3129 = vmatprep.subr.bf16.mxu1 %v3525_v14 }
 0x2a6   :  { %v743_v59 = vpop.permute.xlu1 %742  ;;  %v965_v61 = vpop.permute.xlu0 %964 }
 0x2a7   :  { %v970_v63 = vsel %vm177_vm2, %v965_v61, 0 }
 0x2aa   :  { %v853_v62 = vpop.permute.xlu1 %852 }
 0x2ab   :  { %3120 = vmatmul.mubr.msk.bf16.vlgmr.msra.gmra.mrb[8].mxu1 %vm177_vm2, %v396_v51 }
 0x2ac   :  { %3130 = vmatpush3.bf16.xpose.msra.mxu1 %v513_v52  ;;  %3131 = vmatprep.mubr.msk.bf16.mxu1 %vm3526_vm1, %v3525_v14 }
 0x2ad   :  { %3141 = vmatprep.subr.bf16.mxu1 %v3525_v14 }
 0x2ae   :  { %v963_v0 = vpop.permute.xlu1 %962 }
 0x2b2   :  { %v3776_v49 = vpop.permute.xlu1 %347 }
 0x2b3   :  { %3132 = vmatmul.mubr.msk.bf16.vlgmr.msra.gmra.mrb[12].mxu1 %vm177_vm2, %v506_v54 }
 0x2b4   :  { %3142 = vmatpush3.bf16.xpose.msra.mxu1 %v640_v55  ;;  %3143 = vmatprep.mubr.msk.bf16.mxu1 %vm3526_vm1, %v3525_v14 }
 0x2b5   :  { %3153 = vmatprep.subr.bf16.mxu1 %v3525_v14 }
 0x2bb   :  { %3144 = vmatmul.mubr.msk.bf16.vlgmr.msra.gmra.mrb[16].mxu1 %vm177_vm2, %v3687_v42 }
 0x2bc   :  { %3154 = vmatpush3.bf16.xpose.msra.mxu1 %v750_v57  ;;  %3155 = vmatprep.mubr.msk.bf16.mxu1 %vm3526_vm1, %v3525_v14 }
 0x2bd   :  { %3165 = vmatprep.subr.bf16.mxu1 %v3525_v14 }
 0x2c3   :  { %3156 = vmatmul.mubr.msk.bf16.vlgmr.msra.gmra.mrb[20].mxu1 %vm177_vm2, %v743_v59 }
 0x2c4   :  { %3166 = vmatpush3.bf16.xpose.msra.mxu1 %v860_v60  ;;  %3167 = vmatprep.mubr.msk.bf16.mxu1 %vm3526_vm1, %v3525_v14 }
 0x2c5   :  { %3177 = vmatprep.subr.bf16.mxu1 %v3525_v14 }
 0x2cb   :  { %3168 = vmatmul.mubr.msk.bf16.vlgmr.msra.gmra.mrb[24].mxu1 %vm177_vm2, %v853_v62 }
 0x2cc   :  { %3178 = vmatpush3.bf16.xpose.msra.mxu1 %v970_v63  ;;  %3179 = vmatprep.mubr.msk.bf16.mxu1 %vm3526_vm1, %v3525_v14 }
 0x2cd   :  { %3189 = vmatprep.subr.bf16.mxu1 %v3525_v14 }
 0x2d3   :  { %3180 = vmatmul.mubr.msk.bf16.vlgmr.msra.gmra.mrb[28].mxu1 %vm177_vm2, %v963_v0 }
 0x2d4   :  { %3193 = vmatprep.mubr.msk.bf16.mxu1 %vm3526_vm1, %v3525_v14 }
 0x36e   :  { %v218_v1 = vpop.f32.mrb[0].mxu1 }
 0x36f   :  { %v3097_v2 = vpop.f32.mrb[1].mxu1  ;;  %v224_v3 = vsel %vm177_vm2, %v218_v1, -inf }
 0x370   :  { %v221_v4 = vpop.f32.mrb[2].mxu1  ;;  %225 = vmax.xlane.f32.xlu0 %v224_v3 }
 0x371   :  { %v3098_v5 = vpop.f32.mrb[3].mxu1 }
 0x376   :  { %v329_v6 = vpop.f32.mrb[4].mxu1 }
 0x377   :  { %v3109_v7 = vpop.f32.mrb[5].mxu1  ;;  %v335_v8 = vsel %vm177_vm2, %v329_v6, -inf }
 0x378   :  { %v332_v9 = vpop.f32.mrb[6].mxu1  ;;  %336 = vmax.xlane.f32.xlu1 %v335_v8 }
 0x379   :  { %v3110_v10 = vpop.f32.mrb[7].mxu1 }
 0x37e   :  { %v3751_v11 = vpop.f32.mrb[8].mxu1 }
 0x37f   :  { %v3121_v12 = vpop.f32.mrb[9].mxu1  ;;  %v445_v35 = vsel %vm177_vm2, %v3751_v11, -inf }
 0x380   :  { %v442_v13 = vpop.f32.mrb[10].mxu1 }
 0x381   :  { %v3122_v15 = vpop.f32.mrb[11].mxu1 }
 0x386   :  { %v3753_v16 = vpop.f32.mrb[12].mxu1  ;;  %236 = vrot.lane.b32.xlu0 %v3673_v39, %s3535_s18 }
 0x387   :  { %v3133_v17 = vpop.f32.mrb[13].mxu1  ;;  %v555_v41 = vsel %vm177_vm2, %v3753_v16, -inf }
 0x388   :  { %v552_v18 = vpop.f32.mrb[14].mxu1 }
 0x389   :  { %v3134_v19 = vpop.f32.mrb[15].mxu1 }
 0x38e   :  { %v3757_v20 = vpop.f32.mrb[16].mxu1 }
 0x38f   :  { %v3145_v21 = vpop.f32.mrb[17].mxu1  ;;  %v682_v44 = vsel %vm177_vm2, %v3757_v20, -inf }
 0x390   :  { %v679_v22 = vpop.f32.mrb[18].mxu1 }
 0x391   :  { %v3146_v23 = vpop.f32.mrb[19].mxu1 }
 0x396   :  { %v786_v24 = vpop.f32.mrb[20].mxu1 }
 0x397   :  { %v3157_v25 = vpop.f32.mrb[21].mxu1  ;;  %v792_v26 = vsel %vm177_vm2, %v786_v24, -inf }
 0x398   :  { %793 = vmax.xlane.f32.xlu1 %v792_v26  ;;  %v789_v27 = vpop.f32.mrb[22].mxu1 }
 0x399   :  { %v3158_v28 = vpop.f32.mrb[23].mxu1 }
 0x39e   :  { %v3760_v29 = vpop.f32.mrb[24].mxu1 }
 0x39f   :  { %v3169_v30 = vpop.f32.mrb[25].mxu1  ;;  %v902_v45 = vsel %vm177_vm2, %v3760_v29, -inf }
 0x3a0   :  { %v899_v33 = vpop.f32.mrb[26].mxu1 }
 0x3a1   :  { %v3170_v34 = vpop.f32.mrb[27].mxu1  ;;  %v353_v33 = vsel %vm241_vm3, %v3776_v49, 0 }
 0x3a5   :  { %446 = vmax.xlane.f32.xlu0 %v445_v35 }
 0x3a6   :  { %v3764_v36 = vpop.f32.mrb[28].mxu1 }
 0x3a7   :  { %v3181_v37 = vpop.f32.mrb[29].mxu1  ;;  %v1012_v38 = vsel %vm177_vm2, %v3764_v36, -inf }
 0x3a8   :  { %1013 = vmax.xlane.f32.xlu1 %v1012_v38  ;;  %v1009_v40 = vpop.f32.mrb[30].mxu1 }
 0x3a9   :  { %556 = vmax.xlane.f32.xlu0 %v555_v41  ;;  %v3182_v43 = vpop.f32.mrb[31].mxu1 }
 0x3ad   :  { %683 = vmax.xlane.f32.xlu0 %v682_v44 }
 0x3b1   :  { %903 = vmax.xlane.f32.xlu0 %v902_v45 }
 0x3c7   :  { %457 = vrot.lane.b32.xlu0 %v3673_v39, %s4285_s19 }
 0x3fd   :  { %v226_v46 = vpop.xlane.xlu0 %225 }
 0x3fe   :  { %v227_v47 = vsub.f32 %v218_v1, %v226_v46 }
 0x400   :  { %v228_v48 = vmul.f32 1.442695, %v227_v47 }
 0x401   :  { %v237_v50 = vpop.permute.xlu0 %236 }
 0x402   :  { %3429 = vpow2.f32 %v228_v48  ;;  %v243_v51 = vsel %vm241_vm3, %v237_v50, 0 }
 0x403   :  { %3100 = vmatpush3.bf16.msra.mxu0 %v243_v51 }
 0x404   :  { %3111 = vmatprep.subr.bf16.mxu0 %v3525_v14 }
 0x405   :  { %v337_v52 = vpop.xlane.xlu1 %336 }
 0x406   :  { %v338_v53 = vsub.f32 %v329_v6, %v337_v52 }
 0x408   :  { %v339_v54 = vmul.f32 1.442695, %v338_v53 }
 0x40a   :  { %3431 = vpow2.f32 %v339_v54 }
 0x40c   :  { %v3430_v55 = vpop.eup %3429 }
 0x40d   :  { %v230_v56 = vsel %vm177_vm2, %v3430_v55, 0.0 }
 0x40e   :  { %231 = vadd.xlane.f32.xlu0 %v230_v56 }
 0x414   :  { %v3781_v57 = vpop.eup %3431 }
 0x415   :  { %v341_v58 = vsel %vm177_vm2, %v3781_v57, 0.0 }
 0x416   :  { %342 = vadd.xlane.f32.xlu1 %v341_v58 }
 0x425   :  { %v794_v1 = vpop.xlane.xlu1 %793 }
 0x426   :  { %v795_v4 = vsub.f32 %v786_v24, %v794_v1 }
 0x427   :  { %694 = vrot.lane.b32.xlu1 %v3687_v42, %s3535_s18 }
 0x428   :  { %v796_v7 = vmul.f32 1.442695, %v795_v4 }
 0x432   :  { %v447_v59 = vpop.xlane.xlu0 %446 }
 0x433   :  { %v448_v60 = vsub.f32 %v3751_v11, %v447_v59 }
 0x435   :  { %v449_v61 = vmul.f32 1.442695, %v448_v60  ;;  %v1014_v19 = vpop.xlane.xlu1 %1013 }
 0x436   :  { %v557_v62 = vpop.xlane.xlu0 %556 }
 0x437   :  { %3433 = vpow2.f32 %v449_v61  ;;  %v558_v63 = vsub.f32 %v3753_v16, %v557_v62 }
 0x439   :  { %v559_v0 = vmul.f32 1.442695, %v558_v63 }
 0x43a   :  { %v684_v2 = vpop.xlane.xlu0 %683 }
 0x43b   :  { %v685_v3 = vsub.f32 %v3757_v20, %v684_v2  ;;  %3435 = vpow2.f32 %v559_v0  ;;  %v1015_v20 = vsub.f32 %v3764_v36, %v1014_v19 }
 0x43d   :  { %v686_v5 = vmul.f32 1.442695, %v685_v3  ;;  %v1016_v22 = vmul.f32 1.442695, %v1015_v20 }
 0x43e   :  { %v904_v16 = vpop.xlane.xlu0 %903 }
 0x43f   :  { %3437 = vpow2.f32 %v686_v5  ;;  %v905_v17 = vsub.f32 %v3760_v29, %v904_v16 }
 0x440   :  { %3439 = vpow2.f32 %v796_v7 }
 0x441   :  { %v3434_v6 = vpop.eup %3433  ;;  %v906_v18 = vmul.f32 1.442695, %v905_v17 }
 0x442   :  { %v451_v8 = vsel %vm177_vm2, %v3434_v6, 0.0  ;;  %v458_v25 = vpop.permute.xlu0 %457 }
 0x443   :  { %452 = vadd.xlane.f32.xlu0 %v451_v8  ;;  %3441 = vpow2.f32 %v906_v18  ;;  %v463_v36 = vsel %vm241_vm3, %v458_v25, 0 }
 0x444   :  { %3443 = vpow2.f32 %v1016_v22 }
 0x445   :  { %v3791_v9 = vpop.eup %3435 }
 0x446   :  { %v561_v10 = vsel %vm177_vm2, %v3791_v9, 0.0 }
 0x449   :  { %v3795_v11 = vpop.eup %3437 }
 0x44a   :  { %v688_v12 = vsel %vm177_vm2, %v3795_v11, 0.0  ;;  %v3799_v13 = vpop.eup %3439 }
 0x44b   :  { %562 = vadd.xlane.f32.xlu1 %v561_v10  ;;  %v798_v15 = vsel %vm177_vm2, %v3799_v13, 0.0 }
 0x44d   :  { %v3809_v21 = vpop.eup %3441 }
 0x44e   :  { %v908_v23 = vsel %vm177_vm2, %v3809_v21, 0.0 }
 0x44f   :  { %689 = vadd.xlane.f32.xlu1 %v688_v12 }
 0x453   :  { %799 = vadd.xlane.f32.xlu1 %v798_v15 }
 0x459   :  { %567 = vrot.lane.b32.xlu0 %v3673_v39, %s4280_s3  ;;  %v3813_v39 = vpop.eup %3443 }
 0x45a   :  { %v1018_v24 = vsel %vm177_vm2, %v3813_v39, 0.0 }
 0x464   :  { %804 = vrot.lane.b32.xlu1 %v3687_v42, %s3534_s0 }
 0x478   :  { %909 = vadd.xlane.f32.xlu0 %v908_v23 }
 0x488   :  { %1019 = vadd.xlane.f32.xlu1 %v1018_v24 }
 0x48e   :  { %914 = vrot.lane.b32.xlu0 %v3687_v42, %s4285_s19 }
 0x499   :  { %1024 = vrot.lane.b32.xlu1 %v3687_v42, %s4280_s3 }
 0x49b   :  { %v232_v26 = vpop.xlane.xlu0 %231 }
 0x49c   :  { %3445 = vrcp.f32 %v232_v26 }
 0x4a3   :  { %v343_v27 = vpop.xlane.xlu1 %342 }
 0x4a4   :  { %3447 = vrcp.f32 %v343_v27 }
 0x4a6   :  { %v3446_v28 = vpop.eup %3445 }
 0x4a7   :  { %v234_v29 = vmul.f32 %v3446_v28, %v3430_v55  ;;  %v695_v38 = vpop.permute.xlu1 %694 }
 0x4a8   :  { %v700_v53 = vsel %vm241_vm3, %v695_v38, 0 }
 0x4a9   :  { %v235_v30 = vpack.c.bf16 %v234_v29, %v234_v29 }
 0x4ab   :  { %3102 = vmatmul.mubr.msk.bf16.vlgmr.msra.gmra.mrb[4].mxu0 %vm177_vm2, %v235_v30 }
 0x4ac   :  { %3112 = vmatpush3.bf16.msra.mxu0 %v353_v33  ;;  %3113 = vmatprep.mubr.msk.bf16.mxu0 %vm3526_vm1, %v3525_v14 }
 0x4ad   :  { %3123 = vmatprep.subr.bf16.mxu0 %v3525_v14 }
 0x4ae   :  { %v3448_v34 = vpop.eup %3447 }
 0x4af   :  { %v345_v42 = vmul.f32 %v3448_v34, %v3781_v57 }
 0x4b1   :  { %v346_v35 = vpack.c.bf16 %v345_v42, %v345_v42 }
 0x4b3   :  { %3114 = vmatmul.mubr.msk.bf16.vlgmr.msra.gmra.mrb[8].mxu0 %vm177_vm2, %v346_v35  ;;  %v3405_v35 = vld [vmem:[%s4265_s5] sm:$0xff]  }
 0x4b4   :  { %3124 = vmatpush3.bf16.msra.mxu0 %v463_v36  ;;  %3125 = vmatprep.mubr.msk.bf16.mxu0 %vm3526_vm1, %v3525_v14 }
 0x4b5   :  { %3135 = vmatprep.subr.bf16.mxu0 %v3525_v14  ;;  %3190 = vmatpush3.bf16.msra.mxu1 %v3405_v35  ;;  %v2907_v35 = vld [vmem:[%s4269_s8] ss:$0 sm:$0xff] }
 0x4b6   :  { %3191 = vmatprep.subr.bf16.mxu1 %v3525_v14 }
 0x4d0   :  { %v453_v37 = vpop.xlane.xlu0 %452 }
 0x4d1   :  { %3449 = vrcp.f32 %v453_v37 }
 0x4d4   :  { %v568_v45 = vpop.permute.xlu0 %567 }
 0x4d5   :  { %v573_v47 = vsel %vm241_vm3, %v568_v45, 0 }
 0x4d8   :  { %v563_v40 = vpop.xlane.xlu1 %562 }
 0x4d9   :  { %3451 = vrcp.f32 %v563_v40 }
 0x4db   :  { %v3450_v41 = vpop.eup %3449 }
 0x4dc   :  { %v455_v43 = vmul.f32 %v3450_v41, %v3434_v6  ;;  %v690_v44 = vpop.xlane.xlu1 %689 }
 0x4dd   :  { %3453 = vrcp.f32 %v690_v44 }
 0x4de   :  { %v456_v46 = vpack.c.bf16 %v455_v43, %v455_v43  ;;  %v3406_v43 = vld [vmem:[%s4265_s5 + $0x8] sm:$0xff]  }
 0x4df   :  { %3192 = vmatpush3.bf16.msra.mxu1 %v3406_v43  ;;  %v3410_v43 = vld [vmem:[%s4270_s11 + $0x8] sm:$0xff]  }
 0x4e0   :  { %3126 = vmatmul.mubr.msk.bf16.vlgmr.msra.gmra.mrb[12].mxu0 %vm177_vm2, %v456_v46  ;;  %v800_v48 = vpop.xlane.xlu1 %799  ;;  %3205 = vmatprep.subr.bf16.mxu1 %v3525_v14 }
 0x4e1   :  { %3136 = vmatpush3.bf16.msra.mxu0 %v573_v47  ;;  %3137 = vmatprep.mubr.msk.bf16.mxu0 %vm3526_vm1, %v3525_v14  ;;  %3455 = vrcp.f32 %v800_v48 }
 0x4e2   :  { %3147 = vmatprep.subr.bf16.mxu0 %v3525_v14 }
 0x4e3   :  { %v3452_v49 = vpop.eup %3451 }
 0x4e4   :  { %v565_v50 = vmul.f32 %v3452_v49, %v3791_v9  ;;  %v805_v55 = vpop.permute.xlu1 %804 }
 0x4e5   :  { %v810_v58 = vsel %vm241_vm3, %v805_v55, 0 }
 0x4e6   :  { %v566_v51 = vpack.c.bf16 %v565_v50, %v565_v50 }
 0x4e7   :  { %v3454_v52 = vpop.eup %3453 }
 0x4e8   :  { %3138 = vmatmul.mubr.msk.bf16.vlgmr.msra.gmra.mrb[16].mxu0 %vm177_vm2, %v566_v51  ;;  %v692_v54 = vmul.f32 %v3454_v52, %v3795_v11 }
 0x4e9   :  { %3148 = vmatpush3.bf16.msra.mxu0 %v700_v53  ;;  %3149 = vmatprep.mubr.msk.bf16.mxu0 %vm3526_vm1, %v3525_v14 }
 0x4ea   :  { %3159 = vmatprep.subr.bf16.mxu0 %v3525_v14  ;;  %v693_v56 = vpack.c.bf16 %v692_v54, %v692_v54 }
 0x4eb   :  { %v3456_v57 = vpop.eup %3455 }
 0x4ec   :  { %v802_v59 = vmul.f32 %v3456_v57, %v3799_v13 }
 0x4ee   :  { %v803_v60 = vpack.c.bf16 %v802_v59, %v802_v59 }
 0x4f0   :  { %3150 = vmatmul.mubr.msk.bf16.vlgmr.msra.gmra.mrb[20].mxu0 %vm177_vm2, %v693_v56 }
 0x4f1   :  { %3160 = vmatpush3.bf16.msra.mxu0 %v810_v58  ;;  %3161 = vmatprep.mubr.msk.bf16.mxu0 %vm3526_vm1, %v3525_v14 }
 0x4f2   :  { %3171 = vmatprep.subr.bf16.mxu0 %v3525_v14 }
 0x4f8   :  { %3162 = vmatmul.mubr.msk.bf16.vlgmr.msra.gmra.mrb[24].mxu0 %vm177_vm2, %v803_v60 }
 0x4f9   :  { %3173 = vmatprep.mubr.msk.bf16.mxu0 %vm3526_vm1, %v3525_v14 }
 0x505   :  { %v910_v61 = vpop.xlane.xlu0 %909 }
 0x506   :  { %3457 = vrcp.f32 %v910_v61 }
 0x509   :  { %v915_v62 = vpop.permute.xlu0 %914 }
 0x50a   :  { %v920_v63 = vsel %vm241_vm3, %v915_v62, 0 }
 0x50b   :  { %3172 = vmatpush3.bf16.msra.mxu0 %v920_v63 }
 0x50c   :  { %3183 = vmatprep.subr.bf16.mxu0 %v3525_v14 }
 0x510   :  { %v3458_v0 = vpop.eup %3457 }
 0x511   :  { %v912_v1 = vmul.f32 %v3458_v0, %v3809_v21 }
 0x513   :  { %v913_v2 = vpack.c.bf16 %v912_v1, %v912_v1  ;;  %v2902_v1 = vld [vmem:[%s4266_s6] ss:$0 sm:$0xff] }
 0x515   :  { %3174 = vmatmul.mubr.msk.bf16.vlgmr.msra.gmra.mrb[28].mxu0 %vm177_vm2, %v913_v2  ;;  %v1020_v3 = vpop.xlane.xlu1 %1019 }
 0x516   :  { %3459 = vrcp.f32 %v1020_v3  ;;  %3185 = vmatprep.mubr.msk.bf16.mxu0 %vm3526_vm1, %v3525_v14 }
 0x519   :  { %v1025_v4 = vpop.permute.xlu1 %1024 }
 0x51a   :  { %v1030_v5 = vsel %vm241_vm3, %v1025_v4, 0 }
 0x51b   :  { %3184 = vmatpush3.bf16.msra.mxu0 %v1030_v5 }
 0x51c   :  { %3197 = vmatprep.subr.bf16.mxu0 %v3525_v14 }
 0x520   :  { %v3460_v6 = vpop.eup %3459 }
 0x521   :  { %v1022_v7 = vmul.f32 %v3460_v6, %v3813_v39 }
 0x523   :  { %v1023_v8 = vpack.c.bf16 %v1022_v7, %v1022_v7 }
 0x525   :  { %3186 = vmatmul.mubr.msk.bf16.vlgmr.msra.gmra.mrb[32].mxu0 %vm177_vm2, %v1023_v8 }
 0x526   :  { %3201 = vmatprep.mubr.msk.bf16.mxu0 %vm3526_vm1, %v3525_v14 }
 0x57e   :  { %v279_v9 = vpop.f32.mrb[4].mxu0 }
 0x57f   :  { %v3103_v10 = vpop.f32.mrb[5].mxu0 }
 0x580   :  { %v282_v11 = vpop.f32.mrb[6].mxu0 }
 0x581   :  { %v3104_v12 = vpop.f32.mrb[7].mxu0 }
 0x586   :  { %v389_v13 = vpop.f32.mrb[8].mxu0 }
 0x587   :  { %v3115_v15 = vpop.f32.mrb[9].mxu0 }
 0x588   :  { %v392_v16 = vpop.f32.mrb[10].mxu0 }
 0x589   :  { %v3116_v17 = vpop.f32.mrb[11].mxu0 }
 0x5b3   :  { %v499_v18 = vpop.f32.mrb[12].mxu0 }
 0x5b4   :  { %v3127_v19 = vpop.f32.mrb[13].mxu0 }
 0x5b5   :  { %v502_v20 = vpop.f32.mrb[14].mxu0 }
 0x5b6   :  { %v3128_v21 = vpop.f32.mrb[15].mxu0 }
 0x5bb   :  { %v609_v22 = vpop.f32.mrb[16].mxu0 }
 0x5bc   :  { %v3139_v23 = vpop.f32.mrb[17].mxu0 }
 0x5bd   :  { %v612_v39 = vpop.f32.mrb[18].mxu0 }
 0x5be   :  { %v3140_v24 = vpop.f32.mrb[19].mxu0 }
 0x5c3   :  { %v736_v25 = vpop.f32.mrb[20].mxu0 }
 0x5c4   :  { %v3151_v26 = vpop.f32.mrb[21].mxu0 }
 0x5c5   :  { %v739_v27 = vpop.f32.mrb[22].mxu0 }
 0x5c6   :  { %v3152_v28 = vpop.f32.mrb[23].mxu0 }
 0x5cb   :  { %v846_v29 = vpop.f32.mrb[24].mxu0 }
 0x5cc   :  { %v3373_v30 = vpack.i.bf16 %v846_v29, %v389_v13  ;;  %v3163_v33 = vpop.f32.mrb[25].mxu0 }
 0x5cd   :  { %v849_v34 = vpop.f32.mrb[26].mxu0 }
 0x5ce   :  { %3374 = vrot.lane.b32.xlu0 %v3373_v30, %s4284_s20  ;;  %v3164_v42 = vpop.f32.mrb[27].mxu0  ;;  %v2906_v30 = vld [vmem:[%s4268_s7] ss:$0 sm:$0xff] }
 0x5e8   :  { %v956_v36 = vpop.f32.mrb[28].mxu0 }
 0x5e9   :  { %v3378_v37 = vpack.i.bf16 %v956_v36, %v499_v18  ;;  %v3175_v38 = vpop.f32.mrb[29].mxu0 }
 0x5ea   :  { %v959_v40 = vpop.f32.mrb[30].mxu0 }
 0x5eb   :  { %3379 = vrot.lane.b32.xlu1 %v3378_v37, %s4283_s1  ;;  %v3176_v41 = vpop.f32.mrb[31].mxu0 }
 0x5ec   :  { %v3409_v41 = vld [vmem:[%s4270_s11] sm:$0xff]  }
 0x5f8   :  { %v1066_v44 = vpop.f32.mrb[32].mxu0 }
 0x5f9   :  { %v3383_v45 = vpack.i.bf16 %v1066_v44, %v609_v22  ;;  %v3187_v46 = vpop.f32.mrb[33].mxu0  ;;  %v3408_v22 = vld [vmem:[%s4267_s9 + $0x8] sm:$0xff]   ;;  %v3411_v44 = vld [vmem:[%s4270_s11 + $0x10] sm:$0xff]  }
 0x5fa   :  { %v1069_v47 = vpop.f32.mrb[34].mxu0  ;;  %v2908_v46 = vld [vmem:[%s4271_s10] ss:$0 sm:$0xff] }
 0x5fb   :  { %3384 = vrot.lane.b32.xlu0 %v3383_v45, %s4282_s21  ;;  %v3188_v48 = vpop.f32.mrb[35].mxu0  ;;  %v3412_v45 = vld [vmem:[%s4270_s11 + $0x18] sm:$0xff]  }
 0x640   :  { %v3375_v49 = vpop.permute.xlu0 %3374 }
 0x641   :  { %v3377_v51 = vunpack.i.h.bf16 %v3375_v49  ;;  %v3376_v52 = vunpack.i.l.bf16 %v3375_v49 }
 0x643   :  { %v1084_v56 = vsel %vm177_vm2, %v736_v25, %v3377_v51  ;;  %v627_v57 = vsel %vm177_vm2, %v279_v9, %v3376_v52 }
 0x65d   :  { %v3380_v50 = vpop.permute.xlu1 %3379 }
 0x65e   :  { %v3382_v53 = vunpack.i.h.bf16 %v3380_v50  ;;  %v3381_v54 = vunpack.i.l.bf16 %v3380_v50 }
 0x660   :  { %v1085_v60 = vsel %vm628_vm4, %v1084_v56, %v3382_v53  ;;  %v629_v61 = vsel %vm628_vm4, %v627_v57, %v3381_v54 }
 0x66d   :  { %v3385_v55 = vpop.permute.xlu0 %3384 }
 0x66e   :  { %v3387_v58 = vunpack.i.h.bf16 %v3385_v55  ;;  %v3386_v59 = vunpack.i.l.bf16 %v3385_v55 }
 0x670   :  { %v1086_v62 = vsel %vm630_vm5, %v1085_v60, %v3387_v58  ;;  %v631_v63 = vsel %vm630_vm5, %v629_v61, %v3386_v59 }
 0x671   :  { %v1087_v0 = vpack.c.bf16 %v1086_v62, %v631_v63 }
 0x673   :  { %3194 = vmatmul.mubr.msk.bf16.vlgmr.msra.gmra.mrb[32].mxu1 %vm61_vm0, %v1087_v0 }
 0x674   :  { %3213 = vmatprep.mubr.msk.bf16.mxu1 %vm3526_vm1, %v3525_v14  ;;  %3206 = vmatpush3.bf16.msra.mxu1 %v3409_v41 }
 0x675   :  { %3207 = vmatprep.subr.bf16.mxu1 %v3525_v14 }
 0x678   :  { %3208 = vmatpush3.bf16.msra.mxu1 %v3410_v43  ;;  %v2912_v43 = vld [vmem:[%s4272_s12] ss:$0 sm:$0xff] }
 0x679   :  { %3209 = vmatprep.subr.bf16.mxu1 %v3525_v14 }
 0x67c   :  { %3210 = vmatpush3.bf16.msra.mxu1 %v3411_v44 }
 0x67d   :  { %3211 = vmatprep.subr.bf16.mxu1 %v3525_v14 }
 0x680   :  { %3212 = vmatpush3.bf16.msra.mxu1 %v3412_v45 }
 0x681   :  { %3231 = vmatprep.subr.bf16.mxu1 %v3525_v14 }
 0x746   :  { %v1148_v2 = vpop.f32.mrb[32].mxu1 }
 0x747   :  { %v1149_v3 = vadd.f32 %v2902_v1, %v1148_v2  ;;  %v3195_v4 = vpop.f32.mrb[33].mxu1 }
 0x748   :  { %v1151_v5 = vpop.f32.mrb[34].mxu1 }
 0x749   :  { %v1152_v6 = vadd.f32 %v2902_v1, %v1151_v5  ;;  %v3196_v7 = vpop.f32.mrb[35].mxu1  ;;  %v1155_v8 = vadd.f32 %v1149_v3, %v3661_v31 }
 0x74b   :  { %v1159_v9 = vsel %vm61_vm0, %v1155_v8, 0.0  ;;  %v1156_v10 = vadd.f32 %v1152_v6, %v3663_v32  ;;  %v3407_v32 = vld [vmem:[%s4267_s9] sm:$0xff]  }
 0x74c   :  { %1160 = vadd.xlane.f32.xlu1 %v1159_v9  ;;  %3198 = vmatpush3.bf16.msra.mxu0 %v3407_v32 }
 0x74d   :  { %v1162_v11 = vsel %vm61_vm0, %v1156_v10, 0.0  ;;  %3199 = vmatprep.subr.bf16.mxu0 %v3525_v14 }
 0x74e   :  { %1163 = vadd.xlane.f32.xlu0 %v1162_v11 }
 0x750   :  { %3200 = vmatpush3.bf16.msra.mxu0 %v3408_v22 }
 0x751   :  { %3217 = vmatprep.subr.bf16.mxu0 %v3525_v14 }
 0x7d9   :  { %v1161_v12 = vpop.xlane.xlu1 %1160 }
 0x7da   :  { %v1165_v13 = vmul.f32 0.03125, %v1161_v12 }
 0x7db   :  { %v1164_v15 = vpop.xlane.xlu0 %1163 }
 0x7dc   :  { %v1167_v16 = vsub.f32 %v1155_v8, %v1165_v13  ;;  %v1166_v17 = vmul.f32 0.03125, %v1164_v15 }
 0x7de   :  { %v1168_v18 = vsub.f32 %v1156_v10, %v1166_v17  ;;  %v1169_v19 = vmul.f32 %v1167_v16, %v1167_v16 }
 0x7e0   :  { %v1171_v20 = vsel %vm61_vm0, %v1169_v19, 0.0  ;;  %v1170_v21 = vmul.f32 %v1168_v18, %v1168_v18 }
 0x7e1   :  { %1172 = vadd.xlane.f32.xlu0 %v1171_v20 }
 0x7e2   :  { %v1174_v31 = vsel %vm61_vm0, %v1170_v21, 0.0 }
 0x7e5   :  { %1175 = vadd.xlane.f32.xlu0 %v1174_v31 }
 0x86e   :  { %v1173_v23 = vpop.xlane.xlu0 %1172 }
 0x86f   :  { %v1177_v39 = vmul.f32 0.03125, %v1173_v23 }
 0x871   :  { %v1179_v24 = vadd.f32 1e-12, %v1177_v39 }
 0x872   :  { %v1176_v25 = vpop.xlane.xlu0 %1175 }
 0x873   :  { %3461 = vrsqrt.f32 %v1179_v24  ;;  %v1178_v26 = vmul.f32 0.03125, %v1176_v25 }
 0x875   :  { %v1180_v27 = vadd.f32 1e-12, %v1178_v26 }
 0x877   :  { %3463 = vrsqrt.f32 %v1180_v27 }
 0x87d   :  { %v3462_v28 = vpop.eup %3461 }
 0x87e   :  { %v1183_v29 = vmul.f32 %v3462_v28, %v1167_v16 }
 0x880   :  { %v1191_v34 = vmul.f32 %v2906_v30, %v1183_v29 }
 0x881   :  { %v3464_v33 = vpop.eup %3463 }
 0x882   :  { %v1184_v42 = vmul.f32 %v3464_v33, %v1168_v18  ;;  %v3909_v37 = vadd.f32 %v2907_v35, %v1191_v34 }
 0x884   :  { %v1192_v36 = vmul.f32 %v2906_v30, %v1184_v42 }
 0x886   :  { %v3911_v38 = vadd.f32 %v2907_v35, %v1192_v36 }
 0x888   :  { %v1201_v40 = vpack.c.bf16 %v3911_v38, %v3909_v37 }
 0x88a   :  { %3202 = vmatmul.mubr.msk.bf16.vlgmr.msra.gmra.mrb[36].mxu0 %vm61_vm0, %v1201_v40 }
 0x88b   :  { %3221 = vmatprep.mubr.msk.bf16.mxu0 %vm3526_vm1, %v3525_v14 }
 0x95d   :  { %v1262_v47 = vpop.f32.mrb[36].mxu0 }
 0x95e   :  { %v1263_v48 = vadd.f32 %v2908_v46, %v1262_v47  ;;  %v3203_v49 = vpop.f32.mrb[37].mxu0 }
 0x95f   :  { %v1265_v50 = vpop.f32.mrb[38].mxu0 }
 0x960   :  { %v1271_v51 = vmul.f32 0.70710677, %v1263_v48  ;;  %v1266_v52 = vadd.f32 %v2908_v46, %v1265_v50  ;;  %v3204_v53 = vpop.f32.mrb[39].mxu0  ;;  %v1269_v34 = vmul.f32 0.5, %v1263_v48 }
 0x962   :  { %v1273_v54 = vand.u32 2147483647, %v1271_v51  ;;  %v1272_v55 = vmul.f32 0.70710677, %v1266_v52  ;;  %vm1311_vm6 = vcmp.ge.f32.partialorder %v1271_v51, 0.0  ;;  %v1270_v42 = vmul.f32 0.5, %v1266_v52 }
 0x964   :  { %v1275_v56 = vmul.f32 0.3275911, %v1273_v54  ;;  %v1274_v57 = vand.u32 2147483647, %v1272_v55  ;;  %v1299_v61 = vsub.f32 0.0, %v1273_v54  ;;  %vm1312_vm7 = vcmp.ge.f32.partialorder %v1272_v55, 0.0 }
 0x966   :  { %v1277_v58 = vadd.f32 1.0, %v1275_v56  ;;  %v1276_v59 = vmul.f32 0.3275911, %v1274_v57  ;;  %v1300_v62 = vsub.f32 0.0, %v1274_v57  ;;  %v1301_v0 = vmul.f32 %v1299_v61, %v1273_v54 }
 0x968   :  { %3465 = vrcp.f32 %v1277_v58  ;;  %v1278_v60 = vadd.f32 1.0, %v1276_v59  ;;  %v1302_v4 = vmul.f32 %v1300_v62, %v1274_v57  ;;  %v1303_v5 = vmul.f32 1.442695, %v1301_v0 }
 0x96a   :  { %3467 = vrcp.f32 %v1278_v60  ;;  %v1305_v10 = vmul.f32 1.442695, %v1302_v4 }
 0x96b   :  { %3469 = vpow2.f32 %v1303_v5 }
 0x96c   :  { %3471 = vpow2.f32 %v1305_v10 }
 0x972   :  { %v3466_v63 = vpop.eup %3465 }
 0x973   :  { %v1281_v1 = vmul.f32 1.0614054, %v3466_v63 }
 0x974   :  { %v3468_v2 = vpop.eup %3467 }
 0x975   :  { %v1283_v3 = vadd.f32 -1.4531521, %v1281_v1  ;;  %v1282_v6 = vmul.f32 1.0614054, %v3468_v2  ;;  %v3470_v31 = vpop.eup %3469 }
 0x976   :  { %v3472_v39 = vpop.eup %3471 }
 0x977   :  { %v1285_v7 = vmul.f32 %v3466_v63, %v1283_v3  ;;  %v1284_v8 = vadd.f32 -1.4531521, %v1282_v6 }
 0x979   :  { %v1287_v9 = vadd.f32 1.4214138, %v1285_v7  ;;  %v1286_v11 = vmul.f32 %v3468_v2, %v1284_v8  ;;  %v2918_v7 = vld [vmem:[%s4273_s13] ss:$0 sm:$0xff] }
 0x97b   :  { %v1289_v12 = vmul.f32 %v3466_v63, %v1287_v9  ;;  %v1288_v13 = vadd.f32 1.4214138, %v1286_v11 }
 0x97d   :  { %v1291_v15 = vadd.f32 -0.28449672, %v1289_v12  ;;  %v1290_v16 = vmul.f32 %v3468_v2, %v1288_v13  ;;  %v2919_v12 = vld [vmem:[%s4274_s14] ss:$0 sm:$0xff] }
 0x97f   :  { %v1293_v17 = vmul.f32 %v3466_v63, %v1291_v15  ;;  %v1292_v18 = vadd.f32 -0.28449672, %v1290_v16 }
 0x981   :  { %v1295_v19 = vadd.f32 0.2548296, %v1293_v17  ;;  %v1294_v20 = vmul.f32 %v3468_v2, %v1292_v18  ;;  %v2925_v18 = vld [vmem:[%s4264_s4 + $0x1] ss:$0 sm:$0xff]  ;;  %s4291_s4 = smov 48  }
 0x983   :  { %v1297_v21 = vmul.f32 %v3466_v63, %v1295_v19  ;;  %v1296_v32 = vadd.f32 0.2548296, %v1294_v20  ;;  %v3414_v63 = vld [vmem:[%s4290_s30 + $0x18] sm:$0xff]  }
 0x985   :  { %v1307_v22 = vmul.f32 %v3470_v31, %v1297_v21  ;;  %v1298_v23 = vmul.f32 %v3468_v2, %v1296_v32 }
 0x987   :  { %v1309_v24 = vsub.f32 1.0, %v1307_v22  ;;  %v1308_v25 = vmul.f32 %v3472_v39, %v1298_v23 }
 0x989   :  { %v1313_v26 = vsub.f32 0.0, %v1309_v24  ;;  %v1310_v27 = vsub.f32 1.0, %v1308_v25 }
 0x98b   :  { %v1315_v28 = vsel %vm1311_vm6, %v1309_v24, %v1313_v26  ;;  %v1314_v29 = vsub.f32 0.0, %v1310_v27 }
 0x98c   :  { %v1317_v30 = vadd.f32 1.0, %v1315_v28 }
 0x98d   :  { %v1316_v33 = vsel %vm1312_vm7, %v1310_v27, %v1314_v29 }
 0x98e   :  { %v1318_v35 = vadd.f32 1.0, %v1316_v33  ;;  %v1319_v36 = vmul.f32 %v1317_v30, %v1269_v34 }
 0x990   :  { %v1320_v40 = vmul.f32 %v1318_v35, %v1270_v42 }
 0x992   :  { %v1321_v41 = vpack.c.bf16 %v1320_v40, %v1319_v36 }
 0x994   :  { %3214 = vmatmul.mubr.msk.bf16.vlgmr.msra.gmra.mrb[36].mxu1 %vm1361_vm8, %v1321_v41 }
 0x995   :  { %3233 = vmatprep.mubr.msk.bf16.mxu1 %vm3526_vm1, %v3525_v14 }
 0xa67   :  { %v1399_v44 = vpop.f32.mrb[36].mxu1 }
 0xa68   :  { %v1400_v45 = vadd.f32 %v2912_v43, %v1399_v44  ;;  %v3215_v46 = vpop.f32.mrb[37].mxu1 }
 0xa69   :  { %v1402_v47 = vpop.f32.mrb[38].mxu1 }
 0xa6a   :  { %v1403_v48 = vadd.f32 %v2912_v43, %v1402_v47  ;;  %v3216_v49 = vpop.f32.mrb[39].mxu1  ;;  %v1406_v50 = vadd.f32 %v1400_v45, %v3909_v37 }
 0xa6c   :  { %v1410_v51 = vsel %vm61_vm0, %v1406_v50, 0.0  ;;  %v1407_v52 = vadd.f32 %v1403_v48, %v3911_v38  ;;  %v3413_v38 = vld [vmem:[%s4290_s30 + $0x10] sm:$0xff]  }
 0xa6d   :  { %1411 = vadd.xlane.f32.xlu1 %v1410_v51  ;;  %3218 = vmatpush3.bf16.msra.mxu0 %v3413_v38 }
 0xa6e   :  { %v1413_v53 = vsel %vm61_vm0, %v1407_v52, 0.0  ;;  %3219 = vmatprep.subr.bf16.mxu0 %v3525_v14 }
 0xa6f   :  { %1414 = vadd.xlane.f32.xlu0 %v1413_v53 }
 0xa71   :  { %3220 = vmatpush3.bf16.msra.mxu0 %v3414_v63 }
 0xa72   :  { %3225 = vmatprep.subr.bf16.mxu0 %v3525_v14 }
 0xafa   :  { %v1412_v54 = vpop.xlane.xlu1 %1411 }
 0xafb   :  { %v1416_v55 = vmul.f32 0.03125, %v1412_v54 }
 0xafc   :  { %v1415_v56 = vpop.xlane.xlu0 %1414 }
 0xafd   :  { %v1418_v57 = vsub.f32 %v1406_v50, %v1416_v55  ;;  %v1417_v58 = vmul.f32 0.03125, %v1415_v56 }
 0xaff   :  { %v1419_v59 = vsub.f32 %v1407_v52, %v1417_v58  ;;  %v1420_v60 = vmul.f32 %v1418_v57, %v1418_v57 }
 0xb01   :  { %v1422_v61 = vsel %vm61_vm0, %v1420_v60, 0.0  ;;  %v1421_v62 = vmul.f32 %v1419_v59, %v1419_v59 }
 0xb02   :  { %1423 = vadd.xlane.f32.xlu1 %v1422_v61 }
 0xb03   :  { %v1425_v37 = vsel %vm61_vm0, %v1421_v62, 0.0 }
 0xb04   :  { %1426 = vadd.xlane.f32.xlu0 %v1425_v37 }
 0xb8f   :  { %v1424_v0 = vpop.xlane.xlu1 %1423 }
 0xb90   :  { %v1428_v1 = vmul.f32 0.03125, %v1424_v0 }
 0xb91   :  { %v1427_v2 = vpop.xlane.xlu0 %1426 }
 0xb92   :  { %v1430_v3 = vadd.f32 1e-12, %v1428_v1  ;;  %v1429_v4 = vmul.f32 0.03125, %v1427_v2 }
 0xb94   :  { %3473 = vrsqrt.f32 %v1430_v3  ;;  %v1431_v5 = vadd.f32 1e-12, %v1429_v4 }
 0xb96   :  { %3475 = vrsqrt.f32 %v1431_v5 }
 0xb9e   :  { %v3474_v6 = vpop.eup %3473 }
 0xb9f   :  { %v1434_v8 = vmul.f32 %v3474_v6, %v1418_v57 }
 0xba0   :  { %v3476_v9 = vpop.eup %3475 }
 0xba1   :  { %v1442_v10 = vmul.f32 %v2918_v7, %v1434_v8  ;;  %v1435_v11 = vmul.f32 %v3476_v9, %v1419_v59 }
 0xba3   :  { %v1443_v13 = vmul.f32 %v2918_v7, %v1435_v11  ;;  %v3963_v15 = vadd.f32 %v2919_v12, %v1442_v10 }
 0xba5   :  { %v3965_v16 = vadd.f32 %v2919_v12, %v1443_v13 }
 0xba7   :  { %v1452_v17 = vpack.c.bf16 %v3965_v16, %v3963_v15 }
 0xba9   :  { %3222 = vmatmul.mubr.msk.bf16.vlgmr.msra.gmra.mrb[40].mxu0 %vm61_vm0, %v1452_v17 }
 0xbaa   :  { %3227 = vmatprep.mubr.msk.bf16.mxu0 %vm3526_vm1, %v3525_v14 }
 0xc7c   :  { %v1515_v19 = vpop.f32.mrb[40].mxu0 }
 0xc7d   :  { %v1516_v20 = vadd.f32 %v2925_v18, %v1515_v19  ;;  %v3223_v21 = vpop.f32.mrb[41].mxu0 }
 0xc7e   :  { %v1518_v31 = vpop.f32.mrb[42].mxu0 }
 0xc7f   :  { %v3975_v32 = vpack.c.bf16 %v1516_v20, %v1516_v20  ;;  %v3224_v22 = vpop.f32.mrb[43].mxu0  ;;  %v1519_v23 = vadd.f32 %v2925_v18, %v1518_v31 }
 0xc81   :  { %1634 = vrot.lane.b32.xlu0 %v3975_v32, %s3527_s2  ;;  %1524 = vrot.lane.b32.xlu1 %v3975_v32, %s3528_s24  ;;  %v3985_v39 = vpack.c.bf16 %v1519_v23, %v1519_v23 }
 0xc85   :  { %1854 = vrot.lane.b32.xlu0 %v3975_v32, %s3533_s29  ;;  %1632 = vrot.lane.b32.xlu1 %v3975_v32, %s3529_s25 }
 0xc89   :  { %1744 = vrot.lane.b32.xlu1 %v3975_v32, %s3531_s27  ;;  %1979 = vrot.lane.b32.xlu0 %v3985_v39, %s3528_s24 }
 0xc8d   :  { %1742 = vrot.lane.b32.xlu1 %v3975_v32, %s3530_s26  ;;  %2087 = vrot.lane.b32.xlu0 %v3985_v39, %s3529_s25 }
 0xc91   :  { %1852 = vrot.lane.b32.xlu1 %v3975_v32, %s3532_s28  ;;  %2197 = vrot.lane.b32.xlu0 %v3985_v39, %s3530_s26  ;;  %s4293_s26 = smov 8  }
 0xc95   :  { %2089 = vrot.lane.b32.xlu1 %v3985_v39, %s3527_s2  ;;  %2307 = vrot.lane.b32.xlu0 %v3985_v39, %s3532_s28  ;;  %s4292_s2 = smov 40  }
 0xc99   :  { %2199 = vrot.lane.b32.xlu1 %v3985_v39, %s3531_s27 }
 0xc9d   :  { %2309 = vrot.lane.b32.xlu1 %v3985_v39, %s3533_s29  ;;  %s4294_s29 = smov 16  }
 0xcf3   :  { %v1525_v24 = vpop.permute.xlu1 %1524  ;;  %v1635_v26 = vpop.permute.xlu0 %1634 }
 0xcf4   :  { %v1530_v25 = vsel %vm177_vm2, %v1525_v24, 0  ;;  %v1640_v28 = vsel %vm177_vm2, %v1635_v26, 0 }
 0xcf5   :  { %3226 = vmatpush3.bf16.xpose.msra.mxu0 %v1530_v25 }
 0xcf6   :  { %3237 = vmatprep.subr.bf16.mxu0 %v3525_v14 }
 0xcf7   :  { %v1633_v27 = vpop.permute.xlu1 %1632  ;;  %v1855_v33 = vpop.permute.xlu0 %1854 }
 0xcf8   :  { %v1860_v42 = vsel %vm177_vm2, %v1855_v33, 0 }
 0xcfb   :  { %v1745_v29 = vpop.permute.xlu1 %1744  ;;  %v1980_v35 = vpop.permute.xlu0 %1979 }
 0xcfc   :  { %3228 = vmatmul.mubr.msk.bf16.vlgmr.msra.gmra.mrb[44].mxu0 %vm177_vm2, %v3975_v32  ;;  %v1750_v30 = vsel %vm177_vm2, %v1745_v29, 0  ;;  %v1985_v40 = vsel %vm177_vm2, %v1980_v35, 0 }
 0xcfd   :  { %3238 = vmatpush3.bf16.xpose.msra.mxu0 %v1640_v28  ;;  %3239 = vmatprep.mubr.msk.bf16.mxu0 %vm3526_vm1, %v3525_v14 }
 0xcfe   :  { %3249 = vmatprep.subr.bf16.mxu0 %v3525_v14 }
 0xcff   :  { %v1743_v34 = vpop.permute.xlu1 %1742  ;;  %v2088_v45 = vpop.permute.xlu0 %2087 }
 0xd03   :  { %v1853_v36 = vpop.permute.xlu1 %1852  ;;  %v2198_v48 = vpop.permute.xlu0 %2197 }
 0xd04   :  { %3240 = vmatmul.mubr.msk.bf16.vlgmr.msra.gmra.mrb[48].mxu0 %vm177_vm2, %v1633_v27 }
 0xd05   :  { %3250 = vmatpush3.bf16.xpose.msra.mxu0 %v1750_v30  ;;  %3251 = vmatprep.mubr.msk.bf16.mxu0 %vm3526_vm1, %v3525_v14 }
 0xd06   :  { %3261 = vmatprep.subr.bf16.mxu0 %v3525_v14 }
 0xd07   :  { %v2090_v41 = vpop.permute.xlu1 %2089  ;;  %v2308_v50 = vpop.permute.xlu0 %2307 }
 0xd08   :  { %v2095_v43 = vsel %vm177_vm2, %v2090_v41, 0 }
 0xd0b   :  { %v2200_v44 = vpop.permute.xlu1 %2199 }
 0xd0c   :  { %3252 = vmatmul.mubr.msk.bf16.vlgmr.msra.gmra.mrb[52].mxu0 %vm177_vm2, %v1743_v34  ;;  %v2205_v46 = vsel %vm177_vm2, %v2200_v44, 0 }
 0xd0d   :  { %3262 = vmatpush3.bf16.xpose.msra.mxu0 %v1860_v42  ;;  %3263 = vmatprep.mubr.msk.bf16.mxu0 %vm3526_vm1, %v3525_v14 }
 0xd0e   :  { %3273 = vmatprep.subr.bf16.mxu0 %v3525_v14 }
 0xd0f   :  { %v2310_v47 = vpop.permute.xlu1 %2309 }
 0xd10   :  { %v2315_v49 = vsel %vm177_vm2, %v2310_v47, 0 }
 0xd14   :  { %3264 = vmatmul.mubr.msk.bf16.vlgmr.msra.gmra.mrb[56].mxu0 %vm177_vm2, %v1853_v36 }
 0xd15   :  { %3274 = vmatpush3.bf16.xpose.msra.mxu0 %v1985_v40  ;;  %3275 = vmatprep.mubr.msk.bf16.mxu0 %vm3526_vm1, %v3525_v14 }
 0xd16   :  { %3285 = vmatprep.subr.bf16.mxu0 %v3525_v14 }
 0xd1c   :  { %3276 = vmatmul.mubr.msk.bf16.vlgmr.msra.gmra.mrb[60].mxu0 %vm177_vm2, %v3985_v39 }
 0xd1d   :  { %3286 = vmatpush3.bf16.xpose.msra.mxu0 %v2095_v43  ;;  %3287 = vmatprep.mubr.msk.bf16.mxu0 %vm3526_vm1, %v3525_v14 }
 0xd1e   :  { %3297 = vmatprep.subr.bf16.mxu0 %v3525_v14 }
 0xd24   :  { %3288 = vmatmul.mubr.msk.bf16.vlgmr.msra.gmra.mrb[64].mxu0 %vm177_vm2, %v2088_v45 }
 0xd25   :  { %3298 = vmatpush3.bf16.xpose.msra.mxu0 %v2205_v46  ;;  %3299 = vmatprep.mubr.msk.bf16.mxu0 %vm3526_vm1, %v3525_v14 }
 0xd26   :  { %3309 = vmatprep.subr.bf16.mxu0 %v3525_v14 }
 0xd2c   :  { %3300 = vmatmul.mubr.msk.bf16.vlgmr.msra.gmra.mrb[68].mxu0 %vm177_vm2, %v2198_v48 }
 0xd2d   :  { %3310 = vmatpush3.bf16.xpose.msra.mxu0 %v2315_v49  ;;  %3311 = vmatprep.mubr.msk.bf16.mxu0 %vm3526_vm1, %v3525_v14 }
 0xd2e   :  { %3321 = vmatprep.subr.bf16.mxu0 %v3525_v14 }
 0xd34   :  { %3312 = vmatmul.mubr.msk.bf16.vlgmr.msra.gmra.mrb[72].mxu0 %vm177_vm2, %v2308_v50 }
 0xd35   :  { %3325 = vmatprep.mubr.msk.bf16.mxu0 %vm3526_vm1, %v3525_v14 }
 0xdcf   :  { %v1566_v51 = vpop.f32.mrb[44].mxu0 }
 0xdd0   :  { %v3229_v52 = vpop.f32.mrb[45].mxu0  ;;  %v1572_v53 = vsel %vm177_vm2, %v1566_v51, -inf }
 0xdd1   :  { %1573 = vmax.xlane.f32.xlu1 %v1572_v53  ;;  %v1569_v54 = vpop.f32.mrb[46].mxu0 }
 0xdd2   :  { %v3230_v55 = vpop.f32.mrb[47].mxu0 }
 0xdd7   :  { %v1676_v56 = vpop.f32.mrb[48].mxu0 }
 0xdd8   :  { %v3241_v57 = vpop.f32.mrb[49].mxu0  ;;  %v1682_v58 = vsel %vm177_vm2, %v1676_v56, -inf }
 0xdd9   :  { %1683 = vmax.xlane.f32.xlu0 %v1682_v58  ;;  %v1679_v59 = vpop.f32.mrb[50].mxu0 }
 0xdda   :  { %v3242_v60 = vpop.f32.mrb[51].mxu0 }
 0xddf   :  { %v1786_v61 = vpop.f32.mrb[52].mxu0 }
 0xde0   :  { %v3253_v62 = vpop.f32.mrb[53].mxu0  ;;  %v1792_v37 = vsel %vm177_vm2, %v1786_v61, -inf }
 0xde1   :  { %1793 = vmax.xlane.f32.xlu0 %v1792_v37  ;;  %v1789_v38 = vpop.f32.mrb[54].mxu0 }
 0xde2   :  { %v3254_v63 = vpop.f32.mrb[55].mxu0 }
 0xde7   :  { %v4052_v0 = vpop.f32.mrb[56].mxu0 }
 0xde8   :  { %v3265_v1 = vpop.f32.mrb[57].mxu0  ;;  %v1902_v2 = vsel %vm177_vm2, %v4052_v0, -inf }
 0xde9   :  { %1903 = vmax.xlane.f32.xlu0 %v1902_v2  ;;  %v1899_v3 = vpop.f32.mrb[58].mxu0 }
 0xdea   :  { %v3266_v4 = vpop.f32.mrb[59].mxu0 }
 0xdef   :  { %v2021_v5 = vpop.f32.mrb[60].mxu0 }
 0xdf0   :  { %v3277_v6 = vpop.f32.mrb[61].mxu0  ;;  %v2027_v7 = vsel %vm177_vm2, %v2021_v5, -inf }
 0xdf1   :  { %2028 = vmax.xlane.f32.xlu1 %v2027_v7  ;;  %v2024_v8 = vpop.f32.mrb[62].mxu0 }
 0xdf2   :  { %v3278_v9 = vpop.f32.mrb[63].mxu0 }
 0xdf7   :  { %v2131_v10 = vpop.f32.mrb[64].mxu0 }
 0xdf8   :  { %v3289_v11 = vpop.f32.mrb[65].mxu0  ;;  %v2137_v12 = vsel %vm177_vm2, %v2131_v10, -inf }
 0xdf9   :  { %2138 = vmax.xlane.f32.xlu0 %v2137_v12  ;;  %v2134_v13 = vpop.f32.mrb[66].mxu0 }
 0xdfa   :  { %v3290_v17 = vpop.f32.mrb[67].mxu0 }
 0xdff   :  { %v2241_v18 = vpop.f32.mrb[68].mxu0 }
 0xe00   :  { %v3301_v19 = vpop.f32.mrb[69].mxu0  ;;  %v2247_v20 = vsel %vm177_vm2, %v2241_v18, -inf }
 0xe01   :  { %2248 = vmax.xlane.f32.xlu1 %v2247_v20  ;;  %v2244_v21 = vpop.f32.mrb[70].mxu0 }
 0xe02   :  { %v3302_v31 = vpop.f32.mrb[71].mxu0 }
 0xe07   :  { %v4059_v22 = vpop.f32.mrb[72].mxu0 }
 0xe08   :  { %v3313_v23 = vpop.f32.mrb[73].mxu0  ;;  %v2357_v26 = vsel %vm177_vm2, %v4059_v22, -inf }
 0xe09   :  { %v2354_v24 = vpop.f32.mrb[74].mxu0 }
 0xe0a   :  { %v3314_v25 = vpop.f32.mrb[75].mxu0 }
 0xe0f   :  { %1694 = vrot.lane.b32.xlu0 %v3975_v32, %s3534_s0 }
 0xe12   :  { %1584 = vrot.lane.b32.xlu1 %v3975_v32, %s3535_s18 }
 0xe2e   :  { %2358 = vmax.xlane.f32.xlu0 %v2357_v26 }
 0xe5e   :  { %v1574_v27 = vpop.xlane.xlu1 %1573 }
 0xe5f   :  { %v1575_v28 = vsub.f32 %v1566_v51, %v1574_v27 }
 0xe61   :  { %v1576_v29 = vmul.f32 1.442695, %v1575_v28 }
 0xe63   :  { %3477 = vpow2.f32 %v1576_v29 }
 0xe66   :  { %v1684_v30 = vpop.xlane.xlu0 %1683 }
 0xe67   :  { %v1685_v33 = vsub.f32 %v1676_v56, %v1684_v30 }
 0xe69   :  { %v1686_v34 = vmul.f32 1.442695, %v1685_v33 }
 0xe6b   :  { %3479 = vpow2.f32 %v1686_v34 }
 0xe6d   :  { %v4067_v42 = vpop.eup %3477 }
 0xe6e   :  { %v1794_v35 = vpop.xlane.xlu0 %1793  ;;  %v1578_v36 = vsel %vm177_vm2, %v4067_v42, 0.0 }
 0xe6f   :  { %v1795_v40 = vsub.f32 %v1786_v61, %v1794_v35  ;;  %1579 = vadd.xlane.f32.xlu1 %v1578_v36 }
 0xe71   :  { %v1796_v41 = vmul.f32 1.442695, %v1795_v40 }
 0xe73   :  { %3481 = vpow2.f32 %v1796_v41 }
 0xe75   :  { %v4071_v43 = vpop.eup %3479 }
 0xe76   :  { %v1688_v44 = vsel %vm177_vm2, %v4071_v43, 0.0  ;;  %v1904_v50 = vpop.xlane.xlu0 %1903 }
 0xe77   :  { %1689 = vadd.xlane.f32.xlu0 %v1688_v44  ;;  %v1905_v52 = vsub.f32 %v4052_v0, %v1904_v50 }
 0xe79   :  { %v1906_v53 = vmul.f32 1.442695, %v1905_v52 }
 0xe7b   :  { %3483 = vpow2.f32 %v1906_v53 }
 0xe7d   :  { %v4075_v45 = vpop.eup %3481 }
 0xe7e   :  { %v1798_v46 = vsel %vm177_vm2, %v4075_v45, 0.0  ;;  %v2029_v47 = vpop.xlane.xlu1 %2028 }
 0xe7f   :  { %1799 = vadd.xlane.f32.xlu1 %v1798_v46  ;;  %v2030_v54 = vsub.f32 %v2021_v5, %v2029_v47 }
 0xe81   :  { %v2031_v57 = vmul.f32 1.442695, %v2030_v54 }
 0xe83   :  { %3485 = vpow2.f32 %v2031_v57 }
 0xe86   :  { %v2139_v55 = vpop.xlane.xlu0 %2138 }
 0xe87   :  { %v2140_v56 = vsub.f32 %v2131_v10, %v2139_v55 }
 0xe89   :  { %v2141_v59 = vmul.f32 1.442695, %v2140_v56 }
 0xe8a   :  { %v1695_v2 = vpop.permute.xlu0 %1694 }
 0xe8b   :  { %3487 = vpow2.f32 %v2141_v59  ;;  %v1700_v13 = vsel %vm241_vm3, %v1695_v2, 0 }
 0xe8d   :  { %1804 = vrot.lane.b32.xlu0 %v3975_v32, %s4291_s4 }
 0xe8e   :  { %v2249_v48 = vpop.xlane.xlu1 %2248 }
 0xe8f   :  { %v2250_v58 = vsub.f32 %v2241_v18, %v2249_v48 }
 0xe90   :  { %1914 = vrot.lane.b32.xlu1 %v3975_v32, %s4292_s2  ;;  %v3484_v32 = vpop.eup %3483 }
 0xe91   :  { %v2251_v60 = vmul.f32 1.442695, %v2250_v58  ;;  %v1908_v61 = vsel %vm177_vm2, %v3484_v32, 0.0  ;;  %v4087_v62 = vpop.eup %3485 }
 0xe92   :  { %v1585_v49 = vpop.permute.xlu1 %1584  ;;  %v2033_v38 = vsel %vm177_vm2, %v4087_v62, 0.0 }
 0xe93   :  { %v1590_v51 = vsel %vm241_vm3, %v1585_v49, 0  ;;  %3489 = vpow2.f32 %v2251_v60 }
 0xe94   :  { %3232 = vmatpush3.bf16.msra.mxu1 %v1590_v51 }
 0xe95   :  { %3243 = vmatprep.subr.bf16.mxu1 %v3525_v14  ;;  %v4089_v37 = vpop.eup %3487 }
 0xe96   :  { %v2143_v0 = vsel %vm177_vm2, %v4089_v37, 0.0 }
 0xe9d   :  { %v4093_v63 = vpop.eup %3489 }
 0xe9e   :  { %v2253_v1 = vsel %vm177_vm2, %v4093_v63, 0.0 }
 0xeac   :  { %1909 = vadd.xlane.f32.xlu0 %v1908_v61 }
 0xeb0   :  { %2034 = vadd.xlane.f32.xlu0 %v2033_v38 }
 0xeb4   :  { %2144 = vadd.xlane.f32.xlu1 %v2143_v0  ;;  %2254 = vadd.xlane.f32.xlu0 %v2253_v1 }
 0xebb   :  { %v2359_v3 = vpop.xlane.xlu0 %2358 }
 0xebc   :  { %v2360_v4 = vsub.f32 %v4059_v22, %v2359_v3 }
 0xebe   :  { %v2361_v5 = vmul.f32 1.442695, %v2360_v4 }
 0xec0   :  { %3491 = vpow2.f32 %v2361_v5 }
 0xec5   :  { %2149 = vrot.lane.b32.xlu1 %v3985_v39, %s3534_s0  ;;  %s4295_s0 = smov 24  }
 0xec9   :  { %2259 = vrot.lane.b32.xlu1 %v3985_v39, %s4291_s4 }
 0xeca   :  { %v4104_v6 = vpop.eup %3491 }
 0xecb   :  { %v2363_v7 = vsel %vm177_vm2, %v4104_v6, 0.0 }
 0xecc   :  { %2364 = vadd.xlane.f32.xlu0 %v2363_v7 }
 0xecd   :  { %2369 = vrot.lane.b32.xlu1 %v3985_v39, %s4292_s2 }
 0xee2   :  { %2039 = vrot.lane.b32.xlu0 %v3985_v39, %s3535_s18 }
 0xefc   :  { %v1580_v8 = vpop.xlane.xlu1 %1579 }
 0xefd   :  { %3493 = vrcp.f32 %v1580_v8 }
 0xf04   :  { %v1690_v9 = vpop.xlane.xlu0 %1689 }
 0xf05   :  { %3495 = vrcp.f32 %v1690_v9 }
 0xf07   :  { %v3494_v10 = vpop.eup %3493 }
 0xf08   :  { %v1582_v11 = vmul.f32 %v3494_v10, %v4067_v42  ;;  %v1805_v19 = vpop.permute.xlu0 %1804 }
 0xf09   :  { %v1810_v21 = vsel %vm241_vm3, %v1805_v19, 0 }
 0xf0a   :  { %v1583_v12 = vpack.c.bf16 %v1582_v11, %v1582_v11 }
 0xf0c   :  { %3234 = vmatmul.mubr.msk.bf16.vlgmr.msra.gmra.mrb[40].mxu1 %vm177_vm2, %v1583_v12  ;;  %v1800_v17 = vpop.xlane.xlu1 %1799 }
 0xf0d   :  { %3244 = vmatpush3.bf16.msra.mxu1 %v1700_v13  ;;  %3497 = vrcp.f32 %v1800_v17  ;;  %3245 = vmatprep.mubr.msk.bf16.mxu1 %vm3526_vm1, %v3525_v14  ;;  %v3415_v13 = vld [vmem:[%s4265_s5 + $0x10] sm:$0xff]  }
 0xf0e   :  { %3255 = vmatprep.subr.bf16.mxu1 %v3525_v14  ;;  %3322 = vmatpush3.bf16.msra.mxu0 %v3415_v13  ;;  %v2956_v13 = vld [vmem:[%s4268_s7 + $0x1] ss:$0 sm:$0xff] }
 0xf0f   :  { %v3496_v39 = vpop.eup %3495  ;;  %3323 = vmatprep.subr.bf16.mxu0 %v3525_v14 }
 0xf10   :  { %v1692_v18 = vmul.f32 %v3496_v39, %v4071_v43  ;;  %v1915_v23 = vpop.permute.xlu1 %1914 }
 0xf11   :  { %v1920_v25 = vsel %vm241_vm3, %v1915_v23, 0 }
 0xf12   :  { %v1693_v20 = vpack.c.bf16 %v1692_v18, %v1692_v18 }
 0xf14   :  { %3246 = vmatmul.mubr.msk.bf16.vlgmr.msra.gmra.mrb[44].mxu1 %vm177_vm2, %v1693_v20  ;;  %v3416_v20 = vld [vmem:[%s4265_s5 + $0x18] sm:$0xff]  }
 0xf15   :  { %3256 = vmatpush3.bf16.msra.mxu1 %v1810_v21  ;;  %3257 = vmatprep.mubr.msk.bf16.mxu1 %vm3526_vm1, %v3525_v14 }
 0xf16   :  { %3267 = vmatprep.subr.bf16.mxu1 %v3525_v14  ;;  %3324 = vmatpush3.bf16.msra.mxu0 %v3416_v20 }
 0xf17   :  { %v3498_v31 = vpop.eup %3497  ;;  %3337 = vmatprep.subr.bf16.mxu0 %v3525_v14 }
 0xf18   :  { %v1802_v22 = vmul.f32 %v3498_v31, %v4075_v45 }
 0xf1a   :  { %v1803_v24 = vpack.c.bf16 %v1802_v22, %v1802_v22 }
 0xf1c   :  { %3258 = vmatmul.mubr.msk.bf16.vlgmr.msra.gmra.mrb[48].mxu1 %vm177_vm2, %v1803_v24 }
 0xf1d   :  { %3268 = vmatpush3.bf16.msra.mxu1 %v1920_v25  ;;  %3269 = vmatprep.mubr.msk.bf16.mxu1 %vm3526_vm1, %v3525_v14 }
 0xf1e   :  { %3279 = vmatprep.subr.bf16.mxu1 %v3525_v14 }
 0xf39   :  { %v1910_v26 = vpop.xlane.xlu0 %1909 }
 0xf3a   :  { %3499 = vrcp.f32 %v1910_v26 }
 0xf3d   :  { %v2035_v30 = vpop.xlane.xlu0 %2034 }
 0xf3e   :  { %3501 = vrcp.f32 %v2035_v30 }
 0xf41   :  { %v2145_v33 = vpop.xlane.xlu1 %2144  ;;  %v2255_v34 = vpop.xlane.xlu0 %2254 }
 0xf42   :  { %3503 = vrcp.f32 %v2145_v33 }
 0xf43   :  { %3505 = vrcp.f32 %v2255_v34 }
 0xf44   :  { %v3500_v27 = vpop.eup %3499 }
 0xf45   :  { %v1912_v28 = vmul.f32 %v3500_v27, %v3484_v32  ;;  %v2150_v43 = vpop.permute.xlu1 %2149 }
 0xf46   :  { %v2155_v46 = vsel %vm241_vm3, %v2150_v43, 0 }
 0xf47   :  { %v1913_v29 = vpack.c.bf16 %v1912_v28, %v1912_v28 }
 0xf48   :  { %v3502_v42 = vpop.eup %3501 }
 0xf49   :  { %3270 = vmatmul.mubr.msk.bf16.vlgmr.msra.gmra.mrb[52].mxu1 %vm177_vm2, %v1913_v29  ;;  %v2037_v36 = vmul.f32 %v3502_v42, %v4087_v62  ;;  %v2260_v48 = vpop.permute.xlu1 %2259 }
 0xf4a   :  { %3281 = vmatprep.mubr.msk.bf16.mxu1 %vm3526_vm1, %v3525_v14  ;;  %v2265_v51 = vsel %vm241_vm3, %v2260_v48, 0 }
 0xf4b   :  { %v2038_v44 = vpack.c.bf16 %v2037_v36, %v2037_v36 }
 0xf4c   :  { %v3504_v45 = vpop.eup %3503 }
 0xf4d   :  { %v2147_v47 = vmul.f32 %v3504_v45, %v4089_v37  ;;  %v3506_v50 = vpop.eup %3505  ;;  %v2370_v53 = vpop.permute.xlu1 %2369 }
 0xf4e   :  { %v2257_v52 = vmul.f32 %v3506_v50, %v4093_v63  ;;  %v2375_v56 = vsel %vm241_vm3, %v2370_v53, 0 }
 0xf4f   :  { %v2148_v49 = vpack.c.bf16 %v2147_v47, %v2147_v47 }
 0xf50   :  { %v2258_v54 = vpack.c.bf16 %v2257_v52, %v2257_v52 }
 0xf59   :  { %v2365_v35 = vpop.xlane.xlu0 %2364 }
 0xf5a   :  { %3507 = vrcp.f32 %v2365_v35 }
 0xf5d   :  { %v2040_v40 = vpop.permute.xlu0 %2039 }
 0xf5e   :  { %v2045_v41 = vsel %vm241_vm3, %v2040_v40, 0 }
 0xf5f   :  { %3280 = vmatpush3.bf16.msra.mxu1 %v2045_v41 }
 0xf60   :  { %3291 = vmatprep.subr.bf16.mxu1 %v3525_v14 }
 0xf62   :  { %3282 = vmatmul.mubr.msk.bf16.vlgmr.msra.gmra.mrb[56].mxu1 %vm177_vm2, %v2038_v44 }
 0xf63   :  { %3292 = vmatpush3.bf16.msra.mxu1 %v2155_v46  ;;  %3293 = vmatprep.mubr.msk.bf16.mxu1 %vm3526_vm1, %v3525_v14 }
 0xf64   :  { %3303 = vmatprep.subr.bf16.mxu1 %v3525_v14  ;;  %v3508_v55 = vpop.eup %3507 }
 0xf65   :  { %v2367_v57 = vmul.f32 %v3508_v55, %v4104_v6 }
 0xf67   :  { %v2368_v58 = vpack.c.bf16 %v2367_v57, %v2367_v57 }
 0xf6a   :  { %3294 = vmatmul.mubr.msk.bf16.vlgmr.msra.gmra.mrb[60].mxu1 %vm177_vm2, %v2148_v49 }
 0xf6b   :  { %3304 = vmatpush3.bf16.msra.mxu1 %v2265_v51  ;;  %3305 = vmatprep.mubr.msk.bf16.mxu1 %vm3526_vm1, %v3525_v14  ;;  %v2950_v51 = vld [vmem:[%s4266_s6 + $0x1] ss:$0 sm:$0xff] }
 0xf6c   :  { %3315 = vmatprep.subr.bf16.mxu1 %v3525_v14 }
 0xf72   :  { %3306 = vmatmul.mubr.msk.bf16.vlgmr.msra.gmra.mrb[64].mxu1 %vm177_vm2, %v2258_v54 }
 0xf73   :  { %3316 = vmatpush3.bf16.msra.mxu1 %v2375_v56  ;;  %3317 = vmatprep.mubr.msk.bf16.mxu1 %vm3526_vm1, %v3525_v14 }
 0xf74   :  { %3329 = vmatprep.subr.bf16.mxu1 %v3525_v14 }
 0xf7a   :  { %3318 = vmatmul.mubr.msk.bf16.vlgmr.msra.gmra.mrb[68].mxu1 %vm177_vm2, %v2368_v58 }
 0xf7b   :  { %3333 = vmatprep.mubr.msk.bf16.mxu1 %vm3526_vm1, %v3525_v14 }
 0xfdf   :  { %v1626_v59 = vpop.f32.mrb[40].mxu1 }
 0xfe0   :  { %v3235_v60 = vpop.f32.mrb[41].mxu1 }
 0xfe1   :  { %v1629_v32 = vpop.f32.mrb[42].mxu1 }
 0xfe2   :  { %v3236_v61 = vpop.f32.mrb[43].mxu1 }
 0xfe7   :  { %v1736_v62 = vpop.f32.mrb[44].mxu1 }
 0xfe8   :  { %v3247_v37 = vpop.f32.mrb[45].mxu1 }
 0xfe9   :  { %v1739_v38 = vpop.f32.mrb[46].mxu1 }
 0xfea   :  { %v3248_v63 = vpop.f32.mrb[47].mxu1 }
 0xfef   :  { %v1846_v0 = vpop.f32.mrb[48].mxu1 }
 0xff0   :  { %v3259_v1 = vpop.f32.mrb[49].mxu1 }
 0xff1   :  { %v1849_v2 = vpop.f32.mrb[50].mxu1 }
 0xff2   :  { %v3260_v3 = vpop.f32.mrb[51].mxu1 }
0x101c   :  { %v1956_v4 = vpop.f32.mrb[52].mxu1 }
0x101d   :  { %v3271_v5 = vpop.f32.mrb[53].mxu1 }
0x101e   :  { %v1959_v6 = vpop.f32.mrb[54].mxu1 }
0x101f   :  { %v3272_v7 = vpop.f32.mrb[55].mxu1 }
0x1035   :  { %v2081_v8 = vpop.f32.mrb[56].mxu1 }
0x1036   :  { %v3283_v9 = vpop.f32.mrb[57].mxu1 }
0x1037   :  { %v2084_v10 = vpop.f32.mrb[58].mxu1 }
0x1038   :  { %v3284_v11 = vpop.f32.mrb[59].mxu1 }
0x103d   :  { %v2191_v12 = vpop.f32.mrb[60].mxu1 }
0x103e   :  { %v3388_v17 = vpack.i.bf16 %v2191_v12, %v1736_v62  ;;  %v3295_v39 = vpop.f32.mrb[61].mxu1 }
0x103f   :  { %v2194_v18 = vpop.f32.mrb[62].mxu1 }
0x1040   :  { %3389 = vrot.lane.b32.xlu1 %v3388_v17, %s4293_s26  ;;  %v3296_v19 = vpop.f32.mrb[63].mxu1 }
0x1041   :  { %v2957_v19 = vld [vmem:[%s4269_s8 + $0x1] ss:$0 sm:$0xff] }
0x1045   :  { %v2301_v21 = vpop.f32.mrb[64].mxu1 }
0x1046   :  { %v3393_v31 = vpack.i.bf16 %v2301_v21, %v1846_v0  ;;  %v3307_v22 = vpop.f32.mrb[65].mxu1 }
0x1047   :  { %v2304_v23 = vpop.f32.mrb[66].mxu1 }
0x1048   :  { %3394 = vrot.lane.b32.xlu1 %v3393_v31, %s4294_s29  ;;  %v3308_v24 = vpop.f32.mrb[67].mxu1  ;;  %v3419_v23 = vld [vmem:[%s4270_s11 + $0x20] sm:$0xff]  }
0x1049   :  { %v3420_v24 = vld [vmem:[%s4270_s11 + $0x28] sm:$0xff]  }
0x104d   :  { %v2411_v25 = vpop.f32.mrb[68].mxu1 }
0x104e   :  { %v3398_v26 = vpack.i.bf16 %v2411_v25, %v1956_v4  ;;  %v3319_v27 = vpop.f32.mrb[69].mxu1  ;;  %v3418_v4 = vld [vmem:[%s4267_s9 + $0x18] sm:$0xff]   ;;  %v3421_v25 = vld [vmem:[%s4270_s11 + $0x30] sm:$0xff]  }
0x104f   :  { %v2414_v28 = vpop.f32.mrb[70].mxu1  ;;  %v2963_v27 = vld [vmem:[%s4271_s10 + $0x1] ss:$0 sm:$0xff] }
0x1050   :  { %3399 = vrot.lane.b32.xlu1 %v3398_v26, %s4295_s0  ;;  %v3320_v29 = vpop.f32.mrb[71].mxu1  ;;  %v3422_v26 = vld [vmem:[%s4270_s11 + $0x38] sm:$0xff]  }
0x10b2   :  { %v3390_v30 = vpop.permute.xlu1 %3389 }
0x10b3   :  { %v3392_v34 = vunpack.i.h.bf16 %v3390_v30  ;;  %v3391_v42 = vunpack.i.l.bf16 %v3390_v30 }
0x10b5   :  { %v2429_v41 = vsel %vm177_vm2, %v2081_v8, %v3392_v34  ;;  %v1974_v43 = vsel %vm177_vm2, %v1626_v59, %v3391_v42 }
0x10ba   :  { %v3395_v33 = vpop.permute.xlu1 %3394 }
0x10bb   :  { %v3397_v35 = vunpack.i.h.bf16 %v3395_v33  ;;  %v3396_v36 = vunpack.i.l.bf16 %v3395_v33 }
0x10bd   :  { %v2430_v46 = vsel %vm628_vm4, %v2429_v41, %v3397_v35  ;;  %v1975_v47 = vsel %vm628_vm4, %v1974_v43, %v3396_v36 }
0x10c2   :  { %v3400_v40 = vpop.permute.xlu1 %3399 }
0x10c3   :  { %v3402_v44 = vunpack.i.h.bf16 %v3400_v40  ;;  %v3401_v45 = vunpack.i.l.bf16 %v3400_v40 }
0x10c5   :  { %v2431_v48 = vsel %vm630_vm5, %v2430_v46, %v3402_v44  ;;  %v1976_v49 = vsel %vm630_vm5, %v1975_v47, %v3401_v45 }
0x10c6   :  { %v2432_v50 = vpack.c.bf16 %v2431_v48, %v1976_v49 }
0x10c8   :  { %3326 = vmatmul.mubr.msk.bf16.vlgmr.msra.gmra.mrb[76].mxu0 %vm61_vm0, %v2432_v50 }
0x10c9   :  { %3345 = vmatprep.mubr.msk.bf16.mxu0 %vm3526_vm1, %v3525_v14  ;;  %3338 = vmatpush3.bf16.msra.mxu0 %v3419_v23 }
0x10ca   :  { %3339 = vmatprep.subr.bf16.mxu0 %v3525_v14 }
0x10cd   :  { %3340 = vmatpush3.bf16.msra.mxu0 %v3420_v24  ;;  %v2976_v24 = vld [vmem:[%s4272_s12 + $0x1] ss:$0 sm:$0xff] }
0x10ce   :  { %3341 = vmatprep.subr.bf16.mxu0 %v3525_v14 }
0x10d1   :  { %3342 = vmatpush3.bf16.msra.mxu0 %v3421_v25 }
0x10d2   :  { %3343 = vmatprep.subr.bf16.mxu0 %v3525_v14 }
0x10d5   :  { %3344 = vmatpush3.bf16.msra.mxu0 %v3422_v26 }
0x119b   :  { %v2495_v52 = vpop.f32.mrb[76].mxu0 }
0x119c   :  { %v2496_v53 = vadd.f32 %v2950_v51, %v2495_v52  ;;  %v3327_v54 = vpop.f32.mrb[77].mxu0 }
0x119d   :  { %v2498_v55 = vpop.f32.mrb[78].mxu0 }
0x119e   :  { %v2499_v56 = vadd.f32 %v2950_v51, %v2498_v55  ;;  %v3328_v57 = vpop.f32.mrb[79].mxu0  ;;  %v2502_v58 = vadd.f32 %v2496_v53, %v3963_v15 }
0x11a0   :  { %v2508_v59 = vsel %vm61_vm0, %v2502_v58, 0.0  ;;  %v2503_v60 = vadd.f32 %v2499_v56, %v3965_v16  ;;  %v3417_v16 = vld [vmem:[%s4267_s9 + $0x10] sm:$0xff]  }
0x11a1   :  { %2509 = vadd.xlane.f32.xlu0 %v2508_v59  ;;  %3330 = vmatpush3.bf16.msra.mxu1 %v3417_v16 }
0x11a2   :  { %v2511_v32 = vsel %vm61_vm0, %v2503_v60, 0.0  ;;  %3331 = vmatprep.subr.bf16.mxu1 %v3525_v14 }
0x11a3   :  { %2512 = vadd.xlane.f32.xlu1 %v2511_v32 }
0x11a5   :  { %3332 = vmatpush3.bf16.msra.mxu1 %v3418_v4 }
0x11a6   :  { %3349 = vmatprep.subr.bf16.mxu1 %v3525_v14 }
0x122e   :  { %v2510_v61 = vpop.xlane.xlu0 %2509 }
0x122f   :  { %v2514_v62 = vmul.f32 0.03125, %v2510_v61 }
0x1230   :  { %v2513_v37 = vpop.xlane.xlu1 %2512 }
0x1231   :  { %v2516_v38 = vsub.f32 %v2502_v58, %v2514_v62  ;;  %v2515_v63 = vmul.f32 0.03125, %v2513_v37 }
0x1233   :  { %v2517_v0 = vsub.f32 %v2503_v60, %v2515_v63  ;;  %v2518_v1 = vmul.f32 %v2516_v38, %v2516_v38 }
0x1235   :  { %v2520_v2 = vsel %vm61_vm0, %v2518_v1, 0.0  ;;  %v2519_v3 = vmul.f32 %v2517_v0, %v2517_v0 }
0x1236   :  { %2521 = vadd.xlane.f32.xlu0 %v2520_v2 }
0x1237   :  { %v2523_v15 = vsel %vm61_vm0, %v2519_v3, 0.0 }
0x123a   :  { %2524 = vadd.xlane.f32.xlu0 %v2523_v15 }
0x12c3   :  { %v2522_v5 = vpop.xlane.xlu0 %2521 }
0x12c4   :  { %v2526_v6 = vmul.f32 0.03125, %v2522_v5 }
0x12c6   :  { %v2528_v7 = vadd.f32 1e-12, %v2526_v6 }
0x12c7   :  { %v2525_v8 = vpop.xlane.xlu0 %2524 }
0x12c8   :  { %3509 = vrsqrt.f32 %v2528_v7  ;;  %v2527_v9 = vmul.f32 0.03125, %v2525_v8 }
0x12ca   :  { %v2529_v10 = vadd.f32 1e-12, %v2527_v9 }
0x12cc   :  { %3511 = vrsqrt.f32 %v2529_v10 }
0x12d2   :  { %v3510_v11 = vpop.eup %3509 }
0x12d3   :  { %v2532_v12 = vmul.f32 %v3510_v11, %v2516_v38 }
0x12d5   :  { %v2540_v39 = vmul.f32 %v2956_v13, %v2532_v12 }
0x12d6   :  { %v3512_v17 = vpop.eup %3511 }
0x12d7   :  { %v2533_v18 = vmul.f32 %v3512_v17, %v2517_v0  ;;  %v4200_v21 = vadd.f32 %v2957_v19, %v2540_v39 }
0x12d9   :  { %v2541_v20 = vmul.f32 %v2956_v13, %v2533_v18 }
0x12db   :  { %v4202_v31 = vadd.f32 %v2957_v19, %v2541_v20 }
0x12dd   :  { %v2550_v22 = vpack.c.bf16 %v4202_v31, %v4200_v21 }
0x12df   :  { %3334 = vmatmul.mubr.msk.bf16.vlgmr.msra.gmra.mrb[72].mxu1 %vm61_vm0, %v2550_v22 }
0x12e0   :  { %3353 = vmatprep.mubr.msk.bf16.mxu1 %vm3526_vm1, %v3525_v14 }
0x13b2   :  { %v2613_v28 = vpop.f32.mrb[72].mxu1 }
0x13b3   :  { %v2614_v29 = vadd.f32 %v2963_v27, %v2613_v28  ;;  %v3335_v30 = vpop.f32.mrb[73].mxu1 }
0x13b4   :  { %v2616_v33 = vpop.f32.mrb[74].mxu1 }
0x13b5   :  { %v2622_v34 = vmul.f32 0.70710677, %v2614_v29  ;;  %v2617_v42 = vadd.f32 %v2963_v27, %v2616_v33  ;;  %v3336_v35 = vpop.f32.mrb[75].mxu1  ;;  %v2620_v39 = vmul.f32 0.5, %v2614_v29 }
0x13b7   :  { %v2624_v36 = vand.u32 2147483647, %v2622_v34  ;;  %v2623_v40 = vmul.f32 0.70710677, %v2617_v42  ;;  %vm2662_vm9 = vcmp.ge.f32.partialorder %v2622_v34, 0.0  ;;  %v2621_v18 = vmul.f32 0.5, %v2617_v42 }
0x13b9   :  { %v2626_v41 = vmul.f32 0.3275911, %v2624_v36  ;;  %v2625_v43 = vand.u32 2147483647, %v2623_v40  ;;  %v2650_v47 = vsub.f32 0.0, %v2624_v36  ;;  %vm2663_vm10 = vcmp.ge.f32.partialorder %v2623_v40, 0.0 }
0x13bb   :  { %v2628_v44 = vadd.f32 1.0, %v2626_v41  ;;  %v2627_v45 = vmul.f32 0.3275911, %v2625_v43  ;;  %v2651_v48 = vsub.f32 0.0, %v2625_v43  ;;  %v2652_v50 = vmul.f32 %v2650_v47, %v2624_v36 }
0x13bd   :  { %3513 = vrcp.f32 %v2628_v44  ;;  %v2629_v46 = vadd.f32 1.0, %v2627_v45  ;;  %v2653_v54 = vmul.f32 %v2651_v48, %v2625_v43  ;;  %v2654_v55 = vmul.f32 1.442695, %v2652_v50 }
0x13bf   :  { %3515 = vrcp.f32 %v2629_v46  ;;  %v2656_v60 = vmul.f32 1.442695, %v2653_v54 }
0x13c0   :  { %3517 = vpow2.f32 %v2654_v55 }
0x13c1   :  { %3519 = vpow2.f32 %v2656_v60 }
0x13c7   :  { %v3514_v49 = vpop.eup %3513 }
0x13c8   :  { %v2632_v51 = vmul.f32 1.0614054, %v3514_v49 }
0x13c9   :  { %v3516_v52 = vpop.eup %3515 }
0x13ca   :  { %v2634_v53 = vadd.f32 -1.4531521, %v2632_v51  ;;  %v2633_v56 = vmul.f32 1.0614054, %v3516_v52  ;;  %v3518_v15 = vpop.eup %3517 }
0x13cb   :  { %v3520_v6 = vpop.eup %3519 }
0x13cc   :  { %v2636_v57 = vmul.f32 %v3514_v49, %v2634_v53  ;;  %v2635_v58 = vadd.f32 -1.4531521, %v2633_v56 }
0x13ce   :  { %v2638_v59 = vadd.f32 1.4214138, %v2636_v57  ;;  %v2637_v32 = vmul.f32 %v3516_v52, %v2635_v58  ;;  %v2984_v57 = vld [vmem:[%s4273_s13 + $0x1] ss:$0 sm:$0xff] }
0x13d0   :  { %v2640_v61 = vmul.f32 %v3514_v49, %v2638_v59  ;;  %v2639_v62 = vadd.f32 1.4214138, %v2637_v32  ;;  %v2985_v32 = vld [vmem:[%s4274_s14 + $0x1] ss:$0 sm:$0xff] }
0x13d2   :  { %v2642_v37 = vadd.f32 -0.28449672, %v2640_v61  ;;  %v2641_v38 = vmul.f32 %v3516_v52, %v2639_v62 }
0x13d4   :  { %v2644_v63 = vmul.f32 %v3514_v49, %v2642_v37  ;;  %v2643_v0 = vadd.f32 -0.28449672, %v2641_v38 }
0x13d6   :  { %v2646_v1 = vadd.f32 0.2548296, %v2644_v63  ;;  %v2645_v2 = vmul.f32 %v3516_v52, %v2643_v0  ;;  %v2986_v63 = vld [vmem:[%s4276_s16] ss:$0 sm:$0xff] }
0x13d8   :  { %v2648_v3 = vmul.f32 %v3514_v49, %v2646_v1  ;;  %v2647_v16 = vadd.f32 0.2548296, %v2645_v2  ;;  %v3424_v49 = vld [vmem:[%s4275_s15 + $0x8] sm:$0xff]  }
0x13da   :  { %v2658_v4 = vmul.f32 %v3518_v15, %v2648_v3  ;;  %v2649_v5 = vmul.f32 %v3516_v52, %v2647_v16 }
0x13dc   :  { %v2660_v7 = vsub.f32 1.0, %v2658_v4  ;;  %v2659_v8 = vmul.f32 %v3520_v6, %v2649_v5 }
0x13de   :  { %v2664_v9 = vsub.f32 0.0, %v2660_v7  ;;  %v2661_v10 = vsub.f32 1.0, %v2659_v8 }
0x13e0   :  { %v2666_v11 = vsel %vm2662_vm9, %v2660_v7, %v2664_v9  ;;  %v2665_v12 = vsub.f32 0.0, %v2661_v10 }
0x13e1   :  { %v2668_v13 = vadd.f32 1.0, %v2666_v11 }
0x13e2   :  { %v2667_v17 = vsel %vm2663_vm10, %v2661_v10, %v2665_v12 }
0x13e3   :  { %v2669_v19 = vadd.f32 1.0, %v2667_v17  ;;  %v2670_v20 = vmul.f32 %v2668_v13, %v2620_v39 }
0x13e5   :  { %v2671_v22 = vmul.f32 %v2669_v19, %v2621_v18 }
0x13e7   :  { %v2672_v23 = vpack.c.bf16 %v2671_v22, %v2670_v20 }
0x13e9   :  { %3346 = vmatmul.mubr.msk.bf16.vlgmr.msra.gmra.mrb[80].mxu0 %vm1361_vm8, %v2672_v23 }
0x14bc   :  { %v2751_v25 = vpop.f32.mrb[80].mxu0 }
0x14bd   :  { %v2752_v26 = vadd.f32 %v2976_v24, %v2751_v25  ;;  %v3347_v27 = vpop.f32.mrb[81].mxu0 }
0x14be   :  { %v2754_v28 = vpop.f32.mrb[82].mxu0 }
0x14bf   :  { %v2758_v30 = vadd.f32 %v2752_v26, %v4200_v21  ;;  %v2755_v33 = vadd.f32 %v2976_v24, %v2754_v28  ;;  %v3348_v34 = vpop.f32.mrb[83].mxu0 }
0x14c1   :  { %v2759_v29 = vadd.f32 %v2755_v33, %v4202_v31  ;;  %v2764_v42 = vsel %vm61_vm0, %v2758_v30, 0.0  ;;  %v3423_v31 = vld [vmem:[%s4275_s15] sm:$0xff]  }
0x14c2   :  { %2765 = vadd.xlane.f32.xlu0 %v2764_v42  ;;  %3350 = vmatpush3.bf16.msra.mxu1 %v3423_v31 }
0x14c3   :  { %v2767_v35 = vsel %vm61_vm0, %v2759_v29, 0.0  ;;  %3351 = vmatprep.subr.bf16.mxu1 %v3525_v14 }
0x14c4   :  { %2768 = vadd.xlane.f32.xlu1 %v2767_v35 }
0x14c6   :  { %3352 = vmatpush3.bf16.msra.mxu1 %v3424_v49 }
0x154f   :  { %v2766_v36 = vpop.xlane.xlu0 %2765 }
0x1550   :  { %v2770_v40 = vmul.f32 0.03125, %v2766_v36 }
0x1551   :  { %v2769_v41 = vpop.xlane.xlu1 %2768 }
0x1552   :  { %v2772_v43 = vsub.f32 %v2758_v30, %v2770_v40  ;;  %v2771_v44 = vmul.f32 0.03125, %v2769_v41 }
0x1554   :  { %v2773_v45 = vsub.f32 %v2759_v29, %v2771_v44  ;;  %v2774_v46 = vmul.f32 %v2772_v43, %v2772_v43 }
0x1556   :  { %v2776_v47 = vsel %vm61_vm0, %v2774_v46, 0.0  ;;  %v2775_v21 = vmul.f32 %v2773_v45, %v2773_v45 }
0x1557   :  { %2777 = vadd.xlane.f32.xlu0 %v2776_v47 }
0x1558   :  { %v2779_v48 = vsel %vm61_vm0, %v2775_v21, 0.0 }
0x1559   :  { %2780 = vadd.xlane.f32.xlu1 %v2779_v48 }
0x15e4   :  { %v2778_v50 = vpop.xlane.xlu0 %2777 }
0x15e5   :  { %v2782_v51 = vmul.f32 0.03125, %v2778_v50 }
0x15e6   :  { %v2781_v52 = vpop.xlane.xlu1 %2780 }
0x15e7   :  { %v2784_v53 = vadd.f32 1e-12, %v2782_v51  ;;  %v2783_v54 = vmul.f32 0.03125, %v2781_v52 }
0x15e9   :  { %3521 = vrsqrt.f32 %v2784_v53  ;;  %v2785_v55 = vadd.f32 1e-12, %v2783_v54 }
0x15eb   :  { %3523 = vrsqrt.f32 %v2785_v55 }
0x15f3   :  { %v3522_v56 = vpop.eup %3521 }
0x15f4   :  { %v2788_v58 = vmul.f32 %v3522_v56, %v2772_v43 }
0x15f5   :  { %v3524_v14 = vpop.eup %3523 }
0x15f6   :  { %v2796_v59 = vmul.f32 %v2984_v57, %v2788_v58  ;;  %v2789_v60 = vmul.f32 %v3524_v14, %v2773_v45 }
0x15f8   :  { %v2797_v61 = vmul.f32 %v2984_v57, %v2789_v60  ;;  %v2804_v62 = vadd.f32 %v2985_v32, %v2796_v59 }
0x15fa   :  { %v2805_v37 = vadd.f32 %v2985_v32, %v2797_v61 }
0x15fc   :  { %v2806_v38 = vpack.c.bf16 %v2805_v37, %v2804_v62 }
0x15fe   :  { %3354 = vmatmul.mubr.msk.bf16.vlgmr.msra.gmra.mrb[76].mxu1 %vm61_vm0, %v2806_v38 }
0x16d1   :  { %v2867_v0 = vpop.f32.mrb[76].mxu1 }
0x16d2   :  { %v2868_v1 = vadd.f32 %v2986_v63, %v2867_v0  ;;  %v3355_v2 = vpop.f32.mrb[77].mxu1 }
0x16d3   :  { %v2870_v3 = vpop.f32.mrb[78].mxu1 }
0x16d4   :  { %2874 = vst [vmem:[%s4277_s17] sm:$0xff] %v2868_v1  ;;  %v2871_v15 = vadd.f32 %v2986_v63, %v2870_v3  ;;  %v3356_v16 = vpop.f32.mrb[79].mxu1 }
0x16d6   :  { %2875 = vst [vmem:[%s4277_s17 + $0x8] sm:$0xff] %v2871_v15 }

</bundles_post_ra>
